<compile_context>
chip_gen: v7x
topology: tpu7x:2x2x1
jax: 0.10.0
libtpu: 0.0.40
codegen_flags: <defaults>
</compile_context>

<pallas_src>
import functools
import numpy as np
import jax
import jax.numpy as jnp
from jax.experimental import pallas as pl
from jax.experimental.pallas import tpu as pltpu


# -------------------- fused forward kernel --------------------

def _layer_norm(z, g, b):
    mu = jnp.mean(z, axis=-1, keepdims=True)
    var = jnp.mean((z - mu) ** 2, axis=-1, keepdims=True)
    return (z - mu) * jax.lax.rsqrt(var + 1e-5) * g + b


def _fused_forward_kernel(xs_ref, pe_ref, tokw_ref,
                          wq_ref, bq_ref, wk_ref, bk_ref, wv_ref, bv_ref,
                          wo_ref, bo_ref, w1_ref, b1_ref, w2_ref, b2_ref,
                          ln1g_ref, ln1b_ref, ln2g_ref, ln2b_ref,
                          lnfg_ref, lnfb_ref, projw_ref, projb_ref,
                          o_ref, *, n_layers, n_heads, scale, c_out, activation):
    f32 = jnp.float32
    xs = xs_ref[0]                                                           # [L, 3C]

    # TokenEmbedding (circular Conv1d k=3, no bias) as a single matmul + positional add.
    x = jnp.dot(xs, tokw_ref[...], preferred_element_type=f32) + pe_ref[...]  # [L, D]

    for l in range(n_layers):
        # ---- multi-head self attention; heads accumulated into the out-projection so the
        #      result stays a lane-dense [L, D] slab (no head concat / transposes). ----
        wq_l, wk_l, wv_l, wo_l = wq_ref[l], wk_ref[l], wv_ref[l], wo_ref[l]
        bq_l, bk_l, bv_l = bq_ref[l], bk_ref[l], bv_ref[l]
        attn = jnp.zeros_like(x)
        for h in range(n_heads):
            q = jnp.dot(x, wq_l[h], preferred_element_type=f32) + bq_l[h]    # [L, E]
            k = jnp.dot(x, wk_l[h], preferred_element_type=f32) + bk_l[h]    # [L, E]
            v = jnp.dot(x, wv_l[h], preferred_element_type=f32) + bv_l[h]    # [L, E]
            s = jax.lax.dot_general(q, k, (((1,), (1,)), ((), ())),
                                    preferred_element_type=f32) * scale      # [L, L]
            s = s - jnp.max(s, axis=-1, keepdims=True)
            p = jnp.exp(s)
            p = p * pl.reciprocal(jnp.sum(p, axis=-1, keepdims=True), approx=True)
            oh = jnp.dot(p, v, preferred_element_type=f32)                   # [L, E]
            attn = attn + jnp.dot(oh, wo_l[h], preferred_element_type=f32)   # [L, D]
        attn = attn + bo_ref[l]
        x = _layer_norm(x + attn, ln1g_ref[l], ln1b_ref[l])                  # norm1(x + attn)

        # ---- position-wise FFN: Linear(D->F) -> act -> Linear(F->D) ----
        hdn = jnp.dot(x, w1_ref[l], preferred_element_type=f32) + b1_ref[l]  # [L, F]
        if activation == "relu":
            hdn = jnp.maximum(hdn, 0.0)
        else:  # exact GELU, matches torch.nn.functional.gelu default
            hdn = jax.nn.gelu(hdn, approximate=False)
        y = jnp.dot(hdn, w2_ref[l], preferred_element_type=f32) + b2_ref[l]  # [L, D]
        x = _layer_norm(x + y, ln2g_ref[l], ln2b_ref[l])                     # norm2(x + ffn)

    # final encoder LayerNorm
    x = _layer_norm(x, lnfg_ref[...], lnfb_ref[...])

    # projection(enc_out).permute(0,2,1)[:, :, :c_out]  -> only the first c_out sequence
    # positions are ever used; emit the [c_out, pred_len] block (transposed once outside).
    xc = x[:c_out, :]                                                        # [c_out, D]
    o_ref[0] = (jnp.dot(xc, projw_ref[...], preferred_element_type=f32)
                + projb_ref[...])                                            # [c_out, P]


# -------------------- parameter construction (deterministic) --------------------

def _init(key, shape, scale=0.05):
    return scale * jax.random.normal(key, shape, dtype=jnp.float32)


def sinusoidal_pe(seq_len, d_model):
    pe = np.zeros((seq_len, d_model), dtype=np.float32)
    position = np.arange(0, seq_len, dtype=np.float32)[:, None]
    div_term = np.exp(np.arange(0, d_model, 2, dtype=np.float32)
                      * -(np.log(10000.0) / d_model))
    pe[:, 0::2] = np.sin(position * div_term)
    pe[:, 1::2] = np.cos(position * div_term)
    return jnp.asarray(pe)


def make_params(cfg, key):
    D, F, C = cfg["d_model"], cfg["d_ff"], cfg["enc_in"]
    H, P, NL = cfg["n_heads"], cfg["pred_len"], cfg["e_layers"]
    E = D // H
    keys = iter(jax.random.split(key, 4 + 12 * NL))

    def head_cols(w):   # [D, H*E] (output col = h*E + e) -> [H, D, E]
        return w.reshape(D, H, E).transpose(1, 0, 2)

    names = ("wq", "bq", "wk", "bk", "wv", "bv", "wo", "bo",
             "w1", "b1", "w2", "b2", "ln1_g", "ln1_b", "ln2_g", "ln2_b")
    lay = {n: [] for n in names}
    for _ in range(NL):
        lay["wq"].append(head_cols(_init(next(keys), (D, D))))
        lay["bq"].append(_init(next(keys), (D,)).reshape(H, 1, E))
        lay["wk"].append(head_cols(_init(next(keys), (D, D))))
        lay["bk"].append(_init(next(keys), (D,)).reshape(H, 1, E))
        lay["wv"].append(head_cols(_init(next(keys), (D, D))))
        lay["bv"].append(_init(next(keys), (D,)).reshape(H, 1, E))
        lay["wo"].append(_init(next(keys), (D, D)).reshape(H, E, D))  # rows grouped by head
        lay["bo"].append(_init(next(keys), (D,)).reshape(1, D))
        lay["w1"].append(_init(next(keys), (D, F)))
        lay["b1"].append(_init(next(keys), (F,)).reshape(1, F))
        lay["w2"].append(_init(next(keys), (F, D)))
        lay["b2"].append(_init(next(keys), (D,)).reshape(1, D))
        lay["ln1_g"].append(jnp.ones((1, D), jnp.float32))
        lay["ln1_b"].append(jnp.zeros((1, D), jnp.float32))
        lay["ln2_g"].append(jnp.ones((1, D), jnp.float32))
        lay["ln2_b"].append(jnp.zeros((1, D), jnp.float32))

    params = {n: jnp.stack(v) for n, v in lay.items()}
    params.update(
        # TokenEmbedding Conv1d(C -> D, k=3, circular, bias=False), flattened as [3C, D]
        # with row block k holding W[:, :, k].T (tap k <-> [x_prev, x, x_next] block k).
        # TODO(synk): verify this tap/row ordering when importing real PyTorch Conv1d weights.
        tok_w=_init(next(keys), (3 * C, D)),
        pe=sinusoidal_pe(cfg["seq_len"], D),
        lnf_g=jnp.ones((1, D), jnp.float32),
        lnf_b=jnp.zeros((1, D), jnp.float32),
        proj_w=_init(next(keys), (D, P)),
        proj_b=_init(next(keys), (1, P)),
    )
    return params


# -------------------- model forward --------------------

def transformer_forward(x_enc, params, cfg):
    B, L, C = x_enc.shape
    D, P = cfg["d_model"], cfg["pred_len"]
    H, NL, c_out = cfg["n_heads"], cfg["e_layers"], cfg["c_out"]
    E = D // H

    # circular Conv1d taps packed lane-wise: [x[t-1], x[t], x[t+1]]  -> [B, L, 3C]
    xs = jnp.concatenate(
        [jnp.roll(x_enc, 1, axis=1), x_enc, jnp.roll(x_enc, -1, axis=1)], axis=-1)

    kernel = functools.partial(
        _fused_forward_kernel,
        n_layers=NL, n_heads=H, scale=1.0 / float(np.sqrt(E)),
        c_out=c_out, activation=cfg["activation"])

    vmem = pl.BlockSpec(memory_space=pltpu.MemorySpace.VMEM)   # untiled, VMEM-resident
    out = pl.pallas_call(
        kernel,
        grid=(B,),
        out_shape=jax.ShapeDtypeStruct((B, c_out, P), jnp.float32),
        in_specs=[pl.BlockSpec((1, L, 3 * C), lambda b: (b, 0, 0))] + [vmem] * 22,
        out_specs=pl.BlockSpec((1, c_out, P), lambda b: (b, 0, 0)),
        compiler_params=pltpu.CompilerParams(dimension_semantics=("parallel",)),
    )(xs, params["pe"], params["tok_w"],
      params["wq"], params["bq"], params["wk"], params["bk"],
      params["wv"], params["bv"], params["wo"], params["bo"],
      params["w1"], params["b1"], params["w2"], params["b2"],
      params["ln1_g"], params["ln1_b"], params["ln2_g"], params["ln2_b"],
      params["lnf_g"], params["lnf_b"], params["proj_w"], params["proj_b"])

    # [B, c_out, pred_len] -> [B, pred_len, c_out]  (single tiny XLA transpose)
    return out.transpose(0, 2, 1)


# -------------------- main --------------------

if __name__ == "__main__":
    cfg = dict(
        enc_in=4, seq_len=16, pred_len=8, c_out=4,
        d_model=32, n_heads=4, d_ff=64, e_layers=2,
        activation="relu", dropout=0.0, output_attention=False,
    )
    key = jax.random.PRNGKey(0)
    k_param, k_x = jax.random.split(key)
    params = make_params(cfg, k_param)
    x_enc = jax.random.normal(k_x, (2, cfg["seq_len"], cfg["enc_in"]), dtype=jnp.float32)

    fwd = jax.jit(functools.partial(transformer_forward, cfg=cfg))
    out = jax.block_until_ready(fwd(x_enc, params))
    assert out.shape == (2, cfg["pred_len"], cfg["c_out"]), out.shape
    assert bool(jnp.all(jnp.isfinite(out)))
    print("KERNEL_OK")
</pallas_src>

<mosaic_0001>
module attributes {stable_mosaic.version = 11 : i64} {
  func.func @_fused_forward_kernel(%arg0: i32, %arg1: memref<1x16x12xf32, #tpu.memory_space<vmem>>, %arg2: memref<16x32xf32, #tpu.memory_space<vmem>>, %arg3: memref<12x32xf32, #tpu.memory_space<vmem>>, %arg4: memref<2x4x32x8xf32, #tpu.memory_space<vmem>>, %arg5: memref<2x4x1x8xf32, #tpu.memory_space<vmem>>, %arg6: memref<2x4x32x8xf32, #tpu.memory_space<vmem>>, %arg7: memref<2x4x1x8xf32, #tpu.memory_space<vmem>>, %arg8: memref<2x4x32x8xf32, #tpu.memory_space<vmem>>, %arg9: memref<2x4x1x8xf32, #tpu.memory_space<vmem>>, %arg10: memref<2x4x8x32xf32, #tpu.memory_space<vmem>>, %arg11: memref<2x1x32xf32, #tpu.memory_space<vmem>>, %arg12: memref<2x32x64xf32, #tpu.memory_space<vmem>>, %arg13: memref<2x1x64xf32, #tpu.memory_space<vmem>>, %arg14: memref<2x64x32xf32, #tpu.memory_space<vmem>>, %arg15: memref<2x1x32xf32, #tpu.memory_space<vmem>>, %arg16: memref<2x1x32xf32, #tpu.memory_space<vmem>>, %arg17: memref<2x1x32xf32, #tpu.memory_space<vmem>>, %arg18: memref<2x1x32xf32, #tpu.memory_space<vmem>>, %arg19: memref<2x1x32xf32, #tpu.memory_space<vmem>>, %arg20: memref<1x32xf32, #tpu.memory_space<vmem>>, %arg21: memref<1x32xf32, #tpu.memory_space<vmem>>, %arg22: memref<32x8xf32, #tpu.memory_space<vmem>>, %arg23: memref<1x8xf32, #tpu.memory_space<vmem>>, %arg24: memref<1x4x8xf32, #tpu.memory_space<vmem>>) attributes {dimension_semantics = [#tpu.dimension_semantics<parallel>], iteration_bounds = array<i64: 2>, scalar_prefetch = 0 : i64, scratch_operands = 0 : i64, tpu.core_type = #tpu.core_type<tc>, window_params = [{transform_indices = @transform_0, window_bounds = array<i64: 1, 16, 12>}, {pipeline_mode = #tpu.pipeline_mode<synchronous>, transform_indices = @transform_1, window_bounds = array<i64: 16, 32>}, {pipeline_mode = #tpu.pipeline_mode<synchronous>, transform_indices = @transform_2, window_bounds = array<i64: 12, 32>}, {pipeline_mode = #tpu.pipeline_mode<synchronous>, transform_indices = @transform_3, window_bounds = array<i64: 2, 4, 32, 8>}, {pipeline_mode = #tpu.pipeline_mode<synchronous>, transform_indices = @transform_4, window_bounds = array<i64: 2, 4, 1, 8>}, {pipeline_mode = #tpu.pipeline_mode<synchronous>, transform_indices = @transform_5, window_bounds = array<i64: 2, 4, 32, 8>}, {pipeline_mode = #tpu.pipeline_mode<synchronous>, transform_indices = @transform_6, window_bounds = array<i64: 2, 4, 1, 8>}, {pipeline_mode = #tpu.pipeline_mode<synchronous>, transform_indices = @transform_7, window_bounds = array<i64: 2, 4, 32, 8>}, {pipeline_mode = #tpu.pipeline_mode<synchronous>, transform_indices = @transform_8, window_bounds = array<i64: 2, 4, 1, 8>}, {pipeline_mode = #tpu.pipeline_mode<synchronous>, transform_indices = @transform_9, window_bounds = array<i64: 2, 4, 8, 32>}, {pipeline_mode = #tpu.pipeline_mode<synchronous>, transform_indices = @transform_10, window_bounds = array<i64: 2, 1, 32>}, {pipeline_mode = #tpu.pipeline_mode<synchronous>, transform_indices = @transform_11, window_bounds = array<i64: 2, 32, 64>}, {pipeline_mode = #tpu.pipeline_mode<synchronous>, transform_indices = @transform_12, window_bounds = array<i64: 2, 1, 64>}, {pipeline_mode = #tpu.pipeline_mode<synchronous>, transform_indices = @transform_13, window_bounds = array<i64: 2, 64, 32>}, {pipeline_mode = #tpu.pipeline_mode<synchronous>, transform_indices = @transform_14, window_bounds = array<i64: 2, 1, 32>}, {pipeline_mode = #tpu.pipeline_mode<synchronous>, transform_indices = @transform_15, window_bounds = array<i64: 2, 1, 32>}, {pipeline_mode = #tpu.pipeline_mode<synchronous>, transform_indices = @transform_16, window_bounds = array<i64: 2, 1, 32>}, {pipeline_mode = #tpu.pipeline_mode<synchronous>, transform_indices = @transform_17, window_bounds = array<i64: 2, 1, 32>}, {pipeline_mode = #tpu.pipeline_mode<synchronous>, transform_indices = @transform_18, window_bounds = array<i64: 2, 1, 32>}, {pipeline_mode = #tpu.pipeline_mode<synchronous>, transform_indices = @transform_19, window_bounds = array<i64: 1, 32>}, {pipeline_mode = #tpu.pipeline_mode<synchronous>, transform_indices = @transform_20, window_bounds = array<i64: 1, 32>}, {pipeline_mode = #tpu.pipeline_mode<synchronous>, transform_indices = @transform_21, window_bounds = array<i64: 32, 8>}, {pipeline_mode = #tpu.pipeline_mode<synchronous>, transform_indices = @transform_22, window_bounds = array<i64: 1, 8>}, {transform_indices = @transform_23, window_bounds = array<i64: 1, 4, 8>}]} {
    %c0 = arith.constant 0 : index
    %c0_0 = arith.constant 0 : index
    %c0_1 = arith.constant 0 : index
    %0 = vector.load %arg1[%c0, %c0_0, %c0_1] : memref<1x16x12xf32, #tpu.memory_space<vmem>>, vector<1x16x12xf32>
    %1 = vector.shape_cast %0 : vector<1x16x12xf32> to vector<16x12xf32>
    %c0_2 = arith.constant 0 : index
    %c0_3 = arith.constant 0 : index
    %2 = vector.load %arg3[%c0_2, %c0_3] : memref<12x32xf32, #tpu.memory_space<vmem>>, vector<12x32xf32>
    %cst = arith.constant dense<0.000000e+00> : vector<16x32xf32>
    %3 = tpu.matmul %1, %2, %cst {dimension_numbers = #tpu.dot_dimension_numbers<[1], [0], [0], [1], [0, 0, 1, 1], [], []>} : vector<16x12xf32>, vector<12x32xf32>, vector<16x32xf32> -> vector<16x32xf32>
    %c0_4 = arith.constant 0 : index
    %c0_5 = arith.constant 0 : index
    %4 = vector.load %arg2[%c0_4, %c0_5] : memref<16x32xf32, #tpu.memory_space<vmem>>, vector<16x32xf32>
    %5 = arith.addf %3, %4 : vector<16x32xf32>
    %c0_6 = arith.constant 0 : index
    %c0_7 = arith.constant 0 : index
    %c0_8 = arith.constant 0 : index
    %c0_9 = arith.constant 0 : index
    %6 = vector.load %arg4[%c0_6, %c0_7, %c0_8, %c0_9] : memref<2x4x32x8xf32, #tpu.memory_space<vmem>>, vector<1x4x32x8xf32>
    %7 = vector.shape_cast %6 : vector<1x4x32x8xf32> to vector<4x32x8xf32>
    %c0_10 = arith.constant 0 : index
    %c0_11 = arith.constant 0 : index
    %c0_12 = arith.constant 0 : index
    %c0_13 = arith.constant 0 : index
    %8 = vector.load %arg6[%c0_10, %c0_11, %c0_12, %c0_13] : memref<2x4x32x8xf32, #tpu.memory_space<vmem>>, vector<1x4x32x8xf32>
    %9 = vector.shape_cast %8 : vector<1x4x32x8xf32> to vector<4x32x8xf32>
    %c0_14 = arith.constant 0 : index
    %c0_15 = arith.constant 0 : index
    %c0_16 = arith.constant 0 : index
    %c0_17 = arith.constant 0 : index
    %10 = vector.load %arg8[%c0_14, %c0_15, %c0_16, %c0_17] : memref<2x4x32x8xf32, #tpu.memory_space<vmem>>, vector<1x4x32x8xf32>
    %11 = vector.shape_cast %10 : vector<1x4x32x8xf32> to vector<4x32x8xf32>
    %c0_18 = arith.constant 0 : index
    %c0_19 = arith.constant 0 : index
    %c0_20 = arith.constant 0 : index
    %c0_21 = arith.constant 0 : index
    %12 = vector.load %arg10[%c0_18, %c0_19, %c0_20, %c0_21] : memref<2x4x8x32xf32, #tpu.memory_space<vmem>>, vector<1x4x8x32xf32>
    %13 = vector.shape_cast %12 : vector<1x4x8x32xf32> to vector<4x8x32xf32>
    %c0_22 = arith.constant 0 : index
    %c0_23 = arith.constant 0 : index
    %c0_24 = arith.constant 0 : index
    %c0_25 = arith.constant 0 : index
    %14 = vector.load %arg5[%c0_22, %c0_23, %c0_24, %c0_25] : memref<2x4x1x8xf32, #tpu.memory_space<vmem>>, vector<1x4x1x8xf32>
    %15 = vector.shape_cast %14 : vector<1x4x1x8xf32> to vector<4x1x8xf32>
    %c0_26 = arith.constant 0 : index
    %c0_27 = arith.constant 0 : index
    %c0_28 = arith.constant 0 : index
    %c0_29 = arith.constant 0 : index
    %16 = vector.load %arg7[%c0_26, %c0_27, %c0_28, %c0_29] : memref<2x4x1x8xf32, #tpu.memory_space<vmem>>, vector<1x4x1x8xf32>
    %17 = vector.shape_cast %16 : vector<1x4x1x8xf32> to vector<4x1x8xf32>
    %c0_30 = arith.constant 0 : index
    %c0_31 = arith.constant 0 : index
    %c0_32 = arith.constant 0 : index
    %c0_33 = arith.constant 0 : index
    %18 = vector.load %arg9[%c0_30, %c0_31, %c0_32, %c0_33] : memref<2x4x1x8xf32, #tpu.memory_space<vmem>>, vector<1x4x1x8xf32>
    %19 = vector.shape_cast %18 : vector<1x4x1x8xf32> to vector<4x1x8xf32>
    %cst_34 = arith.constant 0.000000e+00 : f32
    %20 = vector.broadcast %cst_34 : f32 to vector<16x32xf32>
    %21 = vector.extract_strided_slice %7 {offsets = [0, 0, 0], sizes = [1, 32, 8], strides = [1, 1, 1]} : vector<4x32x8xf32> to vector<1x32x8xf32>
    %22 = vector.shape_cast %21 : vector<1x32x8xf32> to vector<32x8xf32>
    %cst_35 = arith.constant dense<0.000000e+00> : vector<16x8xf32>
    %23 = tpu.matmul %5, %22, %cst_35 {dimension_numbers = #tpu.dot_dimension_numbers<[1], [0], [0], [1], [0, 0, 1, 1], [], []>} : vector<16x32xf32>, vector<32x8xf32>, vector<16x8xf32> -> vector<16x8xf32>
    %24 = vector.extract_strided_slice %15 {offsets = [0, 0, 0], sizes = [1, 1, 8], strides = [1, 1, 1]} : vector<4x1x8xf32> to vector<1x1x8xf32>
    %25 = vector.shape_cast %24 : vector<1x1x8xf32> to vector<1x8xf32>
    %26 = vector.broadcast %25 : vector<1x8xf32> to vector<16x8xf32>
    %27 = arith.addf %23, %26 : vector<16x8xf32>
    %28 = vector.extract_strided_slice %9 {offsets = [0, 0, 0], sizes = [1, 32, 8], strides = [1, 1, 1]} : vector<4x32x8xf32> to vector<1x32x8xf32>
    %29 = vector.shape_cast %28 : vector<1x32x8xf32> to vector<32x8xf32>
    %cst_36 = arith.constant dense<0.000000e+00> : vector<16x8xf32>
    %30 = tpu.matmul %5, %29, %cst_36 {dimension_numbers = #tpu.dot_dimension_numbers<[1], [0], [0], [1], [0, 0, 1, 1], [], []>} : vector<16x32xf32>, vector<32x8xf32>, vector<16x8xf32> -> vector<16x8xf32>
    %31 = vector.extract_strided_slice %17 {offsets = [0, 0, 0], sizes = [1, 1, 8], strides = [1, 1, 1]} : vector<4x1x8xf32> to vector<1x1x8xf32>
    %32 = vector.shape_cast %31 : vector<1x1x8xf32> to vector<1x8xf32>
    %33 = vector.broadcast %32 : vector<1x8xf32> to vector<16x8xf32>
    %34 = arith.addf %30, %33 : vector<16x8xf32>
    %35 = vector.extract_strided_slice %11 {offsets = [0, 0, 0], sizes = [1, 32, 8], strides = [1, 1, 1]} : vector<4x32x8xf32> to vector<1x32x8xf32>
    %36 = vector.shape_cast %35 : vector<1x32x8xf32> to vector<32x8xf32>
    %cst_37 = arith.constant dense<0.000000e+00> : vector<16x8xf32>
    %37 = tpu.matmul %5, %36, %cst_37 {dimension_numbers = #tpu.dot_dimension_numbers<[1], [0], [0], [1], [0, 0, 1, 1], [], []>} : vector<16x32xf32>, vector<32x8xf32>, vector<16x8xf32> -> vector<16x8xf32>
    %38 = vector.extract_strided_slice %19 {offsets = [0, 0, 0], sizes = [1, 1, 8], strides = [1, 1, 1]} : vector<4x1x8xf32> to vector<1x1x8xf32>
    %39 = vector.shape_cast %38 : vector<1x1x8xf32> to vector<1x8xf32>
    %40 = vector.broadcast %39 : vector<1x8xf32> to vector<16x8xf32>
    %41 = arith.addf %37, %40 : vector<16x8xf32>
    %cst_38 = arith.constant dense<0.000000e+00> : vector<16x16xf32>
    %42 = tpu.matmul %27, %34, %cst_38 {dimension_numbers = #tpu.dot_dimension_numbers<[1], [1], [0], [0], [0, 0, 1, 0], [], []>} : vector<16x8xf32>, vector<16x8xf32>, vector<16x16xf32> -> vector<16x16xf32>
    %cst_39 = arith.constant 0.353553385 : f32
    %43 = vector.broadcast %cst_39 : f32 to vector<16x16xf32>
    %44 = arith.mulf %42, %43 : vector<16x16xf32>
    %cst_40 = arith.constant dense<0xFF800000> : vector<16xf32>
    %45 = vector.multi_reduction <maximumf>, %44, %cst_40 [1] : vector<16x16xf32> to vector<16xf32>
    %46 = vector.shape_cast %45 : vector<16xf32> to vector<16x1xf32>
    %47 = vector.broadcast %46 : vector<16x1xf32> to vector<16x16xf32>
    %48 = arith.subf %44, %47 : vector<16x16xf32>
    %49 = math.exp %48 : vector<16x16xf32>
    %cst_41 = arith.constant dense<0.000000e+00> : vector<16xf32>
    %50 = vector.multi_reduction <add>, %49, %cst_41 [1] : vector<16x16xf32> to vector<16xf32>
    %51 = vector.shape_cast %50 : vector<16xf32> to vector<16x1xf32>
    %52 = tpu.reciprocal %51 {approx = true} : vector<16x1xf32> -> vector<16x1xf32>
    %53 = vector.broadcast %52 : vector<16x1xf32> to vector<16x16xf32>
    %54 = arith.mulf %49, %53 : vector<16x16xf32>
    %cst_42 = arith.constant dense<0.000000e+00> : vector<16x8xf32>
    %55 = tpu.matmul %54, %41, %cst_42 {dimension_numbers = #tpu.dot_dimension_numbers<[1], [0], [0], [1], [0, 0, 1, 1], [], []>} : vector<16x16xf32>, vector<16x8xf32>, vector<16x8xf32> -> vector<16x8xf32>
    %56 = vector.extract_strided_slice %13 {offsets = [0, 0, 0], sizes = [1, 8, 32], strides = [1, 1, 1]} : vector<4x8x32xf32> to vector<1x8x32xf32>
    %57 = vector.shape_cast %56 : vector<1x8x32xf32> to vector<8x32xf32>
    %cst_43 = arith.constant dense<0.000000e+00> : vector<16x32xf32>
    %58 = tpu.matmul %55, %57, %cst_43 {dimension_numbers = #tpu.dot_dimension_numbers<[1], [0], [0], [1], [0, 0, 1, 1], [], []>} : vector<16x8xf32>, vector<8x32xf32>, vector<16x32xf32> -> vector<16x32xf32>
    %59 = arith.addf %20, %58 : vector<16x32xf32>
    %60 = vector.extract_strided_slice %7 {offsets = [1, 0, 0], sizes = [1, 32, 8], strides = [1, 1, 1]} : vector<4x32x8xf32> to vector<1x32x8xf32>
    %61 = vector.shape_cast %60 : vector<1x32x8xf32> to vector<32x8xf32>
    %cst_44 = arith.constant dense<0.000000e+00> : vector<16x8xf32>
    %62 = tpu.matmul %5, %61, %cst_44 {dimension_numbers = #tpu.dot_dimension_numbers<[1], [0], [0], [1], [0, 0, 1, 1], [], []>} : vector<16x32xf32>, vector<32x8xf32>, vector<16x8xf32> -> vector<16x8xf32>
    %63 = vector.extract_strided_slice %15 {offsets = [1, 0, 0], sizes = [1, 1, 8], strides = [1, 1, 1]} : vector<4x1x8xf32> to vector<1x1x8xf32>
    %64 = vector.shape_cast %63 : vector<1x1x8xf32> to vector<1x8xf32>
    %65 = vector.broadcast %64 : vector<1x8xf32> to vector<16x8xf32>
    %66 = arith.addf %62, %65 : vector<16x8xf32>
    %67 = vector.extract_strided_slice %9 {offsets = [1, 0, 0], sizes = [1, 32, 8], strides = [1, 1, 1]} : vector<4x32x8xf32> to vector<1x32x8xf32>
    %68 = vector.shape_cast %67 : vector<1x32x8xf32> to vector<32x8xf32>
    %cst_45 = arith.constant dense<0.000000e+00> : vector<16x8xf32>
    %69 = tpu.matmul %5, %68, %cst_45 {dimension_numbers = #tpu.dot_dimension_numbers<[1], [0], [0], [1], [0, 0, 1, 1], [], []>} : vector<16x32xf32>, vector<32x8xf32>, vector<16x8xf32> -> vector<16x8xf32>
    %70 = vector.extract_strided_slice %17 {offsets = [1, 0, 0], sizes = [1, 1, 8], strides = [1, 1, 1]} : vector<4x1x8xf32> to vector<1x1x8xf32>
    %71 = vector.shape_cast %70 : vector<1x1x8xf32> to vector<1x8xf32>
    %72 = vector.broadcast %71 : vector<1x8xf32> to vector<16x8xf32>
    %73 = arith.addf %69, %72 : vector<16x8xf32>
    %74 = vector.extract_strided_slice %11 {offsets = [1, 0, 0], sizes = [1, 32, 8], strides = [1, 1, 1]} : vector<4x32x8xf32> to vector<1x32x8xf32>
    %75 = vector.shape_cast %74 : vector<1x32x8xf32> to vector<32x8xf32>
    %cst_46 = arith.constant dense<0.000000e+00> : vector<16x8xf32>
    %76 = tpu.matmul %5, %75, %cst_46 {dimension_numbers = #tpu.dot_dimension_numbers<[1], [0], [0], [1], [0, 0, 1, 1], [], []>} : vector<16x32xf32>, vector<32x8xf32>, vector<16x8xf32> -> vector<16x8xf32>
    %77 = vector.extract_strided_slice %19 {offsets = [1, 0, 0], sizes = [1, 1, 8], strides = [1, 1, 1]} : vector<4x1x8xf32> to vector<1x1x8xf32>
    %78 = vector.shape_cast %77 : vector<1x1x8xf32> to vector<1x8xf32>
    %79 = vector.broadcast %78 : vector<1x8xf32> to vector<16x8xf32>
    %80 = arith.addf %76, %79 : vector<16x8xf32>
    %cst_47 = arith.constant dense<0.000000e+00> : vector<16x16xf32>
    %81 = tpu.matmul %66, %73, %cst_47 {dimension_numbers = #tpu.dot_dimension_numbers<[1], [1], [0], [0], [0, 0, 1, 0], [], []>} : vector<16x8xf32>, vector<16x8xf32>, vector<16x16xf32> -> vector<16x16xf32>
    %cst_48 = arith.constant 0.353553385 : f32
    %82 = vector.broadcast %cst_48 : f32 to vector<16x16xf32>
    %83 = arith.mulf %81, %82 : vector<16x16xf32>
    %cst_49 = arith.constant dense<0xFF800000> : vector<16xf32>
    %84 = vector.multi_reduction <maximumf>, %83, %cst_49 [1] : vector<16x16xf32> to vector<16xf32>
    %85 = vector.shape_cast %84 : vector<16xf32> to vector<16x1xf32>
    %86 = vector.broadcast %85 : vector<16x1xf32> to vector<16x16xf32>
    %87 = arith.subf %83, %86 : vector<16x16xf32>
    %88 = math.exp %87 : vector<16x16xf32>
    %cst_50 = arith.constant dense<0.000000e+00> : vector<16xf32>
    %89 = vector.multi_reduction <add>, %88, %cst_50 [1] : vector<16x16xf32> to vector<16xf32>
    %90 = vector.shape_cast %89 : vector<16xf32> to vector<16x1xf32>
    %91 = tpu.reciprocal %90 {approx = true} : vector<16x1xf32> -> vector<16x1xf32>
    %92 = vector.broadcast %91 : vector<16x1xf32> to vector<16x16xf32>
    %93 = arith.mulf %88, %92 : vector<16x16xf32>
    %cst_51 = arith.constant dense<0.000000e+00> : vector<16x8xf32>
    %94 = tpu.matmul %93, %80, %cst_51 {dimension_numbers = #tpu.dot_dimension_numbers<[1], [0], [0], [1], [0, 0, 1, 1], [], []>} : vector<16x16xf32>, vector<16x8xf32>, vector<16x8xf32> -> vector<16x8xf32>
    %95 = vector.extract_strided_slice %13 {offsets = [1, 0, 0], sizes = [1, 8, 32], strides = [1, 1, 1]} : vector<4x8x32xf32> to vector<1x8x32xf32>
    %96 = vector.shape_cast %95 : vector<1x8x32xf32> to vector<8x32xf32>
    %cst_52 = arith.constant dense<0.000000e+00> : vector<16x32xf32>
    %97 = tpu.matmul %94, %96, %cst_52 {dimension_numbers = #tpu.dot_dimension_numbers<[1], [0], [0], [1], [0, 0, 1, 1], [], []>} : vector<16x8xf32>, vector<8x32xf32>, vector<16x32xf32> -> vector<16x32xf32>
    %98 = arith.addf %59, %97 : vector<16x32xf32>
    %99 = vector.extract_strided_slice %7 {offsets = [2, 0, 0], sizes = [1, 32, 8], strides = [1, 1, 1]} : vector<4x32x8xf32> to vector<1x32x8xf32>
    %100 = vector.shape_cast %99 : vector<1x32x8xf32> to vector<32x8xf32>
    %cst_53 = arith.constant dense<0.000000e+00> : vector<16x8xf32>
    %101 = tpu.matmul %5, %100, %cst_53 {dimension_numbers = #tpu.dot_dimension_numbers<[1], [0], [0], [1], [0, 0, 1, 1], [], []>} : vector<16x32xf32>, vector<32x8xf32>, vector<16x8xf32> -> vector<16x8xf32>
    %102 = vector.extract_strided_slice %15 {offsets = [2, 0, 0], sizes = [1, 1, 8], strides = [1, 1, 1]} : vector<4x1x8xf32> to vector<1x1x8xf32>
    %103 = vector.shape_cast %102 : vector<1x1x8xf32> to vector<1x8xf32>
    %104 = vector.broadcast %103 : vector<1x8xf32> to vector<16x8xf32>
    %105 = arith.addf %101, %104 : vector<16x8xf32>
    %106 = vector.extract_strided_slice %9 {offsets = [2, 0, 0], sizes = [1, 32, 8], strides = [1, 1, 1]} : vector<4x32x8xf32> to vector<1x32x8xf32>
    %107 = vector.shape_cast %106 : vector<1x32x8xf32> to vector<32x8xf32>
    %cst_54 = arith.constant dense<0.000000e+00> : vector<16x8xf32>
    %108 = tpu.matmul %5, %107, %cst_54 {dimension_numbers = #tpu.dot_dimension_numbers<[1], [0], [0], [1], [0, 0, 1, 1], [], []>} : vector<16x32xf32>, vector<32x8xf32>, vector<16x8xf32> -> vector<16x8xf32>
    %109 = vector.extract_strided_slice %17 {offsets = [2, 0, 0], sizes = [1, 1, 8], strides = [1, 1, 1]} : vector<4x1x8xf32> to vector<1x1x8xf32>
    %110 = vector.shape_cast %109 : vector<1x1x8xf32> to vector<1x8xf32>
    %111 = vector.broadcast %110 : vector<1x8xf32> to vector<16x8xf32>
    %112 = arith.addf %108, %111 : vector<16x8xf32>
    %113 = vector.extract_strided_slice %11 {offsets = [2, 0, 0], sizes = [1, 32, 8], strides = [1, 1, 1]} : vector<4x32x8xf32> to vector<1x32x8xf32>
    %114 = vector.shape_cast %113 : vector<1x32x8xf32> to vector<32x8xf32>
    %cst_55 = arith.constant dense<0.000000e+00> : vector<16x8xf32>
    %115 = tpu.matmul %5, %114, %cst_55 {dimension_numbers = #tpu.dot_dimension_numbers<[1], [0], [0], [1], [0, 0, 1, 1], [], []>} : vector<16x32xf32>, vector<32x8xf32>, vector<16x8xf32> -> vector<16x8xf32>
    %116 = vector.extract_strided_slice %19 {offsets = [2, 0, 0], sizes = [1, 1, 8], strides = [1, 1, 1]} : vector<4x1x8xf32> to vector<1x1x8xf32>
    %117 = vector.shape_cast %116 : vector<1x1x8xf32> to vector<1x8xf32>
    %118 = vector.broadcast %117 : vector<1x8xf32> to vector<16x8xf32>
    %119 = arith.addf %115, %118 : vector<16x8xf32>
    %cst_56 = arith.constant dense<0.000000e+00> : vector<16x16xf32>
    %120 = tpu.matmul %105, %112, %cst_56 {dimension_numbers = #tpu.dot_dimension_numbers<[1], [1], [0], [0], [0, 0, 1, 0], [], []>} : vector<16x8xf32>, vector<16x8xf32>, vector<16x16xf32> -> vector<16x16xf32>
    %cst_57 = arith.constant 0.353553385 : f32
    %121 = vector.broadcast %cst_57 : f32 to vector<16x16xf32>
    %122 = arith.mulf %120, %121 : vector<16x16xf32>
    %cst_58 = arith.constant dense<0xFF800000> : vector<16xf32>
    %123 = vector.multi_reduction <maximumf>, %122, %cst_58 [1] : vector<16x16xf32> to vector<16xf32>
    %124 = vector.shape_cast %123 : vector<16xf32> to vector<16x1xf32>
    %125 = vector.broadcast %124 : vector<16x1xf32> to vector<16x16xf32>
    %126 = arith.subf %122, %125 : vector<16x16xf32>
    %127 = math.exp %126 : vector<16x16xf32>
    %cst_59 = arith.constant dense<0.000000e+00> : vector<16xf32>
    %128 = vector.multi_reduction <add>, %127, %cst_59 [1] : vector<16x16xf32> to vector<16xf32>
    %129 = vector.shape_cast %128 : vector<16xf32> to vector<16x1xf32>
    %130 = tpu.reciprocal %129 {approx = true} : vector<16x1xf32> -> vector<16x1xf32>
    %131 = vector.broadcast %130 : vector<16x1xf32> to vector<16x16xf32>
    %132 = arith.mulf %127, %131 : vector<16x16xf32>
    %cst_60 = arith.constant dense<0.000000e+00> : vector<16x8xf32>
    %133 = tpu.matmul %132, %119, %cst_60 {dimension_numbers = #tpu.dot_dimension_numbers<[1], [0], [0], [1], [0, 0, 1, 1], [], []>} : vector<16x16xf32>, vector<16x8xf32>, vector<16x8xf32> -> vector<16x8xf32>
    %134 = vector.extract_strided_slice %13 {offsets = [2, 0, 0], sizes = [1, 8, 32], strides = [1, 1, 1]} : vector<4x8x32xf32> to vector<1x8x32xf32>
    %135 = vector.shape_cast %134 : vector<1x8x32xf32> to vector<8x32xf32>
    %cst_61 = arith.constant dense<0.000000e+00> : vector<16x32xf32>
    %136 = tpu.matmul %133, %135, %cst_61 {dimension_numbers = #tpu.dot_dimension_numbers<[1], [0], [0], [1], [0, 0, 1, 1], [], []>} : vector<16x8xf32>, vector<8x32xf32>, vector<16x32xf32> -> vector<16x32xf32>
    %137 = arith.addf %98, %136 : vector<16x32xf32>
    %138 = vector.extract_strided_slice %7 {offsets = [3, 0, 0], sizes = [1, 32, 8], strides = [1, 1, 1]} : vector<4x32x8xf32> to vector<1x32x8xf32>
    %139 = vector.shape_cast %138 : vector<1x32x8xf32> to vector<32x8xf32>
    %cst_62 = arith.constant dense<0.000000e+00> : vector<16x8xf32>
    %140 = tpu.matmul %5, %139, %cst_62 {dimension_numbers = #tpu.dot_dimension_numbers<[1], [0], [0], [1], [0, 0, 1, 1], [], []>} : vector<16x32xf32>, vector<32x8xf32>, vector<16x8xf32> -> vector<16x8xf32>
    %141 = vector.extract_strided_slice %15 {offsets = [3, 0, 0], sizes = [1, 1, 8], strides = [1, 1, 1]} : vector<4x1x8xf32> to vector<1x1x8xf32>
    %142 = vector.shape_cast %141 : vector<1x1x8xf32> to vector<1x8xf32>
    %143 = vector.broadcast %142 : vector<1x8xf32> to vector<16x8xf32>
    %144 = arith.addf %140, %143 : vector<16x8xf32>
    %145 = vector.extract_strided_slice %9 {offsets = [3, 0, 0], sizes = [1, 32, 8], strides = [1, 1, 1]} : vector<4x32x8xf32> to vector<1x32x8xf32>
    %146 = vector.shape_cast %145 : vector<1x32x8xf32> to vector<32x8xf32>
    %cst_63 = arith.constant dense<0.000000e+00> : vector<16x8xf32>
    %147 = tpu.matmul %5, %146, %cst_63 {dimension_numbers = #tpu.dot_dimension_numbers<[1], [0], [0], [1], [0, 0, 1, 1], [], []>} : vector<16x32xf32>, vector<32x8xf32>, vector<16x8xf32> -> vector<16x8xf32>
    %148 = vector.extract_strided_slice %17 {offsets = [3, 0, 0], sizes = [1, 1, 8], strides = [1, 1, 1]} : vector<4x1x8xf32> to vector<1x1x8xf32>
    %149 = vector.shape_cast %148 : vector<1x1x8xf32> to vector<1x8xf32>
    %150 = vector.broadcast %149 : vector<1x8xf32> to vector<16x8xf32>
    %151 = arith.addf %147, %150 : vector<16x8xf32>
    %152 = vector.extract_strided_slice %11 {offsets = [3, 0, 0], sizes = [1, 32, 8], strides = [1, 1, 1]} : vector<4x32x8xf32> to vector<1x32x8xf32>
    %153 = vector.shape_cast %152 : vector<1x32x8xf32> to vector<32x8xf32>
    %cst_64 = arith.constant dense<0.000000e+00> : vector<16x8xf32>
    %154 = tpu.matmul %5, %153, %cst_64 {dimension_numbers = #tpu.dot_dimension_numbers<[1], [0], [0], [1], [0, 0, 1, 1], [], []>} : vector<16x32xf32>, vector<32x8xf32>, vector<16x8xf32> -> vector<16x8xf32>
    %155 = vector.extract_strided_slice %19 {offsets = [3, 0, 0], sizes = [1, 1, 8], strides = [1, 1, 1]} : vector<4x1x8xf32> to vector<1x1x8xf32>
    %156 = vector.shape_cast %155 : vector<1x1x8xf32> to vector<1x8xf32>
    %157 = vector.broadcast %156 : vector<1x8xf32> to vector<16x8xf32>
    %158 = arith.addf %154, %157 : vector<16x8xf32>
    %cst_65 = arith.constant dense<0.000000e+00> : vector<16x16xf32>
    %159 = tpu.matmul %144, %151, %cst_65 {dimension_numbers = #tpu.dot_dimension_numbers<[1], [1], [0], [0], [0, 0, 1, 0], [], []>} : vector<16x8xf32>, vector<16x8xf32>, vector<16x16xf32> -> vector<16x16xf32>
    %cst_66 = arith.constant 0.353553385 : f32
    %160 = vector.broadcast %cst_66 : f32 to vector<16x16xf32>
    %161 = arith.mulf %159, %160 : vector<16x16xf32>
    %cst_67 = arith.constant dense<0xFF800000> : vector<16xf32>
    %162 = vector.multi_reduction <maximumf>, %161, %cst_67 [1] : vector<16x16xf32> to vector<16xf32>
    %163 = vector.shape_cast %162 : vector<16xf32> to vector<16x1xf32>
    %164 = vector.broadcast %163 : vector<16x1xf32> to vector<16x16xf32>
    %165 = arith.subf %161, %164 : vector<16x16xf32>
    %166 = math.exp %165 : vector<16x16xf32>
    %cst_68 = arith.constant dense<0.000000e+00> : vector<16xf32>
    %167 = vector.multi_reduction <add>, %166, %cst_68 [1] : vector<16x16xf32> to vector<16xf32>
    %168 = vector.shape_cast %167 : vector<16xf32> to vector<16x1xf32>
    %169 = tpu.reciprocal %168 {approx = true} : vector<16x1xf32> -> vector<16x1xf32>
    %170 = vector.broadcast %169 : vector<16x1xf32> to vector<16x16xf32>
    %171 = arith.mulf %166, %170 : vector<16x16xf32>
    %cst_69 = arith.constant dense<0.000000e+00> : vector<16x8xf32>
    %172 = tpu.matmul %171, %158, %cst_69 {dimension_numbers = #tpu.dot_dimension_numbers<[1], [0], [0], [1], [0, 0, 1, 1], [], []>} : vector<16x16xf32>, vector<16x8xf32>, vector<16x8xf32> -> vector<16x8xf32>
    %173 = vector.extract_strided_slice %13 {offsets = [3, 0, 0], sizes = [1, 8, 32], strides = [1, 1, 1]} : vector<4x8x32xf32> to vector<1x8x32xf32>
    %174 = vector.shape_cast %173 : vector<1x8x32xf32> to vector<8x32xf32>
    %cst_70 = arith.constant dense<0.000000e+00> : vector<16x32xf32>
    %175 = tpu.matmul %172, %174, %cst_70 {dimension_numbers = #tpu.dot_dimension_numbers<[1], [0], [0], [1], [0, 0, 1, 1], [], []>} : vector<16x8xf32>, vector<8x32xf32>, vector<16x32xf32> -> vector<16x32xf32>
    %176 = arith.addf %137, %175 : vector<16x32xf32>
    %c0_71 = arith.constant 0 : index
    %c0_72 = arith.constant 0 : index
    %c0_73 = arith.constant 0 : index
    %177 = vector.load %arg11[%c0_71, %c0_72, %c0_73] : memref<2x1x32xf32, #tpu.memory_space<vmem>>, vector<1x1x32xf32>
    %178 = vector.shape_cast %177 : vector<1x1x32xf32> to vector<1x32xf32>
    %179 = vector.broadcast %178 : vector<1x32xf32> to vector<16x32xf32>
    %180 = arith.addf %176, %179 : vector<16x32xf32>
    %181 = arith.addf %5, %180 : vector<16x32xf32>
    %c0_74 = arith.constant 0 : index
    %c0_75 = arith.constant 0 : index
    %c0_76 = arith.constant 0 : index
    %182 = vector.load %arg16[%c0_74, %c0_75, %c0_76] : memref<2x1x32xf32, #tpu.memory_space<vmem>>, vector<1x1x32xf32>
    %183 = vector.shape_cast %182 : vector<1x1x32xf32> to vector<1x32xf32>
    %c0_77 = arith.constant 0 : index
    %c0_78 = arith.constant 0 : index
    %c0_79 = arith.constant 0 : index
    %184 = vector.load %arg17[%c0_77, %c0_78, %c0_79] : memref<2x1x32xf32, #tpu.memory_space<vmem>>, vector<1x1x32xf32>
    %185 = vector.shape_cast %184 : vector<1x1x32xf32> to vector<1x32xf32>
    %cst_80 = arith.constant dense<0.000000e+00> : vector<16xf32>
    %186 = vector.multi_reduction <add>, %181, %cst_80 [1] : vector<16x32xf32> to vector<16xf32>
    %187 = vector.shape_cast %186 : vector<16xf32> to vector<16x1xf32>
    %cst_81 = arith.constant 3.200000e+01 : f32
    %188 = vector.broadcast %cst_81 : f32 to vector<16x1xf32>
    %189 = arith.divf %187, %188 : vector<16x1xf32>
    %190 = vector.broadcast %189 : vector<16x1xf32> to vector<16x32xf32>
    %191 = arith.subf %181, %190 : vector<16x32xf32>
    %192 = arith.mulf %191, %191 : vector<16x32xf32>
    %cst_82 = arith.constant dense<0.000000e+00> : vector<16xf32>
    %193 = vector.multi_reduction <add>, %192, %cst_82 [1] : vector<16x32xf32> to vector<16xf32>
    %194 = vector.shape_cast %193 : vector<16xf32> to vector<16x1xf32>
    %cst_83 = arith.constant 3.200000e+01 : f32
    %195 = vector.broadcast %cst_83 : f32 to vector<16x1xf32>
    %196 = arith.divf %194, %195 : vector<16x1xf32>
    %197 = vector.broadcast %189 : vector<16x1xf32> to vector<16x32xf32>
    %198 = arith.subf %181, %197 : vector<16x32xf32>
    %cst_84 = arith.constant 9.99999974E-6 : f32
    %199 = vector.broadcast %cst_84 : f32 to vector<16x1xf32>
    %200 = arith.addf %196, %199 : vector<16x1xf32>
    %201 = math.rsqrt %200 : vector<16x1xf32>
    %202 = vector.broadcast %201 : vector<16x1xf32> to vector<16x32xf32>
    %203 = arith.mulf %198, %202 : vector<16x32xf32>
    %204 = vector.broadcast %183 : vector<1x32xf32> to vector<16x32xf32>
    %205 = arith.mulf %203, %204 : vector<16x32xf32>
    %206 = vector.broadcast %185 : vector<1x32xf32> to vector<16x32xf32>
    %207 = arith.addf %205, %206 : vector<16x32xf32>
    %c0_85 = arith.constant 0 : index
    %c0_86 = arith.constant 0 : index
    %c0_87 = arith.constant 0 : index
    %208 = vector.load %arg12[%c0_85, %c0_86, %c0_87] : memref<2x32x64xf32, #tpu.memory_space<vmem>>, vector<1x32x64xf32>
    %209 = vector.shape_cast %208 : vector<1x32x64xf32> to vector<32x64xf32>
    %cst_88 = arith.constant dense<0.000000e+00> : vector<16x64xf32>
    %210 = tpu.matmul %207, %209, %cst_88 {dimension_numbers = #tpu.dot_dimension_numbers<[1], [0], [0], [1], [0, 0, 1, 1], [], []>} : vector<16x32xf32>, vector<32x64xf32>, vector<16x64xf32> -> vector<16x64xf32>
    %c0_89 = arith.constant 0 : index
    %c0_90 = arith.constant 0 : index
    %c0_91 = arith.constant 0 : index
    %211 = vector.load %arg13[%c0_89, %c0_90, %c0_91] : memref<2x1x64xf32, #tpu.memory_space<vmem>>, vector<1x1x64xf32>
    %212 = vector.shape_cast %211 : vector<1x1x64xf32> to vector<1x64xf32>
    %213 = vector.broadcast %212 : vector<1x64xf32> to vector<16x64xf32>
    %214 = arith.addf %210, %213 : vector<16x64xf32>
    %cst_92 = arith.constant 0.000000e+00 : f32
    %215 = vector.broadcast %cst_92 : f32 to vector<16x64xf32>
    %216 = arith.maximumf %214, %215 : vector<16x64xf32>
    %c0_93 = arith.constant 0 : index
    %c0_94 = arith.constant 0 : index
    %c0_95 = arith.constant 0 : index
    %217 = vector.load %arg14[%c0_93, %c0_94, %c0_95] : memref<2x64x32xf32, #tpu.memory_space<vmem>>, vector<1x64x32xf32>
    %218 = vector.shape_cast %217 : vector<1x64x32xf32> to vector<64x32xf32>
    %cst_96 = arith.constant dense<0.000000e+00> : vector<16x32xf32>
    %219 = tpu.matmul %216, %218, %cst_96 {dimension_numbers = #tpu.dot_dimension_numbers<[1], [0], [0], [1], [0, 0, 1, 1], [], []>} : vector<16x64xf32>, vector<64x32xf32>, vector<16x32xf32> -> vector<16x32xf32>
    %c0_97 = arith.constant 0 : index
    %c0_98 = arith.constant 0 : index
    %c0_99 = arith.constant 0 : index
    %220 = vector.load %arg15[%c0_97, %c0_98, %c0_99] : memref<2x1x32xf32, #tpu.memory_space<vmem>>, vector<1x1x32xf32>
    %221 = vector.shape_cast %220 : vector<1x1x32xf32> to vector<1x32xf32>
    %222 = vector.broadcast %221 : vector<1x32xf32> to vector<16x32xf32>
    %223 = arith.addf %219, %222 : vector<16x32xf32>
    %224 = arith.addf %207, %223 : vector<16x32xf32>
    %c0_100 = arith.constant 0 : index
    %c0_101 = arith.constant 0 : index
    %c0_102 = arith.constant 0 : index
    %225 = vector.load %arg18[%c0_100, %c0_101, %c0_102] : memref<2x1x32xf32, #tpu.memory_space<vmem>>, vector<1x1x32xf32>
    %226 = vector.shape_cast %225 : vector<1x1x32xf32> to vector<1x32xf32>
    %c0_103 = arith.constant 0 : index
    %c0_104 = arith.constant 0 : index
    %c0_105 = arith.constant 0 : index
    %227 = vector.load %arg19[%c0_103, %c0_104, %c0_105] : memref<2x1x32xf32, #tpu.memory_space<vmem>>, vector<1x1x32xf32>
    %228 = vector.shape_cast %227 : vector<1x1x32xf32> to vector<1x32xf32>
    %cst_106 = arith.constant dense<0.000000e+00> : vector<16xf32>
    %229 = vector.multi_reduction <add>, %224, %cst_106 [1] : vector<16x32xf32> to vector<16xf32>
    %230 = vector.shape_cast %229 : vector<16xf32> to vector<16x1xf32>
    %cst_107 = arith.constant 3.200000e+01 : f32
    %231 = vector.broadcast %cst_107 : f32 to vector<16x1xf32>
    %232 = arith.divf %230, %231 : vector<16x1xf32>
    %233 = vector.broadcast %232 : vector<16x1xf32> to vector<16x32xf32>
    %234 = arith.subf %224, %233 : vector<16x32xf32>
    %235 = arith.mulf %234, %234 : vector<16x32xf32>
    %cst_108 = arith.constant dense<0.000000e+00> : vector<16xf32>
    %236 = vector.multi_reduction <add>, %235, %cst_108 [1] : vector<16x32xf32> to vector<16xf32>
    %237 = vector.shape_cast %236 : vector<16xf32> to vector<16x1xf32>
    %cst_109 = arith.constant 3.200000e+01 : f32
    %238 = vector.broadcast %cst_109 : f32 to vector<16x1xf32>
    %239 = arith.divf %237, %238 : vector<16x1xf32>
    %240 = vector.broadcast %232 : vector<16x1xf32> to vector<16x32xf32>
    %241 = arith.subf %224, %240 : vector<16x32xf32>
    %cst_110 = arith.constant 9.99999974E-6 : f32
    %242 = vector.broadcast %cst_110 : f32 to vector<16x1xf32>
    %243 = arith.addf %239, %242 : vector<16x1xf32>
    %244 = math.rsqrt %243 : vector<16x1xf32>
    %245 = vector.broadcast %244 : vector<16x1xf32> to vector<16x32xf32>
    %246 = arith.mulf %241, %245 : vector<16x32xf32>
    %247 = vector.broadcast %226 : vector<1x32xf32> to vector<16x32xf32>
    %248 = arith.mulf %246, %247 : vector<16x32xf32>
    %249 = vector.broadcast %228 : vector<1x32xf32> to vector<16x32xf32>
    %250 = arith.addf %248, %249 : vector<16x32xf32>
    %c1 = arith.constant 1 : index
    %c0_111 = arith.constant 0 : index
    %c0_112 = arith.constant 0 : index
    %c0_113 = arith.constant 0 : index
    %251 = vector.load %arg4[%c1, %c0_111, %c0_112, %c0_113] : memref<2x4x32x8xf32, #tpu.memory_space<vmem>>, vector<1x4x32x8xf32>
    %252 = vector.shape_cast %251 : vector<1x4x32x8xf32> to vector<4x32x8xf32>
    %c1_114 = arith.constant 1 : index
    %c0_115 = arith.constant 0 : index
    %c0_116 = arith.constant 0 : index
    %c0_117 = arith.constant 0 : index
    %253 = vector.load %arg6[%c1_114, %c0_115, %c0_116, %c0_117] : memref<2x4x32x8xf32, #tpu.memory_space<vmem>>, vector<1x4x32x8xf32>
    %254 = vector.shape_cast %253 : vector<1x4x32x8xf32> to vector<4x32x8xf32>
    %c1_118 = arith.constant 1 : index
    %c0_119 = arith.constant 0 : index
    %c0_120 = arith.constant 0 : index
    %c0_121 = arith.constant 0 : index
    %255 = vector.load %arg8[%c1_118, %c0_119, %c0_120, %c0_121] : memref<2x4x32x8xf32, #tpu.memory_space<vmem>>, vector<1x4x32x8xf32>
    %256 = vector.shape_cast %255 : vector<1x4x32x8xf32> to vector<4x32x8xf32>
    %c1_122 = arith.constant 1 : index
    %c0_123 = arith.constant 0 : index
    %c0_124 = arith.constant 0 : index
    %c0_125 = arith.constant 0 : index
    %257 = vector.load %arg10[%c1_122, %c0_123, %c0_124, %c0_125] : memref<2x4x8x32xf32, #tpu.memory_space<vmem>>, vector<1x4x8x32xf32>
    %258 = vector.shape_cast %257 : vector<1x4x8x32xf32> to vector<4x8x32xf32>
    %c1_126 = arith.constant 1 : index
    %c0_127 = arith.constant 0 : index
    %c0_128 = arith.constant 0 : index
    %c0_129 = arith.constant 0 : index
    %259 = vector.load %arg5[%c1_126, %c0_127, %c0_128, %c0_129] : memref<2x4x1x8xf32, #tpu.memory_space<vmem>>, vector<1x4x1x8xf32>
    %260 = vector.shape_cast %259 : vector<1x4x1x8xf32> to vector<4x1x8xf32>
    %c1_130 = arith.constant 1 : index
    %c0_131 = arith.constant 0 : index
    %c0_132 = arith.constant 0 : index
    %c0_133 = arith.constant 0 : index
    %261 = vector.load %arg7[%c1_130, %c0_131, %c0_132, %c0_133] : memref<2x4x1x8xf32, #tpu.memory_space<vmem>>, vector<1x4x1x8xf32>
    %262 = vector.shape_cast %261 : vector<1x4x1x8xf32> to vector<4x1x8xf32>
    %c1_134 = arith.constant 1 : index
    %c0_135 = arith.constant 0 : index
    %c0_136 = arith.constant 0 : index
    %c0_137 = arith.constant 0 : index
    %263 = vector.load %arg9[%c1_134, %c0_135, %c0_136, %c0_137] : memref<2x4x1x8xf32, #tpu.memory_space<vmem>>, vector<1x4x1x8xf32>
    %264 = vector.shape_cast %263 : vector<1x4x1x8xf32> to vector<4x1x8xf32>
    %cst_138 = arith.constant 0.000000e+00 : f32
    %265 = vector.broadcast %cst_138 : f32 to vector<16x32xf32>
    %266 = vector.extract_strided_slice %252 {offsets = [0, 0, 0], sizes = [1, 32, 8], strides = [1, 1, 1]} : vector<4x32x8xf32> to vector<1x32x8xf32>
    %267 = vector.shape_cast %266 : vector<1x32x8xf32> to vector<32x8xf32>
    %cst_139 = arith.constant dense<0.000000e+00> : vector<16x8xf32>
    %268 = tpu.matmul %250, %267, %cst_139 {dimension_numbers = #tpu.dot_dimension_numbers<[1], [0], [0], [1], [0, 0, 1, 1], [], []>} : vector<16x32xf32>, vector<32x8xf32>, vector<16x8xf32> -> vector<16x8xf32>
    %269 = vector.extract_strided_slice %260 {offsets = [0, 0, 0], sizes = [1, 1, 8], strides = [1, 1, 1]} : vector<4x1x8xf32> to vector<1x1x8xf32>
    %270 = vector.shape_cast %269 : vector<1x1x8xf32> to vector<1x8xf32>
    %271 = vector.broadcast %270 : vector<1x8xf32> to vector<16x8xf32>
    %272 = arith.addf %268, %271 : vector<16x8xf32>
    %273 = vector.extract_strided_slice %254 {offsets = [0, 0, 0], sizes = [1, 32, 8], strides = [1, 1, 1]} : vector<4x32x8xf32> to vector<1x32x8xf32>
    %274 = vector.shape_cast %273 : vector<1x32x8xf32> to vector<32x8xf32>
    %cst_140 = arith.constant dense<0.000000e+00> : vector<16x8xf32>
    %275 = tpu.matmul %250, %274, %cst_140 {dimension_numbers = #tpu.dot_dimension_numbers<[1], [0], [0], [1], [0, 0, 1, 1], [], []>} : vector<16x32xf32>, vector<32x8xf32>, vector<16x8xf32> -> vector<16x8xf32>
    %276 = vector.extract_strided_slice %262 {offsets = [0, 0, 0], sizes = [1, 1, 8], strides = [1, 1, 1]} : vector<4x1x8xf32> to vector<1x1x8xf32>
    %277 = vector.shape_cast %276 : vector<1x1x8xf32> to vector<1x8xf32>
    %278 = vector.broadcast %277 : vector<1x8xf32> to vector<16x8xf32>
    %279 = arith.addf %275, %278 : vector<16x8xf32>
    %280 = vector.extract_strided_slice %256 {offsets = [0, 0, 0], sizes = [1, 32, 8], strides = [1, 1, 1]} : vector<4x32x8xf32> to vector<1x32x8xf32>
    %281 = vector.shape_cast %280 : vector<1x32x8xf32> to vector<32x8xf32>
    %cst_141 = arith.constant dense<0.000000e+00> : vector<16x8xf32>
    %282 = tpu.matmul %250, %281, %cst_141 {dimension_numbers = #tpu.dot_dimension_numbers<[1], [0], [0], [1], [0, 0, 1, 1], [], []>} : vector<16x32xf32>, vector<32x8xf32>, vector<16x8xf32> -> vector<16x8xf32>
    %283 = vector.extract_strided_slice %264 {offsets = [0, 0, 0], sizes = [1, 1, 8], strides = [1, 1, 1]} : vector<4x1x8xf32> to vector<1x1x8xf32>
    %284 = vector.shape_cast %283 : vector<1x1x8xf32> to vector<1x8xf32>
    %285 = vector.broadcast %284 : vector<1x8xf32> to vector<16x8xf32>
    %286 = arith.addf %282, %285 : vector<16x8xf32>
    %cst_142 = arith.constant dense<0.000000e+00> : vector<16x16xf32>
    %287 = tpu.matmul %272, %279, %cst_142 {dimension_numbers = #tpu.dot_dimension_numbers<[1], [1], [0], [0], [0, 0, 1, 0], [], []>} : vector<16x8xf32>, vector<16x8xf32>, vector<16x16xf32> -> vector<16x16xf32>
    %cst_143 = arith.constant 0.353553385 : f32
    %288 = vector.broadcast %cst_143 : f32 to vector<16x16xf32>
    %289 = arith.mulf %287, %288 : vector<16x16xf32>
    %cst_144 = arith.constant dense<0xFF800000> : vector<16xf32>
    %290 = vector.multi_reduction <maximumf>, %289, %cst_144 [1] : vector<16x16xf32> to vector<16xf32>
    %291 = vector.shape_cast %290 : vector<16xf32> to vector<16x1xf32>
    %292 = vector.broadcast %291 : vector<16x1xf32> to vector<16x16xf32>
    %293 = arith.subf %289, %292 : vector<16x16xf32>
    %294 = math.exp %293 : vector<16x16xf32>
    %cst_145 = arith.constant dense<0.000000e+00> : vector<16xf32>
    %295 = vector.multi_reduction <add>, %294, %cst_145 [1] : vector<16x16xf32> to vector<16xf32>
    %296 = vector.shape_cast %295 : vector<16xf32> to vector<16x1xf32>
    %297 = tpu.reciprocal %296 {approx = true} : vector<16x1xf32> -> vector<16x1xf32>
    %298 = vector.broadcast %297 : vector<16x1xf32> to vector<16x16xf32>
    %299 = arith.mulf %294, %298 : vector<16x16xf32>
    %cst_146 = arith.constant dense<0.000000e+00> : vector<16x8xf32>
    %300 = tpu.matmul %299, %286, %cst_146 {dimension_numbers = #tpu.dot_dimension_numbers<[1], [0], [0], [1], [0, 0, 1, 1], [], []>} : vector<16x16xf32>, vector<16x8xf32>, vector<16x8xf32> -> vector<16x8xf32>
    %301 = vector.extract_strided_slice %258 {offsets = [0, 0, 0], sizes = [1, 8, 32], strides = [1, 1, 1]} : vector<4x8x32xf32> to vector<1x8x32xf32>
    %302 = vector.shape_cast %301 : vector<1x8x32xf32> to vector<8x32xf32>
    %cst_147 = arith.constant dense<0.000000e+00> : vector<16x32xf32>
    %303 = tpu.matmul %300, %302, %cst_147 {dimension_numbers = #tpu.dot_dimension_numbers<[1], [0], [0], [1], [0, 0, 1, 1], [], []>} : vector<16x8xf32>, vector<8x32xf32>, vector<16x32xf32> -> vector<16x32xf32>
    %304 = arith.addf %265, %303 : vector<16x32xf32>
    %305 = vector.extract_strided_slice %252 {offsets = [1, 0, 0], sizes = [1, 32, 8], strides = [1, 1, 1]} : vector<4x32x8xf32> to vector<1x32x8xf32>
    %306 = vector.shape_cast %305 : vector<1x32x8xf32> to vector<32x8xf32>
    %cst_148 = arith.constant dense<0.000000e+00> : vector<16x8xf32>
    %307 = tpu.matmul %250, %306, %cst_148 {dimension_numbers = #tpu.dot_dimension_numbers<[1], [0], [0], [1], [0, 0, 1, 1], [], []>} : vector<16x32xf32>, vector<32x8xf32>, vector<16x8xf32> -> vector<16x8xf32>
    %308 = vector.extract_strided_slice %260 {offsets = [1, 0, 0], sizes = [1, 1, 8], strides = [1, 1, 1]} : vector<4x1x8xf32> to vector<1x1x8xf32>
    %309 = vector.shape_cast %308 : vector<1x1x8xf32> to vector<1x8xf32>
    %310 = vector.broadcast %309 : vector<1x8xf32> to vector<16x8xf32>
    %311 = arith.addf %307, %310 : vector<16x8xf32>
    %312 = vector.extract_strided_slice %254 {offsets = [1, 0, 0], sizes = [1, 32, 8], strides = [1, 1, 1]} : vector<4x32x8xf32> to vector<1x32x8xf32>
    %313 = vector.shape_cast %312 : vector<1x32x8xf32> to vector<32x8xf32>
    %cst_149 = arith.constant dense<0.000000e+00> : vector<16x8xf32>
    %314 = tpu.matmul %250, %313, %cst_149 {dimension_numbers = #tpu.dot_dimension_numbers<[1], [0], [0], [1], [0, 0, 1, 1], [], []>} : vector<16x32xf32>, vector<32x8xf32>, vector<16x8xf32> -> vector<16x8xf32>
    %315 = vector.extract_strided_slice %262 {offsets = [1, 0, 0], sizes = [1, 1, 8], strides = [1, 1, 1]} : vector<4x1x8xf32> to vector<1x1x8xf32>
    %316 = vector.shape_cast %315 : vector<1x1x8xf32> to vector<1x8xf32>
    %317 = vector.broadcast %316 : vector<1x8xf32> to vector<16x8xf32>
    %318 = arith.addf %314, %317 : vector<16x8xf32>
    %319 = vector.extract_strided_slice %256 {offsets = [1, 0, 0], sizes = [1, 32, 8], strides = [1, 1, 1]} : vector<4x32x8xf32> to vector<1x32x8xf32>
    %320 = vector.shape_cast %319 : vector<1x32x8xf32> to vector<32x8xf32>
    %cst_150 = arith.constant dense<0.000000e+00> : vector<16x8xf32>
    %321 = tpu.matmul %250, %320, %cst_150 {dimension_numbers = #tpu.dot_dimension_numbers<[1], [0], [0], [1], [0, 0, 1, 1], [], []>} : vector<16x32xf32>, vector<32x8xf32>, vector<16x8xf32> -> vector<16x8xf32>
    %322 = vector.extract_strided_slice %264 {offsets = [1, 0, 0], sizes = [1, 1, 8], strides = [1, 1, 1]} : vector<4x1x8xf32> to vector<1x1x8xf32>
    %323 = vector.shape_cast %322 : vector<1x1x8xf32> to vector<1x8xf32>
    %324 = vector.broadcast %323 : vector<1x8xf32> to vector<16x8xf32>
    %325 = arith.addf %321, %324 : vector<16x8xf32>
    %cst_151 = arith.constant dense<0.000000e+00> : vector<16x16xf32>
    %326 = tpu.matmul %311, %318, %cst_151 {dimension_numbers = #tpu.dot_dimension_numbers<[1], [1], [0], [0], [0, 0, 1, 0], [], []>} : vector<16x8xf32>, vector<16x8xf32>, vector<16x16xf32> -> vector<16x16xf32>
    %cst_152 = arith.constant 0.353553385 : f32
    %327 = vector.broadcast %cst_152 : f32 to vector<16x16xf32>
    %328 = arith.mulf %326, %327 : vector<16x16xf32>
    %cst_153 = arith.constant dense<0xFF800000> : vector<16xf32>
    %329 = vector.multi_reduction <maximumf>, %328, %cst_153 [1] : vector<16x16xf32> to vector<16xf32>
    %330 = vector.shape_cast %329 : vector<16xf32> to vector<16x1xf32>
    %331 = vector.broadcast %330 : vector<16x1xf32> to vector<16x16xf32>
    %332 = arith.subf %328, %331 : vector<16x16xf32>
    %333 = math.exp %332 : vector<16x16xf32>
    %cst_154 = arith.constant dense<0.000000e+00> : vector<16xf32>
    %334 = vector.multi_reduction <add>, %333, %cst_154 [1] : vector<16x16xf32> to vector<16xf32>
    %335 = vector.shape_cast %334 : vector<16xf32> to vector<16x1xf32>
    %336 = tpu.reciprocal %335 {approx = true} : vector<16x1xf32> -> vector<16x1xf32>
    %337 = vector.broadcast %336 : vector<16x1xf32> to vector<16x16xf32>
    %338 = arith.mulf %333, %337 : vector<16x16xf32>
    %cst_155 = arith.constant dense<0.000000e+00> : vector<16x8xf32>
    %339 = tpu.matmul %338, %325, %cst_155 {dimension_numbers = #tpu.dot_dimension_numbers<[1], [0], [0], [1], [0, 0, 1, 1], [], []>} : vector<16x16xf32>, vector<16x8xf32>, vector<16x8xf32> -> vector<16x8xf32>
    %340 = vector.extract_strided_slice %258 {offsets = [1, 0, 0], sizes = [1, 8, 32], strides = [1, 1, 1]} : vector<4x8x32xf32> to vector<1x8x32xf32>
    %341 = vector.shape_cast %340 : vector<1x8x32xf32> to vector<8x32xf32>
    %cst_156 = arith.constant dense<0.000000e+00> : vector<16x32xf32>
    %342 = tpu.matmul %339, %341, %cst_156 {dimension_numbers = #tpu.dot_dimension_numbers<[1], [0], [0], [1], [0, 0, 1, 1], [], []>} : vector<16x8xf32>, vector<8x32xf32>, vector<16x32xf32> -> vector<16x32xf32>
    %343 = arith.addf %304, %342 : vector<16x32xf32>
    %344 = vector.extract_strided_slice %252 {offsets = [2, 0, 0], sizes = [1, 32, 8], strides = [1, 1, 1]} : vector<4x32x8xf32> to vector<1x32x8xf32>
    %345 = vector.shape_cast %344 : vector<1x32x8xf32> to vector<32x8xf32>
    %cst_157 = arith.constant dense<0.000000e+00> : vector<16x8xf32>
    %346 = tpu.matmul %250, %345, %cst_157 {dimension_numbers = #tpu.dot_dimension_numbers<[1], [0], [0], [1], [0, 0, 1, 1], [], []>} : vector<16x32xf32>, vector<32x8xf32>, vector<16x8xf32> -> vector<16x8xf32>
    %347 = vector.extract_strided_slice %260 {offsets = [2, 0, 0], sizes = [1, 1, 8], strides = [1, 1, 1]} : vector<4x1x8xf32> to vector<1x1x8xf32>
    %348 = vector.shape_cast %347 : vector<1x1x8xf32> to vector<1x8xf32>
    %349 = vector.broadcast %348 : vector<1x8xf32> to vector<16x8xf32>
    %350 = arith.addf %346, %349 : vector<16x8xf32>
    %351 = vector.extract_strided_slice %254 {offsets = [2, 0, 0], sizes = [1, 32, 8], strides = [1, 1, 1]} : vector<4x32x8xf32> to vector<1x32x8xf32>
    %352 = vector.shape_cast %351 : vector<1x32x8xf32> to vector<32x8xf32>
    %cst_158 = arith.constant dense<0.000000e+00> : vector<16x8xf32>
    %353 = tpu.matmul %250, %352, %cst_158 {dimension_numbers = #tpu.dot_dimension_numbers<[1], [0], [0], [1], [0, 0, 1, 1], [], []>} : vector<16x32xf32>, vector<32x8xf32>, vector<16x8xf32> -> vector<16x8xf32>
    %354 = vector.extract_strided_slice %262 {offsets = [2, 0, 0], sizes = [1, 1, 8], strides = [1, 1, 1]} : vector<4x1x8xf32> to vector<1x1x8xf32>
    %355 = vector.shape_cast %354 : vector<1x1x8xf32> to vector<1x8xf32>
    %356 = vector.broadcast %355 : vector<1x8xf32> to vector<16x8xf32>
    %357 = arith.addf %353, %356 : vector<16x8xf32>
    %358 = vector.extract_strided_slice %256 {offsets = [2, 0, 0], sizes = [1, 32, 8], strides = [1, 1, 1]} : vector<4x32x8xf32> to vector<1x32x8xf32>
    %359 = vector.shape_cast %358 : vector<1x32x8xf32> to vector<32x8xf32>
    %cst_159 = arith.constant dense<0.000000e+00> : vector<16x8xf32>
    %360 = tpu.matmul %250, %359, %cst_159 {dimension_numbers = #tpu.dot_dimension_numbers<[1], [0], [0], [1], [0, 0, 1, 1], [], []>} : vector<16x32xf32>, vector<32x8xf32>, vector<16x8xf32> -> vector<16x8xf32>
    %361 = vector.extract_strided_slice %264 {offsets = [2, 0, 0], sizes = [1, 1, 8], strides = [1, 1, 1]} : vector<4x1x8xf32> to vector<1x1x8xf32>
    %362 = vector.shape_cast %361 : vector<1x1x8xf32> to vector<1x8xf32>
    %363 = vector.broadcast %362 : vector<1x8xf32> to vector<16x8xf32>
    %364 = arith.addf %360, %363 : vector<16x8xf32>
    %cst_160 = arith.constant dense<0.000000e+00> : vector<16x16xf32>
    %365 = tpu.matmul %350, %357, %cst_160 {dimension_numbers = #tpu.dot_dimension_numbers<[1], [1], [0], [0], [0, 0, 1, 0], [], []>} : vector<16x8xf32>, vector<16x8xf32>, vector<16x16xf32> -> vector<16x16xf32>
    %cst_161 = arith.constant 0.353553385 : f32
    %366 = vector.broadcast %cst_161 : f32 to vector<16x16xf32>
    %367 = arith.mulf %365, %366 : vector<16x16xf32>
    %cst_162 = arith.constant dense<0xFF800000> : vector<16xf32>
    %368 = vector.multi_reduction <maximumf>, %367, %cst_162 [1] : vector<16x16xf32> to vector<16xf32>
    %369 = vector.shape_cast %368 : vector<16xf32> to vector<16x1xf32>
    %370 = vector.broadcast %369 : vector<16x1xf32> to vector<16x16xf32>
    %371 = arith.subf %367, %370 : vector<16x16xf32>
    %372 = math.exp %371 : vector<16x16xf32>
    %cst_163 = arith.constant dense<0.000000e+00> : vector<16xf32>
    %373 = vector.multi_reduction <add>, %372, %cst_163 [1] : vector<16x16xf32> to vector<16xf32>
    %374 = vector.shape_cast %373 : vector<16xf32> to vector<16x1xf32>
    %375 = tpu.reciprocal %374 {approx = true} : vector<16x1xf32> -> vector<16x1xf32>
    %376 = vector.broadcast %375 : vector<16x1xf32> to vector<16x16xf32>
    %377 = arith.mulf %372, %376 : vector<16x16xf32>
    %cst_164 = arith.constant dense<0.000000e+00> : vector<16x8xf32>
    %378 = tpu.matmul %377, %364, %cst_164 {dimension_numbers = #tpu.dot_dimension_numbers<[1], [0], [0], [1], [0, 0, 1, 1], [], []>} : vector<16x16xf32>, vector<16x8xf32>, vector<16x8xf32> -> vector<16x8xf32>
    %379 = vector.extract_strided_slice %258 {offsets = [2, 0, 0], sizes = [1, 8, 32], strides = [1, 1, 1]} : vector<4x8x32xf32> to vector<1x8x32xf32>
    %380 = vector.shape_cast %379 : vector<1x8x32xf32> to vector<8x32xf32>
    %cst_165 = arith.constant dense<0.000000e+00> : vector<16x32xf32>
    %381 = tpu.matmul %378, %380, %cst_165 {dimension_numbers = #tpu.dot_dimension_numbers<[1], [0], [0], [1], [0, 0, 1, 1], [], []>} : vector<16x8xf32>, vector<8x32xf32>, vector<16x32xf32> -> vector<16x32xf32>
    %382 = arith.addf %343, %381 : vector<16x32xf32>
    %383 = vector.extract_strided_slice %252 {offsets = [3, 0, 0], sizes = [1, 32, 8], strides = [1, 1, 1]} : vector<4x32x8xf32> to vector<1x32x8xf32>
    %384 = vector.shape_cast %383 : vector<1x32x8xf32> to vector<32x8xf32>
    %cst_166 = arith.constant dense<0.000000e+00> : vector<16x8xf32>
    %385 = tpu.matmul %250, %384, %cst_166 {dimension_numbers = #tpu.dot_dimension_numbers<[1], [0], [0], [1], [0, 0, 1, 1], [], []>} : vector<16x32xf32>, vector<32x8xf32>, vector<16x8xf32> -> vector<16x8xf32>
    %386 = vector.extract_strided_slice %260 {offsets = [3, 0, 0], sizes = [1, 1, 8], strides = [1, 1, 1]} : vector<4x1x8xf32> to vector<1x1x8xf32>
    %387 = vector.shape_cast %386 : vector<1x1x8xf32> to vector<1x8xf32>
    %388 = vector.broadcast %387 : vector<1x8xf32> to vector<16x8xf32>
    %389 = arith.addf %385, %388 : vector<16x8xf32>
    %390 = vector.extract_strided_slice %254 {offsets = [3, 0, 0], sizes = [1, 32, 8], strides = [1, 1, 1]} : vector<4x32x8xf32> to vector<1x32x8xf32>
    %391 = vector.shape_cast %390 : vector<1x32x8xf32> to vector<32x8xf32>
    %cst_167 = arith.constant dense<0.000000e+00> : vector<16x8xf32>
    %392 = tpu.matmul %250, %391, %cst_167 {dimension_numbers = #tpu.dot_dimension_numbers<[1], [0], [0], [1], [0, 0, 1, 1], [], []>} : vector<16x32xf32>, vector<32x8xf32>, vector<16x8xf32> -> vector<16x8xf32>
    %393 = vector.extract_strided_slice %262 {offsets = [3, 0, 0], sizes = [1, 1, 8], strides = [1, 1, 1]} : vector<4x1x8xf32> to vector<1x1x8xf32>
    %394 = vector.shape_cast %393 : vector<1x1x8xf32> to vector<1x8xf32>
    %395 = vector.broadcast %394 : vector<1x8xf32> to vector<16x8xf32>
    %396 = arith.addf %392, %395 : vector<16x8xf32>
    %397 = vector.extract_strided_slice %256 {offsets = [3, 0, 0], sizes = [1, 32, 8], strides = [1, 1, 1]} : vector<4x32x8xf32> to vector<1x32x8xf32>
    %398 = vector.shape_cast %397 : vector<1x32x8xf32> to vector<32x8xf32>
    %cst_168 = arith.constant dense<0.000000e+00> : vector<16x8xf32>
    %399 = tpu.matmul %250, %398, %cst_168 {dimension_numbers = #tpu.dot_dimension_numbers<[1], [0], [0], [1], [0, 0, 1, 1], [], []>} : vector<16x32xf32>, vector<32x8xf32>, vector<16x8xf32> -> vector<16x8xf32>
    %400 = vector.extract_strided_slice %264 {offsets = [3, 0, 0], sizes = [1, 1, 8], strides = [1, 1, 1]} : vector<4x1x8xf32> to vector<1x1x8xf32>
    %401 = vector.shape_cast %400 : vector<1x1x8xf32> to vector<1x8xf32>
    %402 = vector.broadcast %401 : vector<1x8xf32> to vector<16x8xf32>
    %403 = arith.addf %399, %402 : vector<16x8xf32>
    %cst_169 = arith.constant dense<0.000000e+00> : vector<16x16xf32>
    %404 = tpu.matmul %389, %396, %cst_169 {dimension_numbers = #tpu.dot_dimension_numbers<[1], [1], [0], [0], [0, 0, 1, 0], [], []>} : vector<16x8xf32>, vector<16x8xf32>, vector<16x16xf32> -> vector<16x16xf32>
    %cst_170 = arith.constant 0.353553385 : f32
    %405 = vector.broadcast %cst_170 : f32 to vector<16x16xf32>
    %406 = arith.mulf %404, %405 : vector<16x16xf32>
    %cst_171 = arith.constant dense<0xFF800000> : vector<16xf32>
    %407 = vector.multi_reduction <maximumf>, %406, %cst_171 [1] : vector<16x16xf32> to vector<16xf32>
    %408 = vector.shape_cast %407 : vector<16xf32> to vector<16x1xf32>
    %409 = vector.broadcast %408 : vector<16x1xf32> to vector<16x16xf32>
    %410 = arith.subf %406, %409 : vector<16x16xf32>
    %411 = math.exp %410 : vector<16x16xf32>
    %cst_172 = arith.constant dense<0.000000e+00> : vector<16xf32>
    %412 = vector.multi_reduction <add>, %411, %cst_172 [1] : vector<16x16xf32> to vector<16xf32>
    %413 = vector.shape_cast %412 : vector<16xf32> to vector<16x1xf32>
    %414 = tpu.reciprocal %413 {approx = true} : vector<16x1xf32> -> vector<16x1xf32>
    %415 = vector.broadcast %414 : vector<16x1xf32> to vector<16x16xf32>
    %416 = arith.mulf %411, %415 : vector<16x16xf32>
    %cst_173 = arith.constant dense<0.000000e+00> : vector<16x8xf32>
    %417 = tpu.matmul %416, %403, %cst_173 {dimension_numbers = #tpu.dot_dimension_numbers<[1], [0], [0], [1], [0, 0, 1, 1], [], []>} : vector<16x16xf32>, vector<16x8xf32>, vector<16x8xf32> -> vector<16x8xf32>
    %418 = vector.extract_strided_slice %258 {offsets = [3, 0, 0], sizes = [1, 8, 32], strides = [1, 1, 1]} : vector<4x8x32xf32> to vector<1x8x32xf32>
    %419 = vector.shape_cast %418 : vector<1x8x32xf32> to vector<8x32xf32>
    %cst_174 = arith.constant dense<0.000000e+00> : vector<16x32xf32>
    %420 = tpu.matmul %417, %419, %cst_174 {dimension_numbers = #tpu.dot_dimension_numbers<[1], [0], [0], [1], [0, 0, 1, 1], [], []>} : vector<16x8xf32>, vector<8x32xf32>, vector<16x32xf32> -> vector<16x32xf32>
    %421 = arith.addf %382, %420 : vector<16x32xf32>
    %c1_175 = arith.constant 1 : index
    %c0_176 = arith.constant 0 : index
    %c0_177 = arith.constant 0 : index
    %422 = vector.load %arg11[%c1_175, %c0_176, %c0_177] : memref<2x1x32xf32, #tpu.memory_space<vmem>>, vector<1x1x32xf32>
    %423 = vector.shape_cast %422 : vector<1x1x32xf32> to vector<1x32xf32>
    %424 = vector.broadcast %423 : vector<1x32xf32> to vector<16x32xf32>
    %425 = arith.addf %421, %424 : vector<16x32xf32>
    %426 = arith.addf %250, %425 : vector<16x32xf32>
    %c1_178 = arith.constant 1 : index
    %c0_179 = arith.constant 0 : index
    %c0_180 = arith.constant 0 : index
    %427 = vector.load %arg16[%c1_178, %c0_179, %c0_180] : memref<2x1x32xf32, #tpu.memory_space<vmem>>, vector<1x1x32xf32>
    %428 = vector.shape_cast %427 : vector<1x1x32xf32> to vector<1x32xf32>
    %c1_181 = arith.constant 1 : index
    %c0_182 = arith.constant 0 : index
    %c0_183 = arith.constant 0 : index
    %429 = vector.load %arg17[%c1_181, %c0_182, %c0_183] : memref<2x1x32xf32, #tpu.memory_space<vmem>>, vector<1x1x32xf32>
    %430 = vector.shape_cast %429 : vector<1x1x32xf32> to vector<1x32xf32>
    %cst_184 = arith.constant dense<0.000000e+00> : vector<16xf32>
    %431 = vector.multi_reduction <add>, %426, %cst_184 [1] : vector<16x32xf32> to vector<16xf32>
    %432 = vector.shape_cast %431 : vector<16xf32> to vector<16x1xf32>
    %cst_185 = arith.constant 3.200000e+01 : f32
    %433 = vector.broadcast %cst_185 : f32 to vector<16x1xf32>
    %434 = arith.divf %432, %433 : vector<16x1xf32>
    %435 = vector.broadcast %434 : vector<16x1xf32> to vector<16x32xf32>
    %436 = arith.subf %426, %435 : vector<16x32xf32>
    %437 = arith.mulf %436, %436 : vector<16x32xf32>
    %cst_186 = arith.constant dense<0.000000e+00> : vector<16xf32>
    %438 = vector.multi_reduction <add>, %437, %cst_186 [1] : vector<16x32xf32> to vector<16xf32>
    %439 = vector.shape_cast %438 : vector<16xf32> to vector<16x1xf32>
    %cst_187 = arith.constant 3.200000e+01 : f32
    %440 = vector.broadcast %cst_187 : f32 to vector<16x1xf32>
    %441 = arith.divf %439, %440 : vector<16x1xf32>
    %442 = vector.broadcast %434 : vector<16x1xf32> to vector<16x32xf32>
    %443 = arith.subf %426, %442 : vector<16x32xf32>
    %cst_188 = arith.constant 9.99999974E-6 : f32
    %444 = vector.broadcast %cst_188 : f32 to vector<16x1xf32>
    %445 = arith.addf %441, %444 : vector<16x1xf32>
    %446 = math.rsqrt %445 : vector<16x1xf32>
    %447 = vector.broadcast %446 : vector<16x1xf32> to vector<16x32xf32>
    %448 = arith.mulf %443, %447 : vector<16x32xf32>
    %449 = vector.broadcast %428 : vector<1x32xf32> to vector<16x32xf32>
    %450 = arith.mulf %448, %449 : vector<16x32xf32>
    %451 = vector.broadcast %430 : vector<1x32xf32> to vector<16x32xf32>
    %452 = arith.addf %450, %451 : vector<16x32xf32>
    %c1_189 = arith.constant 1 : index
    %c0_190 = arith.constant 0 : index
    %c0_191 = arith.constant 0 : index
    %453 = vector.load %arg12[%c1_189, %c0_190, %c0_191] : memref<2x32x64xf32, #tpu.memory_space<vmem>>, vector<1x32x64xf32>
    %454 = vector.shape_cast %453 : vector<1x32x64xf32> to vector<32x64xf32>
    %cst_192 = arith.constant dense<0.000000e+00> : vector<16x64xf32>
    %455 = tpu.matmul %452, %454, %cst_192 {dimension_numbers = #tpu.dot_dimension_numbers<[1], [0], [0], [1], [0, 0, 1, 1], [], []>} : vector<16x32xf32>, vector<32x64xf32>, vector<16x64xf32> -> vector<16x64xf32>
    %c1_193 = arith.constant 1 : index
    %c0_194 = arith.constant 0 : index
    %c0_195 = arith.constant 0 : index
    %456 = vector.load %arg13[%c1_193, %c0_194, %c0_195] : memref<2x1x64xf32, #tpu.memory_space<vmem>>, vector<1x1x64xf32>
    %457 = vector.shape_cast %456 : vector<1x1x64xf32> to vector<1x64xf32>
    %458 = vector.broadcast %457 : vector<1x64xf32> to vector<16x64xf32>
    %459 = arith.addf %455, %458 : vector<16x64xf32>
    %cst_196 = arith.constant 0.000000e+00 : f32
    %460 = vector.broadcast %cst_196 : f32 to vector<16x64xf32>
    %461 = arith.maximumf %459, %460 : vector<16x64xf32>
    %c1_197 = arith.constant 1 : index
    %c0_198 = arith.constant 0 : index
    %c0_199 = arith.constant 0 : index
    %462 = vector.load %arg14[%c1_197, %c0_198, %c0_199] : memref<2x64x32xf32, #tpu.memory_space<vmem>>, vector<1x64x32xf32>
    %463 = vector.shape_cast %462 : vector<1x64x32xf32> to vector<64x32xf32>
    %cst_200 = arith.constant dense<0.000000e+00> : vector<16x32xf32>
    %464 = tpu.matmul %461, %463, %cst_200 {dimension_numbers = #tpu.dot_dimension_numbers<[1], [0], [0], [1], [0, 0, 1, 1], [], []>} : vector<16x64xf32>, vector<64x32xf32>, vector<16x32xf32> -> vector<16x32xf32>
    %c1_201 = arith.constant 1 : index
    %c0_202 = arith.constant 0 : index
    %c0_203 = arith.constant 0 : index
    %465 = vector.load %arg15[%c1_201, %c0_202, %c0_203] : memref<2x1x32xf32, #tpu.memory_space<vmem>>, vector<1x1x32xf32>
    %466 = vector.shape_cast %465 : vector<1x1x32xf32> to vector<1x32xf32>
    %467 = vector.broadcast %466 : vector<1x32xf32> to vector<16x32xf32>
    %468 = arith.addf %464, %467 : vector<16x32xf32>
    %469 = arith.addf %452, %468 : vector<16x32xf32>
    %c1_204 = arith.constant 1 : index
    %c0_205 = arith.constant 0 : index
    %c0_206 = arith.constant 0 : index
    %470 = vector.load %arg18[%c1_204, %c0_205, %c0_206] : memref<2x1x32xf32, #tpu.memory_space<vmem>>, vector<1x1x32xf32>
    %471 = vector.shape_cast %470 : vector<1x1x32xf32> to vector<1x32xf32>
    %c1_207 = arith.constant 1 : index
    %c0_208 = arith.constant 0 : index
    %c0_209 = arith.constant 0 : index
    %472 = vector.load %arg19[%c1_207, %c0_208, %c0_209] : memref<2x1x32xf32, #tpu.memory_space<vmem>>, vector<1x1x32xf32>
    %473 = vector.shape_cast %472 : vector<1x1x32xf32> to vector<1x32xf32>
    %cst_210 = arith.constant dense<0.000000e+00> : vector<16xf32>
    %474 = vector.multi_reduction <add>, %469, %cst_210 [1] : vector<16x32xf32> to vector<16xf32>
    %475 = vector.shape_cast %474 : vector<16xf32> to vector<16x1xf32>
    %cst_211 = arith.constant 3.200000e+01 : f32
    %476 = vector.broadcast %cst_211 : f32 to vector<16x1xf32>
    %477 = arith.divf %475, %476 : vector<16x1xf32>
    %478 = vector.broadcast %477 : vector<16x1xf32> to vector<16x32xf32>
    %479 = arith.subf %469, %478 : vector<16x32xf32>
    %480 = arith.mulf %479, %479 : vector<16x32xf32>
    %cst_212 = arith.constant dense<0.000000e+00> : vector<16xf32>
    %481 = vector.multi_reduction <add>, %480, %cst_212 [1] : vector<16x32xf32> to vector<16xf32>
    %482 = vector.shape_cast %481 : vector<16xf32> to vector<16x1xf32>
    %cst_213 = arith.constant 3.200000e+01 : f32
    %483 = vector.broadcast %cst_213 : f32 to vector<16x1xf32>
    %484 = arith.divf %482, %483 : vector<16x1xf32>
    %485 = vector.broadcast %477 : vector<16x1xf32> to vector<16x32xf32>
    %486 = arith.subf %469, %485 : vector<16x32xf32>
    %cst_214 = arith.constant 9.99999974E-6 : f32
    %487 = vector.broadcast %cst_214 : f32 to vector<16x1xf32>
    %488 = arith.addf %484, %487 : vector<16x1xf32>
    %489 = math.rsqrt %488 : vector<16x1xf32>
    %490 = vector.broadcast %489 : vector<16x1xf32> to vector<16x32xf32>
    %491 = arith.mulf %486, %490 : vector<16x32xf32>
    %492 = vector.broadcast %471 : vector<1x32xf32> to vector<16x32xf32>
    %493 = arith.mulf %491, %492 : vector<16x32xf32>
    %494 = vector.broadcast %473 : vector<1x32xf32> to vector<16x32xf32>
    %495 = arith.addf %493, %494 : vector<16x32xf32>
    %c0_215 = arith.constant 0 : index
    %c0_216 = arith.constant 0 : index
    %496 = vector.load %arg20[%c0_215, %c0_216] : memref<1x32xf32, #tpu.memory_space<vmem>>, vector<1x32xf32>
    %c0_217 = arith.constant 0 : index
    %c0_218 = arith.constant 0 : index
    %497 = vector.load %arg21[%c0_217, %c0_218] : memref<1x32xf32, #tpu.memory_space<vmem>>, vector<1x32xf32>
    %cst_219 = arith.constant dense<0.000000e+00> : vector<16xf32>
    %498 = vector.multi_reduction <add>, %495, %cst_219 [1] : vector<16x32xf32> to vector<16xf32>
    %499 = vector.shape_cast %498 : vector<16xf32> to vector<16x1xf32>
    %cst_220 = arith.constant 3.200000e+01 : f32
    %500 = vector.broadcast %cst_220 : f32 to vector<16x1xf32>
    %501 = arith.divf %499, %500 : vector<16x1xf32>
    %502 = vector.broadcast %501 : vector<16x1xf32> to vector<16x32xf32>
    %503 = arith.subf %495, %502 : vector<16x32xf32>
    %504 = arith.mulf %503, %503 : vector<16x32xf32>
    %cst_221 = arith.constant dense<0.000000e+00> : vector<16xf32>
    %505 = vector.multi_reduction <add>, %504, %cst_221 [1] : vector<16x32xf32> to vector<16xf32>
    %506 = vector.shape_cast %505 : vector<16xf32> to vector<16x1xf32>
    %cst_222 = arith.constant 3.200000e+01 : f32
    %507 = vector.broadcast %cst_222 : f32 to vector<16x1xf32>
    %508 = arith.divf %506, %507 : vector<16x1xf32>
    %509 = vector.broadcast %501 : vector<16x1xf32> to vector<16x32xf32>
    %510 = arith.subf %495, %509 : vector<16x32xf32>
    %cst_223 = arith.constant 9.99999974E-6 : f32
    %511 = vector.broadcast %cst_223 : f32 to vector<16x1xf32>
    %512 = arith.addf %508, %511 : vector<16x1xf32>
    %513 = math.rsqrt %512 : vector<16x1xf32>
    %514 = vector.broadcast %513 : vector<16x1xf32> to vector<16x32xf32>
    %515 = arith.mulf %510, %514 : vector<16x32xf32>
    %516 = vector.broadcast %496 : vector<1x32xf32> to vector<16x32xf32>
    %517 = arith.mulf %515, %516 : vector<16x32xf32>
    %518 = vector.broadcast %497 : vector<1x32xf32> to vector<16x32xf32>
    %519 = arith.addf %517, %518 : vector<16x32xf32>
    %520 = vector.extract_strided_slice %519 {offsets = [0, 0], sizes = [4, 32], strides = [1, 1]} : vector<16x32xf32> to vector<4x32xf32>
    %c0_224 = arith.constant 0 : index
    %c0_225 = arith.constant 0 : index
    %521 = vector.load %arg22[%c0_224, %c0_225] : memref<32x8xf32, #tpu.memory_space<vmem>>, vector<32x8xf32>
    %cst_226 = arith.constant dense<0.000000e+00> : vector<4x8xf32>
    %522 = tpu.matmul %520, %521, %cst_226 {dimension_numbers = #tpu.dot_dimension_numbers<[1], [0], [0], [1], [0, 0, 1, 1], [], []>} : vector<4x32xf32>, vector<32x8xf32>, vector<4x8xf32> -> vector<4x8xf32>
    %c0_227 = arith.constant 0 : index
    %c0_228 = arith.constant 0 : index
    %523 = vector.load %arg23[%c0_227, %c0_228] : memref<1x8xf32, #tpu.memory_space<vmem>>, vector<1x8xf32>
    %524 = vector.broadcast %523 : vector<1x8xf32> to vector<4x8xf32>
    %525 = arith.addf %522, %524 : vector<4x8xf32>
    %c0_229 = arith.constant 0 : index
    %c0_230 = arith.constant 0 : index
    %c0_231 = arith.constant 0 : index
    %526 = vector.load %arg24[%c0_229, %c0_230, %c0_231] : memref<1x4x8xf32, #tpu.memory_space<vmem>>, vector<1x4x8xf32>
    %527 = vector.shape_cast %526 : vector<1x4x8xf32> to vector<4x8xf32>
    %528 = vector.shape_cast %525 : vector<4x8xf32> to vector<1x4x8xf32>
    tpu.vector_store %arg24[%c0_229, %c0_230, %c0_231], %528 {strides = array<i32>} : memref<1x4x8xf32, #tpu.memory_space<vmem>>, vector<1x4x8xf32>,
    return
  }
  func.func @transform_0(%arg0: i32) -> (i32, i32, i32) {
    %c0_i32 = arith.constant 0 : i32
    %c0_i32_0 = arith.constant 0 : i32
    %c0_i32_1 = arith.constant 0 : i32
    return %arg0, %c0_i32, %c0_i32_0 : i32, i32, i32
  }
  func.func @transform_1(%arg0: i32) -> (i32, i32) {
    %c0_i32 = arith.constant 0 : i32
    %c0_i32_0 = arith.constant 0 : i32
    %c0_i32_1 = arith.constant 0 : i32
    return %c0_i32, %c0_i32_0 : i32, i32
  }
  func.func @transform_2(%arg0: i32) -> (i32, i32) {
    %c0_i32 = arith.constant 0 : i32
    %c0_i32_0 = arith.constant 0 : i32
    %c0_i32_1 = arith.constant 0 : i32
    return %c0_i32, %c0_i32_0 : i32, i32
  }
  func.func @transform_3(%arg0: i32) -> (i32, i32, i32, i32) {
    %c0_i32 = arith.constant 0 : i32
    %c0_i32_0 = arith.constant 0 : i32
    %c0_i32_1 = arith.constant 0 : i32
    %c0_i32_2 = arith.constant 0 : i32
    %c0_i32_3 = arith.constant 0 : i32
    return %c0_i32, %c0_i32_0, %c0_i32_1, %c0_i32_2 : i32, i32, i32, i32
  }
  func.func @transform_4(%arg0: i32) -> (i32, i32, i32, i32) {
    %c0_i32 = arith.constant 0 : i32
    %c0_i32_0 = arith.constant 0 : i32
    %c0_i32_1 = arith.constant 0 : i32
    %c0_i32_2 = arith.constant 0 : i32
    %c0_i32_3 = arith.constant 0 : i32
    return %c0_i32, %c0_i32_0, %c0_i32_1, %c0_i32_2 : i32, i32, i32, i32
  }
  func.func @transform_5(%arg0: i32) -> (i32, i32, i32, i32) {
    %c0_i32 = arith.constant 0 : i32
    %c0_i32_0 = arith.constant 0 : i32
    %c0_i32_1 = arith.constant 0 : i32
    %c0_i32_2 = arith.constant 0 : i32
    %c0_i32_3 = arith.constant 0 : i32
    return %c0_i32, %c0_i32_0, %c0_i32_1, %c0_i32_2 : i32, i32, i32, i32
  }
  func.func @transform_6(%arg0: i32) -> (i32, i32, i32, i32) {
    %c0_i32 = arith.constant 0 : i32
    %c0_i32_0 = arith.constant 0 : i32
    %c0_i32_1 = arith.constant 0 : i32
    %c0_i32_2 = arith.constant 0 : i32
    %c0_i32_3 = arith.constant 0 : i32
    return %c0_i32, %c0_i32_0, %c0_i32_1, %c0_i32_2 : i32, i32, i32, i32
  }
  func.func @transform_7(%arg0: i32) -> (i32, i32, i32, i32) {
    %c0_i32 = arith.constant 0 : i32
    %c0_i32_0 = arith.constant 0 : i32
    %c0_i32_1 = arith.constant 0 : i32
    %c0_i32_2 = arith.constant 0 : i32
    %c0_i32_3 = arith.constant 0 : i32
    return %c0_i32, %c0_i32_0, %c0_i32_1, %c0_i32_2 : i32, i32, i32, i32
  }
  func.func @transform_8(%arg0: i32) -> (i32, i32, i32, i32) {
    %c0_i32 = arith.constant 0 : i32
    %c0_i32_0 = arith.constant 0 : i32
    %c0_i32_1 = arith.constant 0 : i32
    %c0_i32_2 = arith.constant 0 : i32
    %c0_i32_3 = arith.constant 0 : i32
    return %c0_i32, %c0_i32_0, %c0_i32_1, %c0_i32_2 : i32, i32, i32, i32
  }
  func.func @transform_9(%arg0: i32) -> (i32, i32, i32, i32) {
    %c0_i32 = arith.constant 0 : i32
    %c0_i32_0 = arith.constant 0 : i32
    %c0_i32_1 = arith.constant 0 : i32
    %c0_i32_2 = arith.constant 0 : i32
    %c0_i32_3 = arith.constant 0 : i32
    return %c0_i32, %c0_i32_0, %c0_i32_1, %c0_i32_2 : i32, i32, i32, i32
  }
  func.func @transform_10(%arg0: i32) -> (i32, i32, i32) {
    %c0_i32 = arith.constant 0 : i32
    %c0_i32_0 = arith.constant 0 : i32
    %c0_i32_1 = arith.constant 0 : i32
    %c0_i32_2 = arith.constant 0 : i32
    return %c0_i32, %c0_i32_0, %c0_i32_1 : i32, i32, i32
  }
  func.func @transform_11(%arg0: i32) -> (i32, i32, i32) {
    %c0_i32 = arith.constant 0 : i32
    %c0_i32_0 = arith.constant 0 : i32
    %c0_i32_1 = arith.constant 0 : i32
    %c0_i32_2 = arith.constant 0 : i32
    return %c0_i32, %c0_i32_0, %c0_i32_1 : i32, i32, i32
  }
  func.func @transform_12(%arg0: i32) -> (i32, i32, i32) {
    %c0_i32 = arith.constant 0 : i32
    %c0_i32_0 = arith.constant 0 : i32
    %c0_i32_1 = arith.constant 0 : i32
    %c0_i32_2 = arith.constant 0 : i32
    return %c0_i32, %c0_i32_0, %c0_i32_1 : i32, i32, i32
  }
  func.func @transform_13(%arg0: i32) -> (i32, i32, i32) {
    %c0_i32 = arith.constant 0 : i32
    %c0_i32_0 = arith.constant 0 : i32
    %c0_i32_1 = arith.constant 0 : i32
    %c0_i32_2 = arith.constant 0 : i32
    return %c0_i32, %c0_i32_0, %c0_i32_1 : i32, i32, i32
  }
  func.func @transform_14(%arg0: i32) -> (i32, i32, i32) {
    %c0_i32 = arith.constant 0 : i32
    %c0_i32_0 = arith.constant 0 : i32
    %c0_i32_1 = arith.constant 0 : i32
    %c0_i32_2 = arith.constant 0 : i32
    return %c0_i32, %c0_i32_0, %c0_i32_1 : i32, i32, i32
  }
  func.func @transform_15(%arg0: i32) -> (i32, i32, i32) {
    %c0_i32 = arith.constant 0 : i32
    %c0_i32_0 = arith.constant 0 : i32
    %c0_i32_1 = arith.constant 0 : i32
    %c0_i32_2 = arith.constant 0 : i32
    return %c0_i32, %c0_i32_0, %c0_i32_1 : i32, i32, i32
  }
  func.func @transform_16(%arg0: i32) -> (i32, i32, i32) {
    %c0_i32 = arith.constant 0 : i32
    %c0_i32_0 = arith.constant 0 : i32
    %c0_i32_1 = arith.constant 0 : i32
    %c0_i32_2 = arith.constant 0 : i32
    return %c0_i32, %c0_i32_0, %c0_i32_1 : i32, i32, i32
  }
  func.func @transform_17(%arg0: i32) -> (i32, i32, i32) {
    %c0_i32 = arith.constant 0 : i32
    %c0_i32_0 = arith.constant 0 : i32
    %c0_i32_1 = arith.constant 0 : i32
    %c0_i32_2 = arith.constant 0 : i32
    return %c0_i32, %c0_i32_0, %c0_i32_1 : i32, i32, i32
  }
  func.func @transform_18(%arg0: i32) -> (i32, i32, i32) {
    %c0_i32 = arith.constant 0 : i32
    %c0_i32_0 = arith.constant 0 : i32
    %c0_i32_1 = arith.constant 0 : i32
    %c0_i32_2 = arith.constant 0 : i32
    return %c0_i32, %c0_i32_0, %c0_i32_1 : i32, i32, i32
  }
  func.func @transform_19(%arg0: i32) -> (i32, i32) {
    %c0_i32 = arith.constant 0 : i32
    %c0_i32_0 = arith.constant 0 : i32
    %c0_i32_1 = arith.constant 0 : i32
    return %c0_i32, %c0_i32_0 : i32, i32
  }
  func.func @transform_20(%arg0: i32) -> (i32, i32) {
    %c0_i32 = arith.constant 0 : i32
    %c0_i32_0 = arith.constant 0 : i32
    %c0_i32_1 = arith.constant 0 : i32
    return %c0_i32, %c0_i32_0 : i32, i32
  }
  func.func @transform_21(%arg0: i32) -> (i32, i32) {
    %c0_i32 = arith.constant 0 : i32
    %c0_i32_0 = arith.constant 0 : i32
    %c0_i32_1 = arith.constant 0 : i32
    return %c0_i32, %c0_i32_0 : i32, i32
  }
  func.func @transform_22(%arg0: i32) -> (i32, i32) {
    %c0_i32 = arith.constant 0 : i32
    %c0_i32_0 = arith.constant 0 : i32
    %c0_i32_1 = arith.constant 0 : i32
    return %c0_i32, %c0_i32_0 : i32, i32
  }
  func.func @transform_23(%arg0: i32) -> (i32, i32, i32) {
    %c0_i32 = arith.constant 0 : i32
    %c0_i32_0 = arith.constant 0 : i32
    %c0_i32_1 = arith.constant 0 : i32
    return %arg0, %c0_i32, %c0_i32_0 : i32, i32, i32
  }
}

</mosaic_0001>

<bundles_post_ra>
// kernel: transformer_forward.1
= control target key start
LH: loop header
LB: loop body
LE: loop exit
PB: predicated region body
PF: predicated region fallthrough
CT: control target
= control target key end

     0   :  { %s8428_s0 = inlined_call_operand.vmem [shape: f32[2,16,12], index: 0, kind: input, shape index: {}]   ;;  %s8429_s1 = inlined_call_operand.vmem [shape: f32[16,32], index: 1, kind: input, shape index: {}]   ;;  %s8430_s2 = inlined_call_operand.vmem [shape: f32[12,32], index: 2, kind: input, shape index: {}]   ;;  %s8431_s3 = inlined_call_operand.vmem [shape: f32[2,4,32,8], index: 3, kind: input, shape index: {}]   ;;  %s8432_s4 = inlined_call_operand.vmem [shape: f32[2,4,1,8], index: 4, kind: input, shape index: {}]   ;;  %s8433_s5 = inlined_call_operand.vmem [shape: f32[2,4,32,8], index: 5, kind: input, shape index: {}]   ;;  %s8434_s6 = inlined_call_operand.vmem [shape: f32[2,4,1,8], index: 6, kind: input, shape index: {}]   ;;  %s8435_s7 = inlined_call_operand.vmem [shape: f32[2,4,32,8], index: 7, kind: input, shape index: {}]   ;;  %s8436_s8 = inlined_call_operand.vmem [shape: f32[2,4,1,8], index: 8, kind: input, shape index: {}]   ;;  %s8437_s9 = inlined_call_operand.vmem [shape: f32[2,4,8,32], index: 9, kind: input, shape index: {}]   ;;  %s8438_s10 = inlined_call_operand.vmem [shape: f32[2,1,32], index: 10, kind: input, shape index: {}]   ;;  %s8439_s11 = inlined_call_operand.vmem [shape: f32[2,32,64], index: 11, kind: input, shape index: {}]   ;;  %s8440_s12 = inlined_call_operand.vmem [shape: f32[2,1,64], index: 12, kind: input, shape index: {}]   ;;  %s8441_s13 = inlined_call_operand.vmem [shape: f32[2,64,32], index: 13, kind: input, shape index: {}]   ;;  %s8442_s14 = inlined_call_operand.vmem [shape: f32[2,1,32], index: 14, kind: input, shape index: {}]   ;;  %s8443_s15 = inlined_call_operand.vmem [shape: f32[2,1,32], index: 15, kind: input, shape index: {}]   ;;  %s8444_s16 = inlined_call_operand.vmem [shape: f32[2,1,32], index: 16, kind: input, shape index: {}]   ;;  %s8445_s17 = inlined_call_operand.vmem [shape: f32[2,1,32], index: 17, kind: input, shape index: {}]   ;;  %s8446_s18 = inlined_call_operand.vmem [shape: f32[2,1,32], index: 18, kind: input, shape index: {}]   ;;  %s8447_s19 = inlined_call_operand.vmem [shape: f32[1,32], index: 19, kind: input, shape index: {}]   ;;  %s8448_s20 = inlined_call_operand.vmem [shape: f32[1,32], index: 20, kind: input, shape index: {}]   ;;  %s8449_s21 = inlined_call_operand.vmem [shape: f32[32,8], index: 21, kind: input, shape index: {}]   ;;  %s8450_s22 = inlined_call_operand.vmem [shape: f32[1,8], index: 22, kind: input, shape index: {}]   ;;  %s8451_s23 = inlined_call_operand.hbm [shape: f32[2,4,8], index: 23, kind: output, shape index: {}]  }
   0x1   :  { %8472 = sst [smem:[#allocation12_spill]] %s8428_s0 }
   0x2   :  { %8473 = sst [smem:[#allocation13_spill]] %s8429_s1 }
   0x3   :  { %8474 = sst [smem:[#allocation14_spill]] %s8430_s2 }
   0x4   :  { %8475 = sst [smem:[#allocation15_spill]] %s8431_s3 }
   0x5   :  { %8476 = sst [smem:[#allocation16_spill]] %s8432_s4 }
   0x6   :  { %8477 = sst [smem:[#allocation17_spill]] %s8433_s5 }
   0x7   :  { %8478 = sst [smem:[#allocation18_spill]] %s8434_s6 }
   0x8   :  { %8479 = sst [smem:[#allocation19_spill]] %s8435_s7 }
   0x9   :  { %8480 = sst [smem:[#allocation20_spill]] %s8436_s8 }
   0xa   :  { %8481 = sst [smem:[#allocation21_spill]] %s8437_s9 }
   0xb   :  { %8482 = sst [smem:[#allocation22_spill]] %s8450_s22 }
   0xc   :  { %8483 = sst [smem:[#allocation23_spill]] %s8451_s23 }
   0xd   :  { %28 = vsyncpa [#allocation3], 0 }
   0xe   :  { %30 = vsyncpa [#allocation3 + $0x1], 0  ;;  %s7534_s4 = smov 0   ;;  %s7536_s30 = smov 0  }
   0xf   :  { %s7538_s24 = smov 0   ;;  %s7540_s25 = smov 0  }
  0x10 LB: > { %8484 = sst [smem:[#allocation5_spill]] %s7395_s4  ;;  %s7555_s5 = sadd.s32 4294967295, %s7407_s25   ;;  %s7407_s25 = sphi %s7540_s25, %s8513_s25   ;;  %s7403_s24 = sphi %s7538_s24, %s8515_s24   ;;  %s7399_s30 = sphi %s7536_s30, %s8517_s30   ;;  %s7395_s4 = sphi %s7534_s4, %s8516_s4  }
  0x11   : > { %8485 = sst [smem:[#allocation6_spill]] %s7403_s24  ;;  %s5851_s1 = sadd.s32 4294967294, %s7407_s25  }
  0x12   : > { %8486 = sst [smem:[#allocation7_spill]] %s7407_s25  ;;  %s7559_s26 = sadd.s32 1, %s7407_s25  }
  0x13   : > { %8487 = sst [smem:[#allocation8_spill]] %s7559_s26  ;;  %s531_s2 = sadd.s32 1, %s7403_s24 }
  0x14   : > { %s528_s6 = ssub.s32 %s7407_s25, %s7559_s26  ;;  %p541_p0 = scmp.ne.s32.totalorder %s7403_s24, %s7399_s30 }
  0x15   : > { %p529_p1 = scmp.eq.s32.totalorder %s528_s6, 0  ;;  %p542_p2 = scmp.eq.s32.totalorder %s7555_s5, 1 }
  0x16   : > { %p547_p3 = scmp.ne.s32.totalorder %s7399_s30, %s7395_s4  ;;  %p548_p4 = scmp.eq.s32.totalorder %s5851_s1, 1 }
  0x17   : > { %s7570_s27 = scalar_select %p529_p1, %s7403_s24, %s531_s2  }
  0x18   : > { %p7572_p5 = por %p542_p2, %p541_p0  ;;  %p7576_p6 = por %p548_p4, %p547_p3 }
  0x19   : > { %8488 = sst [smem:[#allocation9_spill]] %s7570_s27  ;;  %p5854_p7 = scmp.ge.s32.totalorder %s7407_s25, 1 }
  0x1a   : > { %s8489_s7 = scalar_select %p7572_p5, 1, 0 }
  0x1b   : > { %s8491_s28 = scalar_select %p7576_p6, 1, 0 }
  0x1c   : > { %8490 = sst [smem:[#allocation10_spill]] %s8489_s7  ;;  %p640_p8 = scmp.lt.s32.totalorder %s7407_s25, 3 }
  0x1d   : > { %8492 = sst [smem:[#allocation11_spill]] %s8491_s28 }
  0x1e   : > { %p641_p9 = pnand %p5854_p7, %p640_p8 }
  0x1f   : > { %s8493_s0 = sld [smem:[#allocation14_spill]] (!%p641_p9)  ;;  %vm722_vm0 = vcmask (!%p641_p9), 1043456   ;;  %p704_p10 = scmp.lt.s32.totalorder (!%p641_p9), %s7555_s5, 1  ;;  %vm7409_vm1 = vmmov (!%p641_p9), 1   ;;  %vm715_vm3 = vcmask (!%p641_p9), 97280   ;;  %vm871_vm4 = vcmask (!%p641_p9), 261120  }
  0x20   : > { %644 = sbr.rel (%p641_p9) target bundleno = 10760 (0x2a08), region = 112  ;;  %vm6879_vm2 = vmpackc.low (!%p641_p9), %vm722_vm0, %vm7409_vm1  ;;  %s8494_s24 = sld [smem:[#allocation15_spill]] (!%p641_p9)  ;;  %vm1115_vm5 = vcmask (!%p641_p9), 64512   ;;  %vm1205_vm7 = vcmask (!%p641_p9), 130048   ;;  %vm3107_vm8 = vcmask (!%p641_p9), 523264   ;;  %vm7411_vm9 = vmmov (!%p641_p9), 0  }
  0x21   : > { %s8496_s23 = sld [smem:[#allocation17_spill]] (!%p641_p9)  ;;  %s8497_s4 = sld [smem:[#allocation12_spill]] (!%p641_p9)  ;;  %vm7665_vm6 = vmpackc.low (!%p641_p9), %vm1115_vm5, %vm1115_vm5  ;;  %vm5776_vm10 = vcmask (!%p641_p9), 60416  }
  0x22   : > { %s8500_s6 = sld [smem:[#allocation18_spill]] (!%p641_p9)  ;;  %s8501_s2 = sld [smem:[#allocation16_spill]] (!%p641_p9) }
  0x23   : > { %s8504_s8 = sld [smem:[#allocation20_spill]] (!%p641_p9)  ;;  %s8505_s9 = sld [smem:[#allocation21_spill]] (!%p641_p9) }
  0x24   : > { %s701_s27 = sand.u32 (!%p641_p9), 1, %s7399_s30   ;;  %s8507_s1 = sld [smem:[#allocation22_spill]] (!%p641_p9) }
  0x25   : > { %v711_v0 = vld [vmem:[%s8493_s0] sm:$0xff] (!%p641_p9)  ;;  %v712_v1 = vld [vmem:[%s8493_s0 + $0x8] sm:$0xf] (!%p641_p9)  ;;  %s5855_s22 = sshll.u32 (!%p641_p9), %s701_s27, 2  ;;  %s5779_s25 = scalar_lea.sflag (!%p641_p9), [#allocation3], %s701_s27 }
  0x26   : > { %v6878_v2 = vpack.c.bf16 (!%p641_p9), %v712_v1, %v711_v0  ;;  %s8495_s26 = smov (!%p641_p9), %s8494_s24  ;;  %v801_v3 = vld [vmem:[%s8494_s24] sm:$0xff] (!%p641_p9)  ;;  %s8508_s24 = sld [smem:[#allocation23_spill]] (!%p641_p9) }
  0x27   : > { %v802_v4 = vld [vmem:[%s8495_s26 + $0x8] sm:$0xff]  ;;  %s705_s29 = scalar_select %p704_p10, %s7555_s5, 1  ;;  %v817_v6 = vld [vmem:[%s8496_s23] sm:$0xff]  ;;  %v803_v11 = vld [vmem:[%s8495_s26 + $0x10] sm:$0xff] }
  0x28   : > { %v6884_v5 = vpack.c.bf16 %v802_v4, %v801_v3  ;;  %v818_v7 = vld [vmem:[%s8496_s23 + $0x8] sm:$0xff]  ;;  %6880 = vmatprep.subr.msk.bf16.mxu0 %vm6879_vm2, %v6878_v2  ;;  %v804_v12 = vld [vmem:[%s8495_s26 + $0x18] sm:$0xff]  ;;  %v819_v14 = vld [vmem:[%s8496_s23 + $0x10] sm:$0xff] }
  0x29   : > { %v6892_v8 = vpack.c.bf16 %v818_v7, %v817_v6  ;;  %6883 = vmatpush3.bf16.msk.msra.mxu0 %vm6879_vm2, %v6878_v2  ;;  %s6110_s0 = sshll.u32 %s705_s29, 4  ;;  %v6888_v13 = vpack.c.bf16 %v804_v12, %v803_v11  ;;  %v820_v15 = vld [vmem:[%s8496_s23 + $0x18] sm:$0xff]  ;;  %s8499_s29 = sld [smem:[#allocation13_spill]]  ;;  %v5864_v29 = vld [vmem:[%s8500_s6] ss:$0 sm:$0xff]  ;;  %v806_v37 = vld [vmem:[%s8495_s26 + $0x28] sm:$0xff] }
  0x2a   : > { %6885 = vmatprep.subr.bf16.mxu1 %v6884_v5  ;;  %s708_s28 = scalar_lea.vmem %s8497_s4, %s6110_s0  ;;  %v6896_v16 = vpack.c.bf16 %v820_v15, %v819_v14  ;;  %v5861_v30 = vld [vmem:[%s8501_s2] ss:$0 sm:$0xff]  ;;  %v807_v47 = vld [vmem:[%s8495_s26 + $0x30] sm:$0xff]  ;;  %v808_v48 = vld [vmem:[%s8495_s26 + $0x38] sm:$0xff] }
  0x2b   : > { %6887 = vmatpush3.bf16.msra.mxu1 %v6884_v5  ;;  %6893 = vmatprep.subr.bf16.mxu0 %v6892_v8  ;;  %v709_v9 = vld [vmem:[%s708_s28] sm:$0xff]  ;;  %v710_v10 = vld [vmem:[%s708_s28 + $0x8] sm:$0xff]  ;;  %s8498_s28 = sld [smem:[#allocation19_spill]]  ;;  %v6922_v52 = vpack.c.bf16 %v808_v48, %v807_v47 }
  0x2c   : > { %6388 = vmatprep.mubr.msk.f32.mxu0 %vm715_vm3, %v709_v9  ;;  %6889 = vmatprep.subr.bf16.mxu1 %v6888_v13  ;;  %v805_v36 = vld [vmem:[%s8495_s26 + $0x20] sm:$0xff] }
  0x2d   : > { %6389 = vmatmul.mubr.msk.f32.vlgmr.msra.gmra.mrb[0].mxu0 %vm715_vm3, %v710_v10  ;;  %v6918_v42 = vpack.c.bf16 %v806_v37, %v805_v36  ;;  %v5867_v43 = vld [vmem:[%s8504_s8] ss:$0 sm:$0xff]  ;;  %v5876_v0 = vld [vmem:[%s8501_s2 + $0x1] ss:$0 sm:$0xff] }
  0x2e   : > { %6895 = vmatpush3.bf16.msra.mxu0 %v6892_v8  ;;  %v5882_v5 = vld [vmem:[%s8504_s8 + $0x1] ss:$0 sm:$0xff] }
  0x2f   : > { %6891 = vmatpush3.bf16.msra.mxu1 %v6888_v13  ;;  %6897 = vmatprep.subr.bf16.mxu0 %v6896_v16  ;;  %v713_v20 = vld [vmem:[%s8499_s29] sm:$0xff]  ;;  %v714_v21 = vld [vmem:[%s8499_s29 + $0x8] sm:$0xff] }
  0x31   : > { %v833_v17 = vld [vmem:[%s8498_s28] sm:$0xff]  ;;  %v834_v18 = vld [vmem:[%s8498_s28 + $0x8] sm:$0xff]  ;;  %v835_v23 = vld [vmem:[%s8498_s28 + $0x10] sm:$0xff] }
  0x32   : > { %6899 = vmatpush3.bf16.msra.mxu0 %v6896_v16  ;;  %v6900_v19 = vpack.c.bf16 %v834_v18, %v833_v17  ;;  %v836_v24 = vld [vmem:[%s8498_s28 + $0x18] sm:$0xff]  ;;  %v837_v53 = vld [vmem:[%s8498_s28 + $0x20] sm:$0xff]  ;;  %v838_v54 = vld [vmem:[%s8498_s28 + $0x28] sm:$0xff] }
  0x33   : > { %v6904_v28 = vpack.c.bf16 %v836_v24, %v835_v23  ;;  %v6934_v55 = vpack.c.bf16 %v838_v54, %v837_v53  ;;  %v839_v56 = vld [vmem:[%s8498_s28 + $0x30] sm:$0xff]  ;;  %v840_v57 = vld [vmem:[%s8498_s28 + $0x38] sm:$0xff] }
  0x34   : > { %6901 = vmatprep.subr.bf16.mxu1 %v6900_v19  ;;  %v6938_v58 = vpack.c.bf16 %v840_v57, %v839_v56 }
 0x100   : > { %v6390_v22 = vpop.f32.mrb[0].mxu0 }
 0x101   : > { %v792_v25 = vpop.f32.mrb[1].mxu0  ;;  %v7637_v27 = vadd.f32 %v6390_v22, %v714_v21  ;;  %v821_v21 = vld [vmem:[%s8496_s23 + $0x20] sm:$0xff]  ;;  %v822_v22 = vld [vmem:[%s8496_s23 + $0x28] sm:$0xff] }
 0x102   : > { %v7635_v26 = vadd.f32 %v792_v25, %v713_v20  ;;  %v6926_v23 = vpack.c.bf16 %v822_v22, %v821_v21  ;;  %v5895_v22 = vld [vmem:[%s8501_s2 + $0x2] ss:$0 sm:$0xff] }
 0x104   : > { %6399 = vmatprep.mubr.msk.f32.mxu1 %vm871_vm4, %v7635_v26  ;;  %6410 = vmatprep.mubr.msk.f32.mxu0 %vm871_vm4, %v7635_v26 }
 0x105   : > { %6400 = vmatmul.mubr.msk.f32.vlgmr.msra.gmra.mrb[0].mxu1 %vm871_vm4, %v7637_v27  ;;  %6411 = vmatmul.mubr.msk.f32.vlgmr.msra.gmra.mrb[2].mxu0 %vm871_vm4, %v7637_v27 }
 0x106   : > { %6903 = vmatpush3.bf16.msra.mxu1 %v6900_v19  ;;  %6421 = vmatprep.mubr.msk.f32.mxu1 %vm871_vm4, %v7635_v26 }
 0x107   : > { %6905 = vmatprep.subr.bf16.mxu1 %v6904_v28 }
 0x10a   : > { %6907 = vmatpush3.bf16.msra.mxu1 %v6904_v28 }
 0x10d   : > { %6422 = vmatmul.mubr.msk.f32.vlgmr.msra.gmra.mrb[2].mxu1 %vm871_vm4, %v7637_v27 }
 0x1d8   : > { %v6401_v31 = vpop.f32.mrb[0].mxu1  ;;  %v6412_v32 = vpop.f32.mrb[2].mxu0 }
 0x1d9   : > { %v1031_v33 = vadd.f32 %v6412_v32, %v5864_v29  ;;  %v944_v34 = vpop.f32.mrb[1].mxu1  ;;  %v1025_v35 = vpop.f32.mrb[3].mxu0  ;;  %v950_v50 = vadd.f32 %v6401_v31, %v5861_v30  ;;  %v824_v31 = vld [vmem:[%s8496_s23 + $0x38] sm:$0xff] }
 0x1da   : > { %v945_v38 = vadd.f32 %v5861_v30, %v944_v34  ;;  %v1026_v39 = vadd.f32 %v5864_v29, %v1025_v35  ;;  %v823_v30 = vld [vmem:[%s8496_s23 + $0x30] sm:$0xff] }
 0x1db   : > { %v6930_v34 = vpack.c.bf16 %v824_v31, %v823_v30  ;;  %v5901_v31 = vld [vmem:[%s8504_s8 + $0x2] ss:$0 sm:$0xff] }
 0x1dc   : > { %v6908_v41 = vpack.c.bf16 %v1031_v33, %v1026_v39  ;;  %6428 = vmatprep.mubr.msk.f32.mxu0 %vm1115_vm5, %v945_v38  ;;  %v5879_v38 = vld [vmem:[%s8500_s6 + $0x1] ss:$0 sm:$0xff] }
 0x1de   : > { %6910 = vmatprep.subr.msk.bf16.mxu0 %vm7665_vm6, %v6908_v41 }
 0x1df   : > { %6913 = vmatpush3.bf16.xpose.msk.msra.mxu0 %vm7665_vm6, %v6908_v41 }
 0x1e0   : > { %v6423_v44 = vpop.f32.mrb[2].mxu1  ;;  %6919 = vmatprep.subr.bf16.mxu0 %v6918_v42 }
 0x1e1   : > { %v1112_v45 = vadd.f32 %v6423_v44, %v5867_v43  ;;  %v1106_v46 = vpop.f32.mrb[3].mxu1 }
 0x1e2   : > { %v1107_v49 = vadd.f32 %v5867_v43, %v1106_v46 }
 0x1e4   : > { %v6914_v51 = vpack.c.bf16 %v1112_v45, %v1107_v49 }
 0x1e6   : > { %6915 = vmatprep.subr.bf16.mxu1 %v6914_v51  ;;  %6429 = vmatmul.mubr.msk.f32.vlgmr.msra.gmra.mrb[4].mxu0 %vm1115_vm5, %v950_v50 }
 0x1e7   : > { %6917 = vmatpush3.bf16.msra.mxu1 %v6914_v51  ;;  %6921 = vmatpush3.bf16.msra.mxu0 %v6918_v42 }
 0x1e8   : > { %6446 = vmatprep.mubr.msk.f32.mxu0 %vm871_vm4, %v7635_v26  ;;  %6923 = vmatprep.subr.bf16.mxu0 %v6922_v52 }
 0x1e9   : > { %6927 = vmatprep.subr.bf16.mxu1 %v6926_v23 }
 0x1eb   : > { %6925 = vmatpush3.bf16.msra.mxu0 %v6922_v52 }
 0x1ec   : > { %6935 = vmatprep.subr.bf16.mxu0 %v6934_v55 }
 0x1ee   : > { %6447 = vmatmul.mubr.msk.f32.vlgmr.msra.gmra.mrb[6].mxu0 %vm871_vm4, %v7637_v27 }
 0x1ef   : > { %6937 = vmatpush3.bf16.msra.mxu0 %v6934_v55  ;;  %6468 = vmatprep.mubr.msk.f32.mxu0 %vm871_vm4, %v7635_v26 }
 0x1f0   : > { %6939 = vmatprep.subr.bf16.mxu0 %v6938_v58 }
 0x1f3   : > { %6941 = vmatpush3.bf16.msra.mxu0 %v6938_v58 }
 0x1f6   : > { %6469 = vmatmul.mubr.msk.f32.vlgmr.msra.gmra.mrb[8].mxu0 %vm871_vm4, %v7637_v27 }
 0x2b9   : > { %v6430_v59 = vpop.f32.mrb[4].mxu0 }
 0x2ba   : > { %v1194_v60 = vpop.f32.mrb[5].mxu0  ;;  %v1204_v62 = vmul.f32 0.35355338, %v6430_v59 }
 0x2bb   : > { %v1203_v61 = vmul.f32 0.35355338, %v1194_v60 }
 0x2bc   : > { %v1209_v2 = vsel %vm1205_vm7, %v1204_v62, -inf }
 0x2bd   : > { %v1206_v63 = vsel %vm1205_vm7, %v1203_v61, -inf }
 0x2be   : > { %1207 = vmax.xlane.f32.xlu0 %v1206_v63 }
 0x2c1   : > { %v6448_v1 = vpop.f32.mrb[6].mxu0 }
 0x2c2   : > { %v1387_v3 = vadd.f32 %v6448_v1, %v5876_v0  ;;  %v1381_v4 = vpop.f32.mrb[7].mxu0  ;;  %1210 = vmax.xlane.f32.xlu0 %v1209_v2 }
 0x2c3   : > { %v1382_v35 = vadd.f32 %v5876_v0, %v1381_v4  ;;  %v850_v0 = vld [vmem:[%s8505_s9 + $0x8] sm:$0xff]  ;;  %v811_v4 = vld [vmem:[%s8495_s26 + $0x50] sm:$0xff] }
 0x2c9   : > { %v6470_v6 = vpop.f32.mrb[8].mxu0 }
 0x2ca   : > { %v1549_v7 = vadd.f32 %v6470_v6, %v5882_v5  ;;  %v1543_v8 = vpop.f32.mrb[9].mxu0 }
 0x2cb   : > { %v1544_v9 = vadd.f32 %v5882_v5, %v1543_v8  ;;  %v812_v5 = vld [vmem:[%s8495_s26 + $0x58] sm:$0xff] }
 0x2cd   : > { %v6948_v10 = vpack.c.bf16 %v1549_v7, %v1544_v9  ;;  %v6956_v9 = vpack.c.bf16 %v812_v5, %v811_v4  ;;  %v815_v4 = vld [vmem:[%s8495_s26 + $0x70] sm:$0xff]  ;;  %v816_v5 = vld [vmem:[%s8495_s26 + $0x78] sm:$0xff] }
 0x2cf   : > { %6949 = vmatprep.subr.bf16.mxu0 %v6948_v10 }
 0x2d0   : > { %6951 = vmatpush3.bf16.msra.mxu0 %v6948_v10  ;;  %v841_v10 = vld [vmem:[%s8498_s28 + $0x40] sm:$0xff] }
 0x34b   : > { %v1208_v11 = vpop.xlane.xlu0 %1207 }
 0x34c   : > { %v1212_v12 = vsub.f32 %v1203_v61, %v1208_v11  ;;  %v809_v61 = vld [vmem:[%s8495_s26 + $0x40] sm:$0xff]  ;;  %v842_v11 = vld [vmem:[%s8498_s28 + $0x48] sm:$0xff] }
 0x34e   : > { %v1214_v13 = vmul.f32 1.442695, %v1212_v12  ;;  %v6968_v12 = vpack.c.bf16 %v842_v11, %v841_v10  ;;  %v845_v10 = vld [vmem:[%s8498_s28 + $0x60] sm:$0xff]  ;;  %v846_v11 = vld [vmem:[%s8498_s28 + $0x68] sm:$0xff] }
 0x34f   : > { %v1211_v14 = vpop.xlane.xlu0 %1210 }
 0x350   : > { %7265 = vpow2.f32 %v1214_v13  ;;  %v1213_v15 = vsub.f32 %v1204_v62, %v1211_v14  ;;  %v810_v62 = vld [vmem:[%s8495_s26 + $0x48] sm:$0xff]  ;;  %v843_v13 = vld [vmem:[%s8498_s28 + $0x50] sm:$0xff]  ;;  %v844_v14 = vld [vmem:[%s8498_s28 + $0x58] sm:$0xff] }
 0x351   : > { %v6952_v63 = vpack.c.bf16 %v810_v62, %v809_v61  ;;  %v813_v61 = vld [vmem:[%s8495_s26 + $0x60] sm:$0xff]  ;;  %v814_v62 = vld [vmem:[%s8495_s26 + $0x68] sm:$0xff] }
 0x352   : > { %v1216_v16 = vmul.f32 1.442695, %v1213_v15  ;;  %v6972_v15 = vpack.c.bf16 %v844_v14, %v843_v13  ;;  %v847_v13 = vld [vmem:[%s8498_s28 + $0x70] sm:$0xff]  ;;  %v848_v14 = vld [vmem:[%s8498_s28 + $0x78] sm:$0xff] }
 0x353   : > { %6953 = vmatprep.subr.bf16.mxu0 %v6952_v63 }
 0x354   : > { %7267 = vpow2.f32 %v1216_v16  ;;  %v849_v16 = vld [vmem:[%s8505_s9] sm:$0xff] }
 0x35a   : > { %v7266_v17 = vpop.eup %7265 }
 0x35b   : > { %v1218_v18 = vsel %vm1205_vm7, %v7266_v17, 0.0 }
 0x35c   : > { %1219 = vadd.xlane.f32.xlu1 %v1218_v18  ;;  %v826_v18 = vld [vmem:[%s8496_s23 + $0x48] sm:$0xff] }
 0x35e   : > { %v7268_v19 = vpop.eup %7267 }
 0x35f   : > { %v1221_v20 = vsel %vm1205_vm7, %v7268_v19, 0.0 }
 0x360   : > { %1222 = vadd.xlane.f32.xlu1 %v1221_v20 }
 0x3e9   : > { %v1220_v24 = vpop.xlane.xlu1 %1219 }
 0x3ea   : > { %7269 = vrcp.f32 %v1220_v24  ;;  %v828_v24 = vld [vmem:[%s8496_s23 + $0x58] sm:$0xff] }
 0x3ed   : > { %v1223_v25 = vpop.xlane.xlu1 %1222 }
 0x3ee   : > { %7271 = vrcp.f32 %v1223_v25 }
 0x3f4   : > { %v7270_v28 = vpop.eup %7269 }
 0x3f5   : > { %v1226_v29 = vmul.f32 %v7270_v28, %v7266_v17  ;;  %v825_v17 = vld [vmem:[%s8496_s23 + $0x40] sm:$0xff] }
 0x3f6   : > { %v6960_v21 = vpack.c.bf16 %v826_v18, %v825_v17  ;;  %v830_v17 = vld [vmem:[%s8496_s23 + $0x68] sm:$0xff] }
 0x3f7   : > { %6435 = vmatprep.mubr.msk.f32.mxu1 %vm1205_vm7, %v1226_v29 }
 0x3f8   : > { %v7272_v32 = vpop.eup %7271 }
 0x3f9   : > { %v1227_v33 = vmul.f32 %v7272_v32, %v7268_v19 }
 0x3fb   : > { %6436 = vmatmul.mubr.msk.f32.vlgmr.msra.gmra.mrb[4].mxu1 %vm1205_vm7, %v1227_v33 }
 0x3fc   : > { %6929 = vmatpush3.bf16.msra.mxu1 %v6926_v23  ;;  %6457 = vmatprep.mubr.msk.f32.mxu1 %vm871_vm4, %v7635_v26  ;;  %v827_v23 = vld [vmem:[%s8496_s23 + $0x50] sm:$0xff] }
 0x3fd   : > { %6931 = vmatprep.subr.bf16.mxu1 %v6930_v34  ;;  %v6964_v30 = vpack.c.bf16 %v828_v24, %v827_v23  ;;  %v5912_v24 = vld [vmem:[%s8501_s2 + $0x3] ss:$0 sm:$0xff] }
 0x400   : > { %6933 = vmatpush3.bf16.msra.mxu1 %v6930_v34 }
 0x403   : > { %6458 = vmatmul.mubr.msk.f32.vlgmr.msra.gmra.mrb[6].mxu1 %vm871_vm4, %v7637_v27 }
 0x404   : > { %6475 = vmatprep.mubr.msk.f32.mxu1 %vm1115_vm5, %v1382_v35 }
 0x4ce   : > { %v7733_v36 = vpop.f32.mrb[4].mxu1 }
 0x4cf   : > { %v7735_v37 = vpop.f32.mrb[5].mxu1 }
 0x4d6   : > { %v6459_v39 = vpop.f32.mrb[6].mxu1 }
 0x4d7   : > { %v1468_v41 = vadd.f32 %v6459_v39, %v5879_v38  ;;  %v1462_v42 = vpop.f32.mrb[7].mxu1 }
 0x4d8   : > { %v1463_v43 = vadd.f32 %v5879_v38, %v1462_v42 }
 0x4da   : > { %v6942_v44 = vpack.c.bf16 %v1468_v41, %v1463_v43 }
 0x4dc   : > { %6944 = vmatprep.subr.msk.bf16.mxu1 %vm7665_vm6, %v6942_v44 }
 0x4dd   : > { %6947 = vmatpush3.bf16.xpose.msk.msra.mxu1 %vm7665_vm6, %v6942_v44 }
 0x4de   : > { %6485 = vmatprep.subr.mxu1 %v850_v0 }
 0x4e4   : > { %6476 = vmatmul.mubr.msk.f32.vlgmr.msra.gmra.mrb[8].mxu1 %vm1115_vm5, %v1387_v3 }
 0x4e5   : > { %6486 = vmatpush3.msra.mxu1 %v850_v0  ;;  %v851_v0 = vld [vmem:[%s8505_s9 + $0x10] sm:$0xff] }
 0x4e6   : > { %6490 = vmatprep.subr.mxu1 %v849_v16 }
 0x5b7   : > { %v6477_v45 = vpop.f32.mrb[8].mxu1 }
 0x5b8   : > { %v1640_v46 = vmul.f32 0.35355338, %v6477_v45  ;;  %v1630_v47 = vpop.f32.mrb[9].mxu1 }
 0x5b9   : > { %v1639_v48 = vmul.f32 0.35355338, %v1630_v47 }
 0x5ba   : > { %v1644_v49 = vsel %vm1205_vm7, %v1640_v46, -inf }
 0x5bb   : > { %1645 = vmax.xlane.f32.xlu1 %v1644_v49  ;;  %v1641_v50 = vsel %vm1205_vm7, %v1639_v48, -inf }
 0x5bc   : > { %1642 = vmax.xlane.f32.xlu0 %v1641_v50 }
 0x648   : > { %v1646_v51 = vpop.xlane.xlu1 %1645 }
 0x649   : > { %v1648_v52 = vsub.f32 %v1640_v46, %v1646_v51  ;;  %v1643_v53 = vpop.xlane.xlu0 %1642 }
 0x64a   : > { %v1647_v54 = vsub.f32 %v1639_v48, %v1643_v53 }
 0x64b   : > { %v1651_v55 = vmul.f32 1.442695, %v1648_v52 }
 0x64c   : > { %v1649_v56 = vmul.f32 1.442695, %v1647_v54 }
 0x64d   : > { %7273 = vpow2.f32 %v1651_v55 }
 0x64e   : > { %7275 = vpow2.f32 %v1649_v56 }
 0x657   : > { %v7274_v57 = vpop.eup %7273 }
 0x658   : > { %v7276_v58 = vpop.eup %7275  ;;  %v1656_v59 = vsel %vm1205_vm7, %v7274_v57, 0.0 }
 0x659   : > { %1657 = vadd.xlane.f32.xlu1 %v1656_v59  ;;  %v1653_v60 = vsel %vm1205_vm7, %v7276_v58, 0.0 }
 0x65a   : > { %1654 = vadd.xlane.f32.xlu0 %v1653_v60 }
 0x6e6   : > { %v1658_v1 = vpop.xlane.xlu1 %1657 }
 0x6e7   : > { %7277 = vrcp.f32 %v1658_v1  ;;  %v1655_v2 = vpop.xlane.xlu0 %1654 }
 0x6e8   : > { %7279 = vrcp.f32 %v1655_v2 }
 0x6f1   : > { %v7278_v3 = vpop.eup %7277 }
 0x6f2   : > { %v7280_v6 = vpop.eup %7279  ;;  %v1662_v8 = vmul.f32 %v7278_v3, %v7274_v57 }
 0x6f3   : > { %v1661_v7 = vmul.f32 %v7280_v6, %v7276_v58 }
 0x6f5   : > { %6482 = vmatprep.mubr.msk.f32.mxu0 %vm1205_vm7, %v1661_v7 }
 0x6f6   : > { %6483 = vmatmul.mubr.msk.f32.vlgmr.msra.gmra.mrb[10].mxu0 %vm1205_vm7, %v1662_v8 }
 0x6f7   : > { %6955 = vmatpush3.bf16.msra.mxu0 %v6952_v63  ;;  %6503 = vmatprep.mubr.msk.f32.mxu0 %vm871_vm4, %v7635_v26  ;;  %v6986_v63 = vpack.c.bf16 %v814_v62, %v813_v61 }
 0x6f8   : > { %6957 = vmatprep.subr.bf16.mxu0 %v6956_v9 }
 0x6fb   : > { %6959 = vmatpush3.bf16.msra.mxu0 %v6956_v9  ;;  %v6990_v9 = vpack.c.bf16 %v816_v5, %v815_v4  ;;  %v5929_v5 = vld [vmem:[%s8438_s10] ss:$0 sm:$0xff] }
 0x6fc   : > { %6969 = vmatprep.subr.bf16.mxu0 %v6968_v12 }
 0x6fe   : > { %6504 = vmatmul.mubr.msk.f32.vlgmr.msra.gmra.mrb[12].mxu0 %vm871_vm4, %v7637_v27 }
 0x6ff   : > { %6971 = vmatpush3.bf16.msra.mxu0 %v6968_v12  ;;  %6525 = vmatprep.mubr.msk.f32.mxu0 %vm871_vm4, %v7635_v26  ;;  %v7002_v12 = vpack.c.bf16 %v846_v11, %v845_v10 }
 0x700   : > { %6973 = vmatprep.subr.bf16.mxu0 %v6972_v15 }
 0x703   : > { %6975 = vmatpush3.bf16.msra.mxu0 %v6972_v15  ;;  %v7006_v15 = vpack.c.bf16 %v848_v14, %v847_v13 }
 0x706   : > { %6526 = vmatmul.mubr.msk.f32.vlgmr.msra.gmra.mrb[14].mxu0 %vm871_vm4, %v7637_v27 }
 0x7c9   : > { %v6484_v19 = vpop.f32.mrb[10].mxu0 }
 0x7ca   : > { %v1735_v20 = vpop.f32.mrb[11].mxu0 }
 0x7cb   : > { %6487 = vmatprep.mubr.msk.f32.mxu1 %vm1115_vm5, %v1735_v20  ;;  %v832_v20 = vld [vmem:[%s8496_s23 + $0x78] sm:$0xff] }
 0x7cc   : > { %6488 = vmatmul.mubr.msk.f32.vlgmr.msra.gmra.mrb[10].mxu1 %vm1115_vm5, %v6484_v19  ;;  %v831_v19 = vld [vmem:[%s8496_s23 + $0x70] sm:$0xff] }
 0x7cd   : > { %6491 = vmatpush3.msra.mxu1 %v849_v16  ;;  %6492 = vmatprep.mubr.msk.f32.mxu1 %vm1115_vm5, %v7735_v37  ;;  %v829_v16 = vld [vmem:[%s8496_s23 + $0x60] sm:$0xff]  ;;  %v6998_v23 = vpack.c.bf16 %v832_v20, %v831_v19 }
 0x7ce   : > { %6961 = vmatprep.subr.bf16.mxu1 %v6960_v21  ;;  %v6994_v18 = vpack.c.bf16 %v830_v17, %v829_v16 }
 0x7d1   : > { %v6505_v25 = vpop.f32.mrb[12].mxu0 }
 0x7d2   : > { %v1984_v28 = vadd.f32 %v6505_v25, %v5895_v22  ;;  %v1978_v29 = vpop.f32.mrb[13].mxu0 }
 0x7d3   : > { %v1979_v35 = vadd.f32 %v5895_v22, %v1978_v29 }
 0x7d4   : > { %6493 = vmatmul.mubr.msk.f32.vlgmr.msra.gmra.mrb[10].mxu1 %vm1115_vm5, %v7733_v36  ;;  %v5898_v36 = vld [vmem:[%s8500_s6 + $0x2] ss:$0 sm:$0xff] }
 0x7d5   : > { %6963 = vmatpush3.bf16.msra.mxu1 %v6960_v21  ;;  %6514 = vmatprep.mubr.msk.f32.mxu1 %vm871_vm4, %v7635_v26 }
 0x7d6   : > { %6965 = vmatprep.subr.bf16.mxu1 %v6964_v30 }
 0x7d9   : > { %6967 = vmatpush3.bf16.msra.mxu1 %v6964_v30  ;;  %v6527_v32 = vpop.f32.mrb[14].mxu0 }
 0x7da   : > { %v2146_v33 = vadd.f32 %v6527_v32, %v5901_v31  ;;  %v2140_v34 = vpop.f32.mrb[15].mxu0 }
 0x7db   : > { %v2141_v37 = vadd.f32 %v5901_v31, %v2140_v34  ;;  %v5918_v31 = vld [vmem:[%s8504_s8 + $0x3] ss:$0 sm:$0xff] }
 0x7dc   : > { %6515 = vmatmul.mubr.msk.f32.vlgmr.msra.gmra.mrb[12].mxu1 %vm871_vm4, %v7637_v27 }
 0x7dd   : > { %v6982_v38 = vpack.c.bf16 %v2146_v33, %v2141_v37  ;;  %6532 = vmatprep.mubr.msk.f32.mxu1 %vm1115_vm5, %v1979_v35 }
 0x7df   : > { %6983 = vmatprep.subr.bf16.mxu0 %v6982_v38 }
 0x7e0   : > { %6985 = vmatpush3.bf16.msra.mxu0 %v6982_v38  ;;  %v5915_v38 = vld [vmem:[%s8500_s6 + $0x3] ss:$0 sm:$0xff] }
 0x7e1   : > { %6987 = vmatprep.subr.bf16.mxu0 %v6986_v63 }
 0x8af   : > { %v6516_v39 = vpop.f32.mrb[12].mxu1 }
 0x8b0   : > { %v2065_v41 = vadd.f32 %v6516_v39, %v5898_v36  ;;  %v2059_v42 = vpop.f32.mrb[13].mxu1 }
 0x8b1   : > { %v2060_v43 = vadd.f32 %v5898_v36, %v2059_v42 }
 0x8b3   : > { %v6976_v44 = vpack.c.bf16 %v2065_v41, %v2060_v43 }
 0x8b5   : > { %6978 = vmatprep.subr.msk.bf16.mxu1 %vm7665_vm6, %v6976_v44 }
 0x8b6   : > { %6981 = vmatpush3.bf16.xpose.msk.msra.mxu1 %vm7665_vm6, %v6976_v44 }
 0x8b7   : > { %6542 = vmatprep.subr.mxu1 %v851_v0 }
 0x8bd   : > { %6533 = vmatmul.mubr.msk.f32.vlgmr.msra.gmra.mrb[14].mxu1 %vm1115_vm5, %v1984_v28 }
 0x8be   : > { %6543 = vmatpush3.msra.mxu1 %v851_v0 }
 0x8bf   : > { %6995 = vmatprep.subr.bf16.mxu1 %v6994_v18 }
 0x990   : > { %v6534_v45 = vpop.f32.mrb[14].mxu1 }
 0x991   : > { %v2237_v46 = vmul.f32 0.35355338, %v6534_v45  ;;  %v2227_v47 = vpop.f32.mrb[15].mxu1 }
 0x992   : > { %v2236_v48 = vmul.f32 0.35355338, %v2227_v47 }
 0x993   : > { %v2241_v49 = vsel %vm1205_vm7, %v2237_v46, -inf }
 0x994   : > { %2242 = vmax.xlane.f32.xlu1 %v2241_v49  ;;  %v2238_v50 = vsel %vm1205_vm7, %v2236_v48, -inf }
 0x995   : > { %2239 = vmax.xlane.f32.xlu0 %v2238_v50 }
 0xa21   : > { %v2243_v51 = vpop.xlane.xlu1 %2242 }
 0xa22   : > { %v2245_v52 = vsub.f32 %v2237_v46, %v2243_v51  ;;  %v2240_v53 = vpop.xlane.xlu0 %2239 }
 0xa23   : > { %v2244_v54 = vsub.f32 %v2236_v48, %v2240_v53 }
 0xa24   : > { %v2248_v55 = vmul.f32 1.442695, %v2245_v52 }
 0xa25   : > { %v2246_v56 = vmul.f32 1.442695, %v2244_v54 }
 0xa26   : > { %7281 = vpow2.f32 %v2248_v55 }
 0xa27   : > { %7283 = vpow2.f32 %v2246_v56 }
 0xa30   : > { %v7282_v57 = vpop.eup %7281 }
 0xa31   : > { %v7284_v58 = vpop.eup %7283  ;;  %v2253_v59 = vsel %vm1205_vm7, %v7282_v57, 0.0 }
 0xa32   : > { %2254 = vadd.xlane.f32.xlu1 %v2253_v59  ;;  %v2250_v60 = vsel %vm1205_vm7, %v7284_v58, 0.0 }
 0xa33   : > { %2251 = vadd.xlane.f32.xlu0 %v2250_v60  ;;  %v852_v60 = vld [vmem:[%s8505_s9 + $0x18] sm:$0xff] }
 0xabf   : > { %v2255_v1 = vpop.xlane.xlu1 %2254 }
 0xac0   : > { %7285 = vrcp.f32 %v2255_v1  ;;  %v2252_v2 = vpop.xlane.xlu0 %2251 }
 0xac1   : > { %7287 = vrcp.f32 %v2252_v2 }
 0xaca   : > { %v7286_v3 = vpop.eup %7285 }
 0xacb   : > { %v7288_v6 = vpop.eup %7287  ;;  %v2259_v8 = vmul.f32 %v7286_v3, %v7282_v57 }
 0xacc   : > { %v2258_v7 = vmul.f32 %v7288_v6, %v7284_v58 }
 0xace   : > { %6539 = vmatprep.mubr.msk.f32.mxu0 %vm1205_vm7, %v2258_v7 }
 0xacf   : > { %6540 = vmatmul.mubr.msk.f32.vlgmr.msra.gmra.mrb[16].mxu0 %vm1205_vm7, %v2259_v8 }
 0xad0   : > { %6989 = vmatpush3.bf16.msra.mxu0 %v6986_v63  ;;  %6555 = vmatprep.mubr.msk.f32.mxu0 %vm871_vm4, %v7635_v26 }
 0xad1   : > { %6991 = vmatprep.subr.bf16.mxu0 %v6990_v9 }
 0xad4   : > { %6993 = vmatpush3.bf16.msra.mxu0 %v6990_v9 }
 0xad5   : > { %7003 = vmatprep.subr.bf16.mxu0 %v7002_v12 }
 0xad7   : > { %6556 = vmatmul.mubr.msk.f32.vlgmr.msra.gmra.mrb[18].mxu0 %vm871_vm4, %v7637_v27 }
 0xad8   : > { %7005 = vmatpush3.bf16.msra.mxu0 %v7002_v12  ;;  %6577 = vmatprep.mubr.msk.f32.mxu0 %vm871_vm4, %v7635_v26 }
 0xad9   : > { %7007 = vmatprep.subr.bf16.mxu0 %v7006_v15 }
 0xadc   : > { %7009 = vmatpush3.bf16.msra.mxu0 %v7006_v15 }
 0xadf   : > { %6578 = vmatmul.mubr.msk.f32.vlgmr.msra.gmra.mrb[20].mxu0 %vm871_vm4, %v7637_v27 }
 0xba2   : > { %v6541_v21 = vpop.f32.mrb[16].mxu0 }
 0xba3   : > { %v2332_v22 = vpop.f32.mrb[17].mxu0 }
 0xba4   : > { %6544 = vmatprep.mubr.msk.f32.mxu1 %vm1115_vm5, %v2332_v22 }
 0xba5   : > { %6545 = vmatmul.mubr.msk.f32.vlgmr.msra.gmra.mrb[10].mxu1 %vm1115_vm5, %v6541_v21 }
 0xba6   : > { %6997 = vmatpush3.bf16.msra.mxu1 %v6994_v18  ;;  %6566 = vmatprep.mubr.msk.f32.mxu1 %vm871_vm4, %v7635_v26 }
 0xba7   : > { %6999 = vmatprep.subr.bf16.mxu1 %v6998_v23 }
 0xbaa   : > { %v6557_v25 = vpop.f32.mrb[18].mxu0  ;;  %7001 = vmatpush3.bf16.msra.mxu1 %v6998_v23  ;;  %v2999_v23 = vld [vmem:[%s8439_s11 + $0x8] sm:$0xff] }
 0xbab   : > { %v2502_v28 = vadd.f32 %v6557_v25, %v5912_v24  ;;  %v2496_v29 = vpop.f32.mrb[19].mxu0  ;;  %v3000_v25 = vld [vmem:[%s8439_s11 + $0x10] sm:$0xff] }
 0xbac   : > { %v2497_v30 = vadd.f32 %v5912_v24, %v2496_v29 }
 0xbad   : > { %6567 = vmatmul.mubr.msk.f32.vlgmr.msra.gmra.mrb[16].mxu1 %vm871_vm4, %v7637_v27 }
 0xbae   : > { %6584 = vmatprep.mubr.msk.f32.mxu1 %vm1115_vm5, %v2497_v30  ;;  %v3092_v30 = vld [vmem:[%s8441_s13] sm:$0xff] }
 0xbb2   : > { %v6579_v32 = vpop.f32.mrb[20].mxu0 }
 0xbb3   : > { %v2664_v33 = vadd.f32 %v6579_v32, %v5918_v31  ;;  %v2658_v34 = vpop.f32.mrb[21].mxu0  ;;  %v3094_v32 = vld [vmem:[%s8441_s13 + $0x10] sm:$0xff] }
 0xbb4   : > { %v2659_v35 = vadd.f32 %v5918_v31, %v2658_v34  ;;  %v3093_v31 = vld [vmem:[%s8441_s13 + $0x8] sm:$0xff]  ;;  %v3095_v34 = vld [vmem:[%s8441_s13 + $0x18] sm:$0xff] }
 0xbb6   : > { %v7016_v37 = vpack.c.bf16 %v2664_v33, %v2659_v35  ;;  %v7028_v33 = vpack.c.bf16 %v3093_v31, %v3092_v30  ;;  %v7032_v35 = vpack.c.bf16 %v3095_v34, %v3094_v32  ;;  %v5974_v30 = vld [vmem:[%s8498_s28 + $0x90] sm:$0xff]  ;;  %v5975_v31 = vld [vmem:[%s8498_s28 + $0x98] sm:$0xff]  ;;  %v5957_v34 = vld [vmem:[%s8496_s23 + $0x88] sm:$0xff] }
 0xbb7   : > { %v7064_v32 = vpack.c.bf16 %v5975_v31, %v5974_v30  ;;  %v6025_v31 = vld [vmem:[%s8504_s8 + $0x5] ss:$0 sm:$0xff] }
 0xbb8   : > { %7017 = vmatprep.subr.bf16.mxu0 %v7016_v37 }
 0xbb9   : > { %7019 = vmatpush3.bf16.msra.mxu0 %v7016_v37  ;;  %v3096_v37 = vld [vmem:[%s8441_s13 + $0x20] sm:$0xff] }
 0xc80   : > { %v6568_v36 = vpop.f32.mrb[16].mxu1 }
 0xc81   : > { %v2583_v39 = vadd.f32 %v6568_v36, %v5915_v38  ;;  %v2577_v41 = vpop.f32.mrb[17].mxu1 }
 0xc82   : > { %v2578_v42 = vadd.f32 %v5915_v38, %v2577_v41  ;;  %v3097_v38 = vld [vmem:[%s8441_s13 + $0x28] sm:$0xff] }
 0xc83   : > { %v7036_v36 = vpack.c.bf16 %v3097_v38, %v3096_v37 }
 0xc84   : > { %v7010_v43 = vpack.c.bf16 %v2583_v39, %v2578_v42 }
 0xc86   : > { %7012 = vmatprep.subr.msk.bf16.mxu1 %vm7665_vm6, %v7010_v43 }
 0xc87   : > { %7015 = vmatpush3.bf16.xpose.msk.msra.mxu1 %vm7665_vm6, %v7010_v43 }
 0xc88   : > { %6594 = vmatprep.subr.mxu1 %v852_v60 }
 0xc8e   : > { %6585 = vmatmul.mubr.msk.f32.vlgmr.msra.gmra.mrb[18].mxu1 %vm1115_vm5, %v2502_v28  ;;  %v3001_v28 = vld [vmem:[%s8439_s11 + $0x18] sm:$0xff] }
 0xc8f   : > { %6595 = vmatpush3.msra.mxu1 %v852_v60  ;;  %v7024_v29 = vpack.c.bf16 %v3001_v28, %v3000_v25  ;;  %v5942_v25 = vld [vmem:[%s8495_s26 + $0x90] sm:$0xff]  ;;  %v5943_v28 = vld [vmem:[%s8495_s26 + $0x98] sm:$0xff] }
 0xc90   : > { %7029 = vmatprep.subr.bf16.mxu1 %v7028_v33 }
 0xd61   : > { %v6586_v44 = vpop.f32.mrb[18].mxu1 }
 0xd62   : > { %v2755_v45 = vmul.f32 0.35355338, %v6586_v44  ;;  %v2745_v46 = vpop.f32.mrb[19].mxu1 }
 0xd63   : > { %v2754_v47 = vmul.f32 0.35355338, %v2745_v46 }
 0xd64   : > { %v2759_v48 = vsel %vm1205_vm7, %v2755_v45, -inf }
 0xd65   : > { %2760 = vmax.xlane.f32.xlu1 %v2759_v48  ;;  %v2756_v49 = vsel %vm1205_vm7, %v2754_v47, -inf }
 0xd66   : > { %2757 = vmax.xlane.f32.xlu0 %v2756_v49 }
 0xdf2   : > { %v2761_v50 = vpop.xlane.xlu1 %2760 }
 0xdf3   : > { %v2763_v51 = vsub.f32 %v2755_v45, %v2761_v50  ;;  %v2758_v52 = vpop.xlane.xlu0 %2757 }
 0xdf4   : > { %v2762_v53 = vsub.f32 %v2754_v47, %v2758_v52  ;;  %v5930_v47 = vld [vmem:[%s8443_s15] ss:$0 sm:$0xff] }
 0xdf5   : > { %v2766_v54 = vmul.f32 1.442695, %v2763_v51  ;;  %v5931_v51 = vld [vmem:[%s8444_s16] ss:$0 sm:$0xff] }
 0xdf6   : > { %v2764_v55 = vmul.f32 1.442695, %v2762_v53 }
 0xdf7   : > { %7289 = vpow2.f32 %v2766_v54 }
 0xdf8   : > { %7291 = vpow2.f32 %v2764_v55 }
 0xe01   : > { %v7290_v56 = vpop.eup %7289 }
 0xe02   : > { %v7292_v57 = vpop.eup %7291  ;;  %v2771_v58 = vsel %vm1205_vm7, %v7290_v56, 0.0 }
 0xe03   : > { %2772 = vadd.xlane.f32.xlu1 %v2771_v58  ;;  %v2768_v59 = vsel %vm1205_vm7, %v7292_v57, 0.0 }
 0xe04   : > { %2769 = vadd.xlane.f32.xlu0 %v2768_v59  ;;  %v5932_v59 = vld [vmem:[%s8440_s12] ss:$0 sm:$0xff] }
 0xe90   : > { %v2773_v61 = vpop.xlane.xlu1 %2772 }
 0xe91   : > { %7293 = vrcp.f32 %v2773_v61  ;;  %v2770_v62 = vpop.xlane.xlu0 %2769 }
 0xe92   : > { %7295 = vrcp.f32 %v2770_v62 }
 0xe9b   : > { %v7294_v63 = vpop.eup %7293 }
 0xe9c   : > { %v7296_v0 = vpop.eup %7295  ;;  %v2777_v2 = vmul.f32 %v7294_v63, %v7290_v56  ;;  %v3098_v56 = vld [vmem:[%s8441_s13 + $0x30] sm:$0xff] }
 0xe9d   : > { %v2776_v1 = vmul.f32 %v7296_v0, %v7292_v57  ;;  %v3099_v57 = vld [vmem:[%s8441_s13 + $0x38] sm:$0xff] }
 0xe9e   : > { %v7040_v58 = vpack.c.bf16 %v3099_v57, %v3098_v56  ;;  %v6010_v56 = vld [vmem:[%s8504_s8 + $0x4] ss:$0 sm:$0xff] }
 0xe9f   : > { %6591 = vmatprep.mubr.msk.f32.mxu0 %vm1205_vm7, %v2776_v1  ;;  %v6004_v57 = vld [vmem:[%s8501_s2 + $0x4] ss:$0 sm:$0xff] }
 0xea0   : > { %6592 = vmatmul.mubr.msk.f32.vlgmr.msra.gmra.mrb[22].mxu0 %vm1205_vm7, %v2777_v2  ;;  %v5935_v2 = vld [vmem:[%s8442_s14] ss:$0 sm:$0xff] }
 0xf73   : > { %v6593_v3 = vpop.f32.mrb[22].mxu0 }
 0xf74   : > { %v2850_v4 = vpop.f32.mrb[23].mxu0 }
 0xf75   : > { %6596 = vmatprep.mubr.msk.f32.mxu1 %vm1115_vm5, %v2850_v4 }
 0xf76   : > { %6597 = vmatmul.mubr.msk.f32.vlgmr.msra.gmra.mrb[10].mxu1 %vm1115_vm5, %v6593_v3 }
 0xf77   : > { %7031 = vmatpush3.bf16.msra.mxu1 %v7028_v33  ;;  %v5956_v33 = vld [vmem:[%s8496_s23 + $0x80] sm:$0xff] }
 0xf78   : > { %7033 = vmatprep.subr.bf16.mxu1 %v7032_v35 }
 0xf7b   : > { %7035 = vmatpush3.bf16.msra.mxu1 %v7032_v35  ;;  %v7052_v35 = vpack.c.bf16 %v5957_v34, %v5956_v33 }
 0xf7c   : > { %7037 = vmatprep.subr.bf16.mxu1 %v7036_v36 }
 0xf7f   : > { %7039 = vmatpush3.bf16.msra.mxu1 %v7036_v36 }
 0xf80   : > { %7041 = vmatprep.subr.bf16.mxu1 %v7040_v58 }
 0xf83   : > { %7043 = vmatpush3.bf16.msra.mxu1 %v7040_v58 }
0x1049   : > { %v6598_v6 = vpop.f32.mrb[10].mxu1 }
0x104a   : > { %v2950_v7 = vadd.f32 %v6598_v6, %v5929_v5  ;;  %v2931_v8 = vpop.f32.mrb[11].mxu1 }
0x104b   : > { %v2949_v9 = vadd.f32 %v5929_v5, %v2931_v8 }
0x104c   : > { %v2952_v10 = vadd.f32 %v2950_v7, %v7637_v27 }
0x104d   : > { %v2951_v11 = vadd.f32 %v2949_v9, %v7635_v26  ;;  %v2998_v26 = vld [vmem:[%s8439_s11] sm:$0xff] }
0x104e   : > { %v2958_v12 = vsel %vm871_vm4, %v2952_v10, 0.0  ;;  %v7020_v24 = vpack.c.bf16 %v2999_v23, %v2998_v26  ;;  %v5972_v26 = vld [vmem:[%s8498_s28 + $0x80] sm:$0xff]  ;;  %v5973_v23 = vld [vmem:[%s8498_s28 + $0x88] sm:$0xff] }
0x104f   : > { %2959 = vadd.xlane.f32.xlu1 %v2958_v12  ;;  %v2955_v13 = vsel %vm871_vm4, %v2951_v11, 0.0 }
0x1050   : > { %2956 = vadd.xlane.f32.xlu0 %v2955_v13  ;;  %7021 = vmatprep.subr.bf16.mxu0 %v7020_v24 }
0x1051   : > { %7023 = vmatpush3.bf16.msra.mxu0 %v7020_v24  ;;  %v7060_v24 = vpack.c.bf16 %v5973_v23, %v5972_v26 }
0x1052   : > { %7025 = vmatprep.subr.bf16.mxu0 %v7024_v29 }
0x1053   : > { %7061 = vmatprep.subr.bf16.mxu1 %v7060_v24 }
0x1055   : > { %7027 = vmatpush3.bf16.msra.mxu0 %v7024_v29  ;;  %v7048_v29 = vpack.c.bf16 %v5943_v28, %v5942_v25  ;;  %v6019_v25 = vld [vmem:[%s8501_s2 + $0x5] ss:$0 sm:$0xff] }
0x10dc   : > { %v2960_v14 = vpop.xlane.xlu1 %2959 }
0x10dd   : > { %v2963_v15 = vmul.f32 0.03125, %v2960_v14  ;;  %v2957_v16 = vpop.xlane.xlu0 %2956 }
0x10de   : > { %v2962_v17 = vmul.f32 0.03125, %v2957_v16 }
0x10df   : > { %v2965_v18 = vsub.f32 %v2952_v10, %v2963_v15 }
0x10e0   : > { %v2964_v19 = vsub.f32 %v2951_v11, %v2962_v17 }
0x10e1   : > { %v2967_v20 = vmul.f32 %v2965_v18, %v2965_v18 }
0x10e2   : > { %v2966_v21 = vmul.f32 %v2964_v19, %v2964_v19 }
0x10e3   : > { %v2971_v22 = vsel %vm871_vm4, %v2967_v20, 0.0 }
0x10e4   : > { %2972 = vadd.xlane.f32.xlu1 %v2971_v22  ;;  %v2968_v27 = vsel %vm871_vm4, %v2966_v21, 0.0  ;;  %v5940_v21 = vld [vmem:[%s8495_s26 + $0x80] sm:$0xff]  ;;  %v5941_v22 = vld [vmem:[%s8495_s26 + $0x88] sm:$0xff] }
0x10e5   : > { %2969 = vadd.xlane.f32.xlu0 %v2968_v27  ;;  %v7044_v27 = vpack.c.bf16 %v5941_v22, %v5940_v21 }
0x10e7   : > { %7045 = vmatprep.subr.bf16.mxu0 %v7044_v27 }
0x1171   : > { %v2973_v39 = vpop.xlane.xlu1 %2972 }
0x1172   : > { %v2975_v41 = vmul.f32 0.03125, %v2973_v39  ;;  %v2970_v42 = vpop.xlane.xlu0 %2969 }
0x1173   : > { %v2974_v43 = vmul.f32 0.03125, %v2970_v42 }
0x1174   : > { %v2977_v44 = vadd.f32 1e-05, %v2975_v41 }
0x1175   : > { %v2976_v45 = vadd.f32 1e-05, %v2974_v43 }
0x1176   : > { %7297 = vrsqrt.f32 %v2977_v44  ;;  %v5938_v44 = vld [vmem:[%s8445_s17] ss:$0 sm:$0xff] }
0x1177   : > { %7299 = vrsqrt.f32 %v2976_v45 }
0x1180   : > { %v7298_v46 = vpop.eup %7297 }
0x1181   : > { %v7300_v48 = vpop.eup %7299  ;;  %v2981_v49 = vmul.f32 %v7298_v46, %v2965_v18 }
0x1182   : > { %v2980_v50 = vmul.f32 %v7300_v48, %v2964_v19  ;;  %v5939_v48 = vld [vmem:[%s8446_s18] ss:$0 sm:$0xff] }
0x1183   : > { %v2989_v52 = vmul.f32 %v5930_v47, %v2981_v49 }
0x1184   : > { %v2988_v53 = vmul.f32 %v5930_v47, %v2980_v50 }
0x1185   : > { %v2997_v55 = vadd.f32 %v5931_v51, %v2989_v52  ;;  %v5959_v52 = vld [vmem:[%s8496_s23 + $0x98] sm:$0xff] }
0x1186   : > { %v2996_v54 = vadd.f32 %v5931_v51, %v2988_v53  ;;  %v5958_v51 = vld [vmem:[%s8496_s23 + $0x90] sm:$0xff] }
0x1188   : > { %6607 = vmatprep.mubr.msk.f32.mxu0 %vm871_vm4, %v2996_v54 }
0x1189   : > { %6608 = vmatmul.mubr.msk.f32.vlgmr.msra.gmra.mrb[24].mxu0 %vm871_vm4, %v2997_v55 }
0x118a   : > { %7047 = vmatpush3.bf16.msra.mxu0 %v7044_v27 }
0x118b   : > { %7049 = vmatprep.subr.bf16.mxu0 %v7048_v29 }
0x118e   : > { %7051 = vmatpush3.bf16.msra.mxu0 %v7048_v29 }
0x118f   : > { %7053 = vmatprep.subr.bf16.mxu0 %v7052_v35 }
0x125c   : > { %v6609_v60 = vpop.f32.mrb[24].mxu0 }
0x125d   : > { %v3087_v61 = vadd.f32 %v6609_v60, %v5932_v59  ;;  %v3081_v62 = vpop.f32.mrb[25].mxu0 }
0x125e   : > { %v3082_v63 = vadd.f32 %v5932_v59, %v3081_v62 }
0x125f   : > { %v3091_v1 = vmax.f32 %v3087_v61, 0.0 }
0x1260   : > { %v3090_v0 = vmax.f32 %v3082_v63, 0.0 }
0x1262   : > { %6626 = vmatprep.mubr.msk.f32.mxu1 %vm3107_vm8, %v3090_v0 }
0x1263   : > { %6627 = vmatmul.mubr.msk.f32.vlgmr.msra.gmra.mrb[20].mxu1 %vm3107_vm8, %v3091_v1 }
0x1264   : > { %7063 = vmatpush3.bf16.msra.mxu1 %v7060_v24 }
0x1265   : > { %7065 = vmatprep.subr.bf16.mxu1 %v7064_v32 }
0x1268   : > { %7067 = vmatpush3.bf16.msra.mxu1 %v7064_v32 }
0x1336   : > { %v6628_v3 = vpop.f32.mrb[20].mxu1 }
0x1337   : > { %v3186_v4 = vadd.f32 %v6628_v3, %v5935_v2  ;;  %v3180_v5 = vpop.f32.mrb[21].mxu1 }
0x1338   : > { %v3181_v6 = vadd.f32 %v5935_v2, %v3180_v5  ;;  %v6007_v2 = vld [vmem:[%s8500_s6 + $0x4] ss:$0 sm:$0xff] }
0x1339   : > { %v3190_v7 = vadd.f32 %v3186_v4, %v2997_v55  ;;  %v7056_v55 = vpack.c.bf16 %v5959_v52, %v5958_v51 }
0x133a   : > { %v3189_v8 = vadd.f32 %v3181_v6, %v2996_v54  ;;  %v5944_v6 = vld [vmem:[%s8495_s26 + $0xa0] sm:$0xff] }
0x133b   : > { %v3196_v9 = vsel %vm871_vm4, %v3190_v7, 0.0 }
0x133c   : > { %3197 = vadd.xlane.f32.xlu1 %v3196_v9  ;;  %v3193_v10 = vsel %vm871_vm4, %v3189_v8, 0.0 }
0x133d   : > { %3194 = vadd.xlane.f32.xlu0 %v3193_v10 }
0x13c9   : > { %v3198_v11 = vpop.xlane.xlu1 %3197 }
0x13ca   : > { %v3200_v12 = vmul.f32 0.03125, %v3198_v11  ;;  %v3195_v13 = vpop.xlane.xlu0 %3194  ;;  %v5946_v11 = vld [vmem:[%s8495_s26 + $0xb0] sm:$0xff] }
0x13cb   : > { %v3199_v14 = vmul.f32 0.03125, %v3195_v13 }
0x13cc   : > { %v3202_v15 = vsub.f32 %v3190_v7, %v3200_v12  ;;  %v5945_v7 = vld [vmem:[%s8495_s26 + $0xa8] sm:$0xff]  ;;  %v5947_v12 = vld [vmem:[%s8495_s26 + $0xb8] sm:$0xff] }
0x13cd   : > { %v3201_v16 = vsub.f32 %v3189_v8, %v3199_v14  ;;  %v7078_v10 = vpack.c.bf16 %v5945_v7, %v5944_v6  ;;  %v7082_v14 = vpack.c.bf16 %v5947_v12, %v5946_v11 }
0x13ce   : > { %v3204_v17 = vmul.f32 %v3202_v15, %v3202_v15 }
0x13cf   : > { %v3203_v18 = vmul.f32 %v3201_v16, %v3201_v16 }
0x13d0   : > { %v3208_v19 = vsel %vm871_vm4, %v3204_v17, 0.0 }
0x13d1   : > { %3209 = vadd.xlane.f32.xlu1 %v3208_v19  ;;  %v3205_v20 = vsel %vm871_vm4, %v3203_v18, 0.0  ;;  %v5978_v18 = vld [vmem:[%s8498_s28 + $0xb0] sm:$0xff]  ;;  %v5979_v19 = vld [vmem:[%s8498_s28 + $0xb8] sm:$0xff] }
0x13d2   : > { %3206 = vadd.xlane.f32.xlu0 %v3205_v20  ;;  %v7098_v20 = vpack.c.bf16 %v5979_v19, %v5978_v18 }
0x145e   : > { %v3210_v37 = vpop.xlane.xlu1 %3209 }
0x145f   : > { %v3212_v38 = vmul.f32 0.03125, %v3210_v37  ;;  %v3207_v36 = vpop.xlane.xlu0 %3206 }
0x1460   : > { %v3211_v39 = vmul.f32 0.03125, %v3207_v36 }
0x1461   : > { %v3214_v41 = vadd.f32 1e-05, %v3212_v38 }
0x1462   : > { %v3213_v42 = vadd.f32 1e-05, %v3211_v39 }
0x1463   : > { %7301 = vrsqrt.f32 %v3214_v41 }
0x1464   : > { %7303 = vrsqrt.f32 %v3213_v42 }
0x146d   : > { %v7302_v43 = vpop.eup %7301 }
0x146e   : > { %v7304_v45 = vpop.eup %7303  ;;  %v3218_v46 = vmul.f32 %v7302_v43, %v3202_v15  ;;  %v5976_v15 = vld [vmem:[%s8498_s28 + $0xa0] sm:$0xff] }
0x146f   : > { %v3217_v47 = vmul.f32 %v7304_v45, %v3201_v16  ;;  %v5977_v16 = vld [vmem:[%s8498_s28 + $0xa8] sm:$0xff] }
0x1470   : > { %v3226_v49 = vmul.f32 %v5938_v44, %v3218_v46  ;;  %v7094_v17 = vpack.c.bf16 %v5977_v16, %v5976_v15 }
0x1471   : > { %v3225_v50 = vmul.f32 %v5938_v44, %v3217_v47 }
0x1472   : > { %v8020_v54 = vadd.f32 %v5939_v48, %v3226_v49  ;;  %v5961_v49 = vld [vmem:[%s8496_s23 + $0xa8] sm:$0xff] }
0x1473   : > { %v8018_v53 = vadd.f32 %v5939_v48, %v3225_v50  ;;  %v5960_v48 = vld [vmem:[%s8496_s23 + $0xa0] sm:$0xff] }
0x1474   : > { %v7086_v50 = vpack.c.bf16 %v5961_v49, %v5960_v48  ;;  %v6038_v49 = vld [vmem:[%s8501_s2 + $0x6] ss:$0 sm:$0xff] }
0x1475   : > { %6637 = vmatprep.mubr.msk.f32.mxu0 %vm871_vm4, %v8018_v53  ;;  %6659 = vmatprep.mubr.msk.f32.mxu1 %vm871_vm4, %v8018_v53 }
0x1476   : > { %6638 = vmatmul.mubr.msk.f32.vlgmr.msra.gmra.mrb[26].mxu0 %vm871_vm4, %v8020_v54  ;;  %6660 = vmatmul.mubr.msk.f32.vlgmr.msra.gmra.mrb[22].mxu1 %vm871_vm4, %v8020_v54 }
0x1477   : > { %7055 = vmatpush3.bf16.msra.mxu0 %v7052_v35  ;;  %6648 = vmatprep.mubr.msk.f32.mxu0 %vm871_vm4, %v8018_v53 }
0x1478   : > { %7057 = vmatprep.subr.bf16.mxu0 %v7056_v55 }
0x147b   : > { %7059 = vmatpush3.bf16.msra.mxu0 %v7056_v55 }
0x147e   : > { %6649 = vmatmul.mubr.msk.f32.vlgmr.msra.gmra.mrb[28].mxu0 %vm871_vm4, %v8020_v54 }
0x1549   : > { %v6639_v58 = vpop.f32.mrb[26].mxu0  ;;  %v6661_v59 = vpop.f32.mrb[22].mxu1 }
0x154a   : > { %v3552_v60 = vadd.f32 %v6661_v59, %v6010_v56  ;;  %v3384_v61 = vpop.f32.mrb[27].mxu0  ;;  %v3546_v62 = vpop.f32.mrb[23].mxu1  ;;  %v3390_v13 = vadd.f32 %v6639_v58, %v6004_v57 }
0x154b   : > { %v3385_v63 = vadd.f32 %v6004_v57, %v3384_v61  ;;  %v3547_v0 = vadd.f32 %v6010_v56, %v3546_v62  ;;  %v5962_v56 = vld [vmem:[%s8496_s23 + $0xb0] sm:$0xff]  ;;  %v5963_v57 = vld [vmem:[%s8496_s23 + $0xb8] sm:$0xff] }
0x154c   : > { %v7090_v61 = vpack.c.bf16 %v5963_v57, %v5962_v56 }
0x154d   : > { %v7074_v1 = vpack.c.bf16 %v3552_v60, %v3547_v0  ;;  %6666 = vmatprep.mubr.msk.f32.mxu0 %vm1115_vm5, %v3385_v63 }
0x154f   : > { %7075 = vmatprep.subr.bf16.mxu1 %v7074_v1 }
0x1550   : > { %7077 = vmatpush3.bf16.msra.mxu1 %v7074_v1  ;;  %v6022_v1 = vld [vmem:[%s8500_s6 + $0x5] ss:$0 sm:$0xff] }
0x1551   : > { %v6650_v3 = vpop.f32.mrb[28].mxu0  ;;  %7087 = vmatprep.subr.bf16.mxu1 %v7086_v50 }
0x1552   : > { %v3471_v4 = vadd.f32 %v6650_v3, %v6007_v2  ;;  %v3465_v5 = vpop.f32.mrb[29].mxu0 }
0x1553   : > { %v3466_v8 = vadd.f32 %v6007_v2, %v3465_v5 }
0x1555   : > { %v7068_v9 = vpack.c.bf16 %v3471_v4, %v3466_v8 }
0x1557   : > { %7070 = vmatprep.subr.msk.bf16.mxu0 %vm7665_vm6, %v7068_v9 }
0x1558   : > { %7073 = vmatpush3.bf16.xpose.msk.msra.mxu0 %vm7665_vm6, %v7068_v9 }
0x1559   : > { %7079 = vmatprep.subr.bf16.mxu0 %v7078_v10 }
0x155f   : > { %6667 = vmatmul.mubr.msk.f32.vlgmr.msra.gmra.mrb[30].mxu0 %vm1115_vm5, %v3390_v13 }
0x1560   : > { %7081 = vmatpush3.bf16.msra.mxu0 %v7078_v10  ;;  %6684 = vmatprep.mubr.msk.f32.mxu0 %vm871_vm4, %v8018_v53 }
0x1561   : > { %7083 = vmatprep.subr.bf16.mxu0 %v7082_v14 }
0x1564   : > { %7085 = vmatpush3.bf16.msra.mxu0 %v7082_v14 }
0x1565   : > { %7095 = vmatprep.subr.bf16.mxu0 %v7094_v17 }
0x1567   : > { %6685 = vmatmul.mubr.msk.f32.vlgmr.msra.gmra.mrb[32].mxu0 %vm871_vm4, %v8020_v54 }
0x1568   : > { %7097 = vmatpush3.bf16.msra.mxu0 %v7094_v17  ;;  %6706 = vmatprep.mubr.msk.f32.mxu0 %vm871_vm4, %v8018_v53 }
0x1569   : > { %7099 = vmatprep.subr.bf16.mxu0 %v7098_v20 }
0x156c   : > { %7101 = vmatpush3.bf16.msra.mxu0 %v7098_v20 }
0x156f   : > { %6707 = vmatmul.mubr.msk.f32.vlgmr.msra.gmra.mrb[34].mxu0 %vm871_vm4, %v8020_v54 }
0x1632   : > { %v6668_v21 = vpop.f32.mrb[30].mxu0 }
0x1633   : > { %v3643_v22 = vmul.f32 0.35355338, %v6668_v21  ;;  %v3633_v27 = vpop.f32.mrb[31].mxu0 }
0x1634   : > { %v3642_v26 = vmul.f32 0.35355338, %v3633_v27  ;;  %v5948_v27 = vld [vmem:[%s8495_s26 + $0xc0] sm:$0xff] }
0x1635   : > { %v3647_v23 = vsel %vm1205_vm7, %v3643_v22, -inf }
0x1636   : > { %3648 = vmax.xlane.f32.xlu1 %v3647_v23  ;;  %v3644_v24 = vsel %vm1205_vm7, %v3642_v26, -inf }
0x1637   : > { %3645 = vmax.xlane.f32.xlu0 %v3644_v24  ;;  %v5989_v24 = vld [vmem:[%s8505_s9 + $0x28] sm:$0xff] }
0x163a   : > { %v6686_v28 = vpop.f32.mrb[32].mxu0 }
0x163b   : > { %v3825_v29 = vadd.f32 %v6686_v28, %v6019_v25  ;;  %v3819_v30 = vpop.f32.mrb[33].mxu0 }
0x163c   : > { %v3820_v62 = vadd.f32 %v6019_v25, %v3819_v30  ;;  %v5950_v30 = vld [vmem:[%s8495_s26 + $0xd0] sm:$0xff] }
0x1642   : > { %v6708_v32 = vpop.f32.mrb[34].mxu0 }
0x1643   : > { %v3987_v33 = vadd.f32 %v6708_v32, %v6025_v31  ;;  %v3981_v34 = vpop.f32.mrb[35].mxu0 }
0x1644   : > { %v3982_v35 = vadd.f32 %v6025_v31, %v3981_v34  ;;  %v5951_v31 = vld [vmem:[%s8495_s26 + $0xd8] sm:$0xff] }
0x1646   : > { %v7108_v37 = vpack.c.bf16 %v3987_v33, %v3982_v35  ;;  %v7116_v35 = vpack.c.bf16 %v5951_v31, %v5950_v30  ;;  %v5954_v30 = vld [vmem:[%s8495_s26 + $0xf0] sm:$0xff]  ;;  %v5955_v31 = vld [vmem:[%s8495_s26 + $0xf8] sm:$0xff] }
0x1648   : > { %7109 = vmatprep.subr.bf16.mxu0 %v7108_v37 }
0x1649   : > { %7111 = vmatpush3.bf16.msra.mxu0 %v7108_v37  ;;  %v5980_v37 = vld [vmem:[%s8498_s28 + $0xc0] sm:$0xff] }
0x16c3   : > { %v3649_v38 = vpop.xlane.xlu1 %3648 }
0x16c4   : > { %v3651_v36 = vsub.f32 %v3643_v22, %v3649_v38  ;;  %v3646_v39 = vpop.xlane.xlu0 %3645  ;;  %v5981_v38 = vld [vmem:[%s8498_s28 + $0xc8] sm:$0xff] }
0x16c5   : > { %v3650_v41 = vsub.f32 %v3642_v26, %v3646_v39  ;;  %v5949_v26 = vld [vmem:[%s8495_s26 + $0xc8] sm:$0xff]  ;;  %v5982_v39 = vld [vmem:[%s8498_s28 + $0xd0] sm:$0xff] }
0x16c6   : > { %v3654_v42 = vmul.f32 1.442695, %v3651_v36  ;;  %v7112_v23 = vpack.c.bf16 %v5949_v26, %v5948_v27  ;;  %v7128_v36 = vpack.c.bf16 %v5981_v38, %v5980_v37  ;;  %v5952_v27 = vld [vmem:[%s8495_s26 + $0xe0] sm:$0xff]  ;;  %v5953_v26 = vld [vmem:[%s8495_s26 + $0xe8] sm:$0xff] }
0x16c7   : > { %v3652_v43 = vmul.f32 1.442695, %v3650_v41  ;;  %v5983_v41 = vld [vmem:[%s8498_s28 + $0xd8] sm:$0xff]  ;;  %v5984_v37 = vld [vmem:[%s8498_s28 + $0xe0] sm:$0xff]  ;;  %v5985_v38 = vld [vmem:[%s8498_s28 + $0xe8] sm:$0xff] }
0x16c8   : > { %7305 = vpow2.f32 %v3654_v42  ;;  %7113 = vmatprep.subr.bf16.mxu0 %v7112_v23  ;;  %v7132_v42 = vpack.c.bf16 %v5983_v41, %v5982_v39  ;;  %v5986_v39 = vld [vmem:[%s8498_s28 + $0xf0] sm:$0xff]  ;;  %v5987_v41 = vld [vmem:[%s8498_s28 + $0xf8] sm:$0xff] }
0x16c9   : > { %7307 = vpow2.f32 %v3652_v43  ;;  %v5988_v43 = vld [vmem:[%s8505_s9 + $0x20] sm:$0xff] }
0x16d2   : > { %v7306_v44 = vpop.eup %7305 }
0x16d3   : > { %v7308_v45 = vpop.eup %7307  ;;  %v3659_v46 = vsel %vm1205_vm7, %v7306_v44, 0.0 }
0x16d4   : > { %3660 = vadd.xlane.f32.xlu1 %v3659_v46  ;;  %v3656_v47 = vsel %vm1205_vm7, %v7308_v45, 0.0 }
0x16d5   : > { %3657 = vadd.xlane.f32.xlu0 %v3656_v47 }
0x1761   : > { %v3661_v51 = vpop.xlane.xlu1 %3660 }
0x1762   : > { %7309 = vrcp.f32 %v3661_v51  ;;  %v3658_v52 = vpop.xlane.xlu0 %3657  ;;  %v5967_v51 = vld [vmem:[%s8496_s23 + $0xd8] sm:$0xff] }
0x1763   : > { %7311 = vrcp.f32 %v3658_v52 }
0x176c   : > { %v7310_v55 = vpop.eup %7309 }
0x176d   : > { %v7312_v58 = vpop.eup %7311  ;;  %v3665_v60 = vmul.f32 %v7310_v55, %v7306_v44  ;;  %v5964_v44 = vld [vmem:[%s8496_s23 + $0xc0] sm:$0xff] }
0x176e   : > { %v3664_v59 = vmul.f32 %v7312_v58, %v7308_v45  ;;  %v5965_v45 = vld [vmem:[%s8496_s23 + $0xc8] sm:$0xff]  ;;  %v6044_v58 = vld [vmem:[%s8504_s8 + $0x6] ss:$0 sm:$0xff] }
0x176f   : > { %v7120_v48 = vpack.c.bf16 %v5965_v45, %v5964_v44  ;;  %v5969_v44 = vld [vmem:[%s8496_s23 + $0xe8] sm:$0xff] }
0x1770   : > { %6673 = vmatprep.mubr.msk.f32.mxu1 %vm1205_vm7, %v3664_v59 }
0x1771   : > { %6674 = vmatmul.mubr.msk.f32.vlgmr.msra.gmra.mrb[24].mxu1 %vm1205_vm7, %v3665_v60 }
0x1772   : > { %7089 = vmatpush3.bf16.msra.mxu1 %v7086_v50  ;;  %6695 = vmatprep.mubr.msk.f32.mxu1 %vm871_vm4, %v8018_v53  ;;  %v5966_v50 = vld [vmem:[%s8496_s23 + $0xd0] sm:$0xff] }
0x1773   : > { %7091 = vmatprep.subr.bf16.mxu1 %v7090_v61  ;;  %v7124_v57 = vpack.c.bf16 %v5967_v51, %v5966_v50  ;;  %v6055_v51 = vld [vmem:[%s8501_s2 + $0x7] ss:$0 sm:$0xff]  ;;  %s6107_s2 = sshll.u32 %s7555_s5, 6  ;;  %s7413_s5 = smov [#allocation2]  }
0x1776   : > { %7093 = vmatpush3.bf16.msra.mxu1 %v7090_v61 }
0x1779   : > { %6696 = vmatmul.mubr.msk.f32.vlgmr.msra.gmra.mrb[26].mxu1 %vm871_vm4, %v8020_v54 }
0x177a   : > { %6713 = vmatprep.mubr.msk.f32.mxu1 %vm1115_vm5, %v3820_v62 }
0x1844   : > { %v8110_v63 = vpop.f32.mrb[24].mxu1 }
0x1845   : > { %v8112_v0 = vpop.f32.mrb[25].mxu1 }
0x184c   : > { %v6697_v2 = vpop.f32.mrb[26].mxu1 }
0x184d   : > { %v3906_v3 = vadd.f32 %v6697_v2, %v6022_v1  ;;  %v3900_v4 = vpop.f32.mrb[27].mxu1 }
0x184e   : > { %v3901_v5 = vadd.f32 %v6022_v1, %v3900_v4 }
0x1850   : > { %v7102_v6 = vpack.c.bf16 %v3906_v3, %v3901_v5 }
0x1852   : > { %7104 = vmatprep.subr.msk.bf16.mxu1 %vm7665_vm6, %v7102_v6 }
0x1853   : > { %7107 = vmatpush3.bf16.xpose.msk.msra.mxu1 %vm7665_vm6, %v7102_v6 }
0x1854   : > { %6723 = vmatprep.subr.mxu1 %v5989_v24 }
0x185a   : > { %6714 = vmatmul.mubr.msk.f32.vlgmr.msra.gmra.mrb[28].mxu1 %vm1115_vm5, %v3825_v29 }
0x185b   : > { %6724 = vmatpush3.msra.mxu1 %v5989_v24  ;;  %v5990_v24 = vld [vmem:[%s8505_s9 + $0x30] sm:$0xff] }
0x185c   : > { %6728 = vmatprep.subr.mxu1 %v5988_v43 }
0x192d   : > { %v6715_v7 = vpop.f32.mrb[28].mxu1 }
0x192e   : > { %v4078_v8 = vmul.f32 0.35355338, %v6715_v7  ;;  %v4068_v9 = vpop.f32.mrb[29].mxu1 }
0x192f   : > { %v4077_v10 = vmul.f32 0.35355338, %v4068_v9 }
0x1930   : > { %v4082_v11 = vsel %vm1205_vm7, %v4078_v8, -inf }
0x1931   : > { %4083 = vmax.xlane.f32.xlu1 %v4082_v11  ;;  %v4079_v12 = vsel %vm1205_vm7, %v4077_v10, -inf }
0x1932   : > { %4080 = vmax.xlane.f32.xlu0 %v4079_v12 }
0x19be   : > { %v4084_v13 = vpop.xlane.xlu1 %4083 }
0x19bf   : > { %v4086_v14 = vsub.f32 %v4078_v8, %v4084_v13  ;;  %v4081_v15 = vpop.xlane.xlu0 %4080 }
0x19c0   : > { %v4085_v16 = vsub.f32 %v4077_v10, %v4081_v15 }
0x19c1   : > { %v4089_v17 = vmul.f32 1.442695, %v4086_v14 }
0x19c2   : > { %v4087_v18 = vmul.f32 1.442695, %v4085_v16 }
0x19c3   : > { %7313 = vpow2.f32 %v4089_v17 }
0x19c4   : > { %7315 = vpow2.f32 %v4087_v18 }
0x19cd   : > { %v7314_v19 = vpop.eup %7313 }
0x19ce   : > { %v7316_v20 = vpop.eup %7315  ;;  %v4094_v21 = vsel %vm1205_vm7, %v7314_v19, 0.0 }
0x19cf   : > { %4095 = vadd.xlane.f32.xlu1 %v4094_v21  ;;  %v4091_v22 = vsel %vm1205_vm7, %v7316_v20, 0.0 }
0x19d0   : > { %4092 = vadd.xlane.f32.xlu0 %v4091_v22 }
0x1a5c   : > { %v4096_v25 = vpop.xlane.xlu1 %4095 }
0x1a5d   : > { %7317 = vrcp.f32 %v4096_v25  ;;  %v4093_v28 = vpop.xlane.xlu0 %4092 }
0x1a5e   : > { %7319 = vrcp.f32 %v4093_v28 }
0x1a67   : > { %v7318_v29 = vpop.eup %7317 }
0x1a68   : > { %v7320_v32 = vpop.eup %7319  ;;  %v4100_v34 = vmul.f32 %v7318_v29, %v7314_v19 }
0x1a69   : > { %v4099_v33 = vmul.f32 %v7320_v32, %v7316_v20 }
0x1a6b   : > { %6720 = vmatprep.mubr.msk.f32.mxu0 %vm1205_vm7, %v4099_v33 }
0x1a6c   : > { %6721 = vmatmul.mubr.msk.f32.vlgmr.msra.gmra.mrb[36].mxu0 %vm1205_vm7, %v4100_v34 }
0x1a6d   : > { %7115 = vmatpush3.bf16.msra.mxu0 %v7112_v23  ;;  %6741 = vmatprep.mubr.msk.f32.mxu0 %vm871_vm4, %v8018_v53  ;;  %v7146_v23 = vpack.c.bf16 %v5953_v26, %v5952_v27 }
0x1a6e   : > { %7117 = vmatprep.subr.bf16.mxu0 %v7116_v35 }
0x1a71   : > { %7119 = vmatpush3.bf16.msra.mxu0 %v7116_v35  ;;  %v7150_v35 = vpack.c.bf16 %v5955_v31, %v5954_v30  ;;  %v6073_v30 = vld [vmem:[%s8438_s10 + $0x1] ss:$0 sm:$0xff] }
0x1a72   : > { %7129 = vmatprep.subr.bf16.mxu0 %v7128_v36 }
0x1a74   : > { %6742 = vmatmul.mubr.msk.f32.vlgmr.msra.gmra.mrb[38].mxu0 %vm871_vm4, %v8020_v54 }
0x1a75   : > { %7131 = vmatpush3.bf16.msra.mxu0 %v7128_v36  ;;  %6763 = vmatprep.mubr.msk.f32.mxu0 %vm871_vm4, %v8018_v53  ;;  %v7162_v36 = vpack.c.bf16 %v5985_v38, %v5984_v37 }
0x1a76   : > { %7133 = vmatprep.subr.bf16.mxu0 %v7132_v42 }
0x1a79   : > { %7135 = vmatpush3.bf16.msra.mxu0 %v7132_v42  ;;  %v7166_v42 = vpack.c.bf16 %v5987_v41, %v5986_v39 }
0x1a7c   : > { %6764 = vmatmul.mubr.msk.f32.vlgmr.msra.gmra.mrb[40].mxu0 %vm871_vm4, %v8020_v54 }
0x1b3f   : > { %v6722_v46 = vpop.f32.mrb[36].mxu0 }
0x1b40   : > { %v4173_v47 = vpop.f32.mrb[37].mxu0 }
0x1b41   : > { %6725 = vmatprep.mubr.msk.f32.mxu1 %vm1115_vm5, %v4173_v47  ;;  %v5971_v47 = vld [vmem:[%s8496_s23 + $0xf8] sm:$0xff] }
0x1b42   : > { %6726 = vmatmul.mubr.msk.f32.vlgmr.msra.gmra.mrb[30].mxu1 %vm1115_vm5, %v6722_v46  ;;  %v5970_v46 = vld [vmem:[%s8496_s23 + $0xf0] sm:$0xff] }
0x1b43   : > { %6729 = vmatpush3.msra.mxu1 %v5988_v43  ;;  %6730 = vmatprep.mubr.msk.f32.mxu1 %vm1115_vm5, %v8112_v0  ;;  %v5968_v43 = vld [vmem:[%s8496_s23 + $0xe0] sm:$0xff]  ;;  %v7158_v50 = vpack.c.bf16 %v5971_v47, %v5970_v46 }
0x1b44   : > { %7121 = vmatprep.subr.bf16.mxu1 %v7120_v48  ;;  %v7154_v45 = vpack.c.bf16 %v5969_v44, %v5968_v43 }
0x1b47   : > { %v6743_v52 = vpop.f32.mrb[38].mxu0 }
0x1b48   : > { %v4422_v55 = vadd.f32 %v6743_v52, %v6038_v49  ;;  %v4416_v56 = vpop.f32.mrb[39].mxu0 }
0x1b49   : > { %v4417_v62 = vadd.f32 %v6038_v49, %v4416_v56 }
0x1b4a   : > { %6731 = vmatmul.mubr.msk.f32.vlgmr.msra.gmra.mrb[30].mxu1 %vm1115_vm5, %v8110_v63  ;;  %v6041_v63 = vld [vmem:[%s8500_s6 + $0x6] ss:$0 sm:$0xff] }
0x1b4b   : > { %7123 = vmatpush3.bf16.msra.mxu1 %v7120_v48  ;;  %6752 = vmatprep.mubr.msk.f32.mxu1 %vm871_vm4, %v8018_v53 }
0x1b4c   : > { %7125 = vmatprep.subr.bf16.mxu1 %v7124_v57 }
0x1b4f   : > { %7127 = vmatpush3.bf16.msra.mxu1 %v7124_v57  ;;  %v6765_v59 = vpop.f32.mrb[40].mxu0 }
0x1b50   : > { %v4584_v60 = vadd.f32 %v6765_v59, %v6044_v58  ;;  %v4578_v61 = vpop.f32.mrb[41].mxu0 }
0x1b51   : > { %v4579_v0 = vadd.f32 %v6044_v58, %v4578_v61  ;;  %v6061_v58 = vld [vmem:[%s8504_s8 + $0x7] ss:$0 sm:$0xff]  ;;  %s8509_s8 = smov %s8508_s24 }
0x1b52   : > { %6753 = vmatmul.mubr.msk.f32.vlgmr.msra.gmra.mrb[32].mxu1 %vm871_vm4, %v8020_v54 }
0x1b53   : > { %v7142_v1 = vpack.c.bf16 %v4584_v60, %v4579_v0  ;;  %6770 = vmatprep.mubr.msk.f32.mxu1 %vm1115_vm5, %v4417_v62 }
0x1b55   : > { %7143 = vmatprep.subr.bf16.mxu0 %v7142_v1 }
0x1b56   : > { %7145 = vmatpush3.bf16.msra.mxu0 %v7142_v1  ;;  %v6058_v1 = vld [vmem:[%s8500_s6 + $0x7] ss:$0 sm:$0xff]  ;;  %s703_s6 = scalar_lea.vmem [#allocation2], %s5855_s22  ;;  %s7349_s22 = sshll.u32 %s7413_s5, 4  ;;  %s7350_s22 = int_to_ptr.vmem [resolvable:$false] %s7349_s22 }
0x1b57   : > { %7147 = vmatprep.subr.bf16.mxu0 %v7146_v23  ;;  %s5792_s7 = sshll.u32 %s703_s6, 4  ;;  %s8388_s7 = int_to_ptr.vmem [resolvable:$true] %s5792_s7 }
0x1b58   : > { %s7345_s3 = scalar_lea.vmem %s8388_s7, 64  ;;  %p7352_p0 = scmp.lt.s32.totalorder %s8388_s7, %s7350_s22 }
0x1b59   : > { %p7346_p11 = scmp.ne.s32.totalorder %s8388_s7, %s7345_s3 }
0x1b5b   : > { %p7347_p12 = pnand %p7346_p11, %p7572_p5 }
0x1b5d   : > { %p7348_p13 = pneg %p7347_p12 }
0x1c25   : > { %v6754_v2 = vpop.f32.mrb[32].mxu1 }
0x1c26   : > { %v4503_v3 = vadd.f32 %v6754_v2, %v6041_v63  ;;  %v4497_v4 = vpop.f32.mrb[33].mxu1 }
0x1c27   : > { %v4498_v5 = vadd.f32 %v6041_v63, %v4497_v4 }
0x1c29   : > { %v7136_v6 = vpack.c.bf16 %v4503_v3, %v4498_v5 }
0x1c2b   : > { %7138 = vmatprep.subr.msk.bf16.mxu1 %vm7665_vm6, %v7136_v6 }
0x1c2c   : > { %7141 = vmatpush3.bf16.xpose.msk.msra.mxu1 %vm7665_vm6, %v7136_v6 }
0x1c2d   : > { %6780 = vmatprep.subr.mxu1 %v5990_v24 }
0x1c33   : > { %6771 = vmatmul.mubr.msk.f32.vlgmr.msra.gmra.mrb[34].mxu1 %vm1115_vm5, %v4422_v55 }
0x1c34   : > { %6781 = vmatpush3.msra.mxu1 %v5990_v24 }
0x1c35   : > { %7155 = vmatprep.subr.bf16.mxu1 %v7154_v45 }
0x1d06   : > { %v6772_v7 = vpop.f32.mrb[34].mxu1 }
0x1d07   : > { %v4675_v8 = vmul.f32 0.35355338, %v6772_v7  ;;  %v4665_v9 = vpop.f32.mrb[35].mxu1 }
0x1d08   : > { %v4674_v10 = vmul.f32 0.35355338, %v4665_v9 }
0x1d09   : > { %v4679_v11 = vsel %vm1205_vm7, %v4675_v8, -inf }
0x1d0a   : > { %4680 = vmax.xlane.f32.xlu1 %v4679_v11  ;;  %v4676_v12 = vsel %vm1205_vm7, %v4674_v10, -inf }
0x1d0b   : > { %4677 = vmax.xlane.f32.xlu0 %v4676_v12 }
0x1d97   : > { %v4681_v13 = vpop.xlane.xlu1 %4680 }
0x1d98   : > { %v4683_v14 = vsub.f32 %v4675_v8, %v4681_v13  ;;  %v4678_v15 = vpop.xlane.xlu0 %4677 }
0x1d99   : > { %v4682_v16 = vsub.f32 %v4674_v10, %v4678_v15 }
0x1d9a   : > { %v4686_v17 = vmul.f32 1.442695, %v4683_v14 }
0x1d9b   : > { %v4684_v18 = vmul.f32 1.442695, %v4682_v16 }
0x1d9c   : > { %7321 = vpow2.f32 %v4686_v17 }
0x1d9d   : > { %7323 = vpow2.f32 %v4684_v18 }
0x1da6   : > { %v7322_v19 = vpop.eup %7321 }
0x1da7   : > { %v7324_v20 = vpop.eup %7323  ;;  %v4691_v21 = vsel %vm1205_vm7, %v7322_v19, 0.0 }
0x1da8   : > { %4692 = vadd.xlane.f32.xlu1 %v4691_v21  ;;  %v4688_v22 = vsel %vm1205_vm7, %v7324_v20, 0.0  ;;  %v5991_v21 = vld [vmem:[%s8505_s9 + $0x38] sm:$0xff]  ;;  %s8386_s9 = scalar_lea.hbm %s8508_s24, %s6107_s2 }
0x1da9   : > { %4689 = vadd.xlane.f32.xlu0 %v4688_v22 }
0x1e35   : > { %v4693_v25 = vpop.xlane.xlu1 %4692 }
0x1e36   : > { %7325 = vrcp.f32 %v4693_v25  ;;  %v4690_v28 = vpop.xlane.xlu0 %4689 }
0x1e37   : > { %7327 = vrcp.f32 %v4690_v28 }
0x1e40   : > { %v7326_v29 = vpop.eup %7325 }
0x1e41   : > { %v7328_v32 = vpop.eup %7327  ;;  %v4697_v34 = vmul.f32 %v7326_v29, %v7322_v19 }
0x1e42   : > { %v4696_v33 = vmul.f32 %v7328_v32, %v7324_v20 }
0x1e44   : > { %6777 = vmatprep.mubr.msk.f32.mxu0 %vm1205_vm7, %v4696_v33 }
0x1e45   : > { %6778 = vmatmul.mubr.msk.f32.vlgmr.msra.gmra.mrb[42].mxu0 %vm1205_vm7, %v4697_v34 }
0x1e46   : > { %7149 = vmatpush3.bf16.msra.mxu0 %v7146_v23  ;;  %6793 = vmatprep.mubr.msk.f32.mxu0 %vm871_vm4, %v8018_v53 }
0x1e47   : > { %7151 = vmatprep.subr.bf16.mxu0 %v7150_v35 }
0x1e4a   : > { %7153 = vmatpush3.bf16.msra.mxu0 %v7150_v35 }
0x1e4b   : > { %7163 = vmatprep.subr.bf16.mxu0 %v7162_v36 }
0x1e4d   : > { %6794 = vmatmul.mubr.msk.f32.vlgmr.msra.gmra.mrb[44].mxu0 %vm871_vm4, %v8020_v54 }
0x1e4e   : > { %7165 = vmatpush3.bf16.msra.mxu0 %v7162_v36  ;;  %6815 = vmatprep.mubr.msk.f32.mxu0 %vm871_vm4, %v8018_v53 }
0x1e4f   : > { %7167 = vmatprep.subr.bf16.mxu0 %v7166_v42 }
0x1e52   : > { %7169 = vmatpush3.bf16.msra.mxu0 %v7166_v42 }
0x1e55   : > { %6816 = vmatmul.mubr.msk.f32.vlgmr.msra.gmra.mrb[46].mxu0 %vm871_vm4, %v8020_v54 }
0x1f18   : > { %v6779_v48 = vpop.f32.mrb[42].mxu0 }
0x1f19   : > { %v4770_v49 = vpop.f32.mrb[43].mxu0 }
0x1f1a   : > { %6782 = vmatprep.mubr.msk.f32.mxu1 %vm1115_vm5, %v4770_v49  ;;  %v6079_v49 = vld [vmem:[%s8439_s11 + $0x28] sm:$0xff] }
0x1f1b   : > { %6783 = vmatmul.mubr.msk.f32.vlgmr.msra.gmra.mrb[30].mxu1 %vm1115_vm5, %v6779_v48 }
0x1f1c   : > { %7157 = vmatpush3.bf16.msra.mxu1 %v7154_v45  ;;  %6804 = vmatprep.mubr.msk.f32.mxu1 %vm871_vm4, %v8018_v53 }
0x1f1d   : > { %7159 = vmatprep.subr.bf16.mxu1 %v7158_v50 }
0x1f20   : > { %v6795_v52 = vpop.f32.mrb[44].mxu0  ;;  %7161 = vmatpush3.bf16.msra.mxu1 %v7158_v50 }
0x1f21   : > { %v4940_v55 = vadd.f32 %v6795_v52, %v6055_v51  ;;  %v4934_v56 = vpop.f32.mrb[45].mxu0  ;;  %v6081_v52 = vld [vmem:[%s8439_s11 + $0x38] sm:$0xff] }
0x1f22   : > { %v4935_v57 = vadd.f32 %v6055_v51, %v4934_v56  ;;  %v6080_v51 = vld [vmem:[%s8439_s11 + $0x30] sm:$0xff]  ;;  %v6086_v56 = vld [vmem:[%s8441_s13 + $0x40] sm:$0xff] }
0x1f23   : > { %6805 = vmatmul.mubr.msk.f32.vlgmr.msra.gmra.mrb[36].mxu1 %vm871_vm4, %v8020_v54 }
0x1f24   : > { %6822 = vmatprep.mubr.msk.f32.mxu1 %vm1115_vm5, %v4935_v57  ;;  %v6087_v57 = vld [vmem:[%s8441_s13 + $0x48] sm:$0xff] }
0x1f28   : > { %v6817_v59 = vpop.f32.mrb[46].mxu0 }
0x1f29   : > { %v5102_v60 = vadd.f32 %v6817_v59, %v6061_v58  ;;  %v5096_v61 = vpop.f32.mrb[47].mxu0  ;;  %v7188_v59 = vpack.c.bf16 %v6087_v57, %v6086_v56  ;;  %v7410_v56 = vmov 0.0|0.0   ;;  %v5694_v57 = vld [vmem:[%s8449_s21 + $0x10] sm:$0xff] }
0x1f2a   : > { %v5097_v62 = vadd.f32 %v6061_v58, %v5096_v61  ;;  %v6088_v58 = vld [vmem:[%s8441_s13 + $0x50] sm:$0xff] }
0x1f2c   : > { %v7176_v0 = vpack.c.bf16 %v5102_v60, %v5097_v62  ;;  %v6089_v60 = vld [vmem:[%s8441_s13 + $0x58] sm:$0xff]  ;;  %v6090_v62 = vld [vmem:[%s8441_s13 + $0x60] sm:$0xff] }
0x1f2d   : > { %v7192_v61 = vpack.c.bf16 %v6089_v60, %v6088_v58  ;;  %v5695_v58 = vld [vmem:[%s8449_s21 + $0x18] sm:$0xff]  ;;  %v7412_v60 = vmov 0.0  }
0x1f2e   : > { %7177 = vmatprep.subr.bf16.mxu0 %v7176_v0 }
0x1f2f   : > { %7179 = vmatpush3.bf16.msra.mxu0 %v7176_v0  ;;  %v6091_v0 = vld [vmem:[%s8441_s13 + $0x68] sm:$0xff] }
0x1ff6   : > { %v6806_v63 = vpop.f32.mrb[36].mxu1 }
0x1ff7   : > { %v5021_v2 = vadd.f32 %v6806_v63, %v6058_v1  ;;  %v5015_v3 = vpop.f32.mrb[37].mxu1 }
0x1ff8   : > { %v5016_v4 = vadd.f32 %v6058_v1, %v5015_v3  ;;  %v7196_v1 = vpack.c.bf16 %v6091_v0, %v6090_v62 }
0x1ffa   : > { %v7170_v5 = vpack.c.bf16 %v5021_v2, %v5016_v4 }
0x1ffc   : > { %7172 = vmatprep.subr.msk.bf16.mxu1 %vm7665_vm6, %v7170_v5 }
0x1ffd   : > { %7175 = vmatpush3.bf16.xpose.msk.msra.mxu1 %vm7665_vm6, %v7170_v5 }
0x1ffe   : > { %6832 = vmatprep.subr.mxu1 %v5991_v21 }
0x2004   : > { %6823 = vmatmul.mubr.msk.f32.vlgmr.msra.gmra.mrb[38].mxu1 %vm1115_vm5, %v4940_v55  ;;  %v7184_v55 = vpack.c.bf16 %v6081_v52, %v6080_v51  ;;  %v5692_v51 = vld [vmem:[%s8449_s21] sm:$0xff]  ;;  %v5693_v52 = vld [vmem:[%s8449_s21 + $0x8] sm:$0xff] }
0x2005   : > { %6833 = vmatpush3.msra.mxu1 %v5991_v21 }
0x2006   : > { %7189 = vmatprep.subr.bf16.mxu1 %v7188_v59 }
0x20d7   : > { %v6824_v6 = vpop.f32.mrb[38].mxu1 }
0x20d8   : > { %v5193_v7 = vmul.f32 0.35355338, %v6824_v6  ;;  %v5183_v8 = vpop.f32.mrb[39].mxu1 }
0x20d9   : > { %v5192_v9 = vmul.f32 0.35355338, %v5183_v8  ;;  %v6076_v8 = vld [vmem:[%s8443_s15 + $0x1] ss:$0 sm:$0xff] }
0x20da   : > { %v5197_v10 = vsel %vm1205_vm7, %v5193_v7, -inf }
0x20db   : > { %5198 = vmax.xlane.f32.xlu1 %v5197_v10  ;;  %v5194_v11 = vsel %vm1205_vm7, %v5192_v9, -inf }
0x20dc   : > { %5195 = vmax.xlane.f32.xlu0 %v5194_v11 }
0x2168   : > { %v5199_v12 = vpop.xlane.xlu1 %5198 }
0x2169   : > { %v5201_v13 = vsub.f32 %v5193_v7, %v5199_v12  ;;  %v5196_v14 = vpop.xlane.xlu0 %5195  ;;  %v6077_v12 = vld [vmem:[%s8444_s16 + $0x1] ss:$0 sm:$0xff] }
0x216a   : > { %v5200_v15 = vsub.f32 %v5192_v9, %v5196_v14 }
0x216b   : > { %v5204_v16 = vmul.f32 1.442695, %v5201_v13 }
0x216c   : > { %v5202_v17 = vmul.f32 1.442695, %v5200_v15 }
0x216d   : > { %7329 = vpow2.f32 %v5204_v16 }
0x216e   : > { %7331 = vpow2.f32 %v5202_v17  ;;  %v6092_v17 = vld [vmem:[%s8441_s13 + $0x70] sm:$0xff] }
0x2177   : > { %v7330_v40 = vpop.eup %7329 }
0x2178   : > { %v7332_v18 = vpop.eup %7331  ;;  %v5209_v19 = vsel %vm1205_vm7, %v7330_v40, 0.0 }
0x2179   : > { %5210 = vadd.xlane.f32.xlu1 %v5209_v19  ;;  %v5206_v20 = vsel %vm1205_vm7, %v7332_v18, 0.0  ;;  %v6083_v19 = vld [vmem:[%s8440_s12 + $0x1] ss:$0 sm:$0xff] }
0x217a   : > { %5207 = vadd.xlane.f32.xlu0 %v5206_v20 }
0x2206   : > { %v5211_v22 = vpop.xlane.xlu1 %5210 }
0x2207   : > { %7333 = vrcp.f32 %v5211_v22  ;;  %v5208_v27 = vpop.xlane.xlu0 %5207 }
0x2208   : > { %7335 = vrcp.f32 %v5208_v27 }
0x2211   : > { %v7334_v26 = vpop.eup %7333 }
0x2212   : > { %v7336_v23 = vpop.eup %7335  ;;  %v5215_v25 = vmul.f32 %v7334_v26, %v7330_v40  ;;  %v6093_v40 = vld [vmem:[%s8441_s13 + $0x78] sm:$0xff] }
0x2213   : > { %v5214_v24 = vmul.f32 %v7336_v23, %v7332_v18  ;;  %v7200_v18 = vpack.c.bf16 %v6093_v40, %v6092_v17 }
0x2215   : > { %6829 = vmatprep.mubr.msk.f32.mxu0 %vm1205_vm7, %v5214_v24  ;;  %v6095_v24 = vld [vmem:[%s8442_s14 + $0x1] ss:$0 sm:$0xff] }
0x2216   : > { %6830 = vmatmul.mubr.msk.f32.vlgmr.msra.gmra.mrb[48].mxu0 %vm1205_vm7, %v5215_v25 }
0x22e9   : > { %v6831_v28 = vpop.f32.mrb[48].mxu0 }
0x22ea   : > { %v5288_v29 = vpop.f32.mrb[49].mxu0 }
0x22eb   : > { %6834 = vmatprep.mubr.msk.f32.mxu1 %vm1115_vm5, %v5288_v29 }
0x22ec   : > { %6835 = vmatmul.mubr.msk.f32.vlgmr.msra.gmra.mrb[30].mxu1 %vm1115_vm5, %v6831_v28 }
0x22ed   : > { %7191 = vmatpush3.bf16.msra.mxu1 %v7188_v59  ;;  %v7208_v59 = vpack.c.bf16 %v5695_v58, %v5694_v57 }
0x22ee   : > { %7193 = vmatprep.subr.bf16.mxu1 %v7192_v61 }
0x22f1   : > { %7195 = vmatpush3.bf16.msra.mxu1 %v7192_v61 }
0x22f2   : > { %7197 = vmatprep.subr.bf16.mxu1 %v7196_v1 }
0x22f5   : > { %7199 = vmatpush3.bf16.msra.mxu1 %v7196_v1 }
0x22f6   : > { %7201 = vmatprep.subr.bf16.mxu1 %v7200_v18 }
0x22f9   : > { %7203 = vmatpush3.bf16.msra.mxu1 %v7200_v18 }
0x23bf   : > { %v6836_v31 = vpop.f32.mrb[30].mxu1 }
0x23c0   : > { %v5389_v32 = vadd.f32 %v6836_v31, %v6073_v30  ;;  %v5369_v33 = vpop.f32.mrb[31].mxu1 }
0x23c1   : > { %v5388_v34 = vadd.f32 %v6073_v30, %v5369_v33 }
0x23c2   : > { %v5391_v35 = vadd.f32 %v5389_v32, %v8020_v54 }
0x23c3   : > { %v5390_v37 = vadd.f32 %v5388_v34, %v8018_v53  ;;  %v6078_v53 = vld [vmem:[%s8439_s11 + $0x20] sm:$0xff] }
0x23c4   : > { %v5399_v38 = vsel %vm871_vm4, %v5391_v35, 0.0  ;;  %v7180_v50 = vpack.c.bf16 %v6079_v49, %v6078_v53 }
0x23c5   : > { %5400 = vadd.xlane.f32.xlu1 %v5399_v38  ;;  %v5396_v36 = vsel %vm871_vm4, %v5390_v37, 0.0 }
0x23c6   : > { %5397 = vadd.xlane.f32.xlu0 %v5396_v36  ;;  %7181 = vmatprep.subr.bf16.mxu0 %v7180_v50 }
0x23c7   : > { %7183 = vmatpush3.bf16.msra.mxu0 %v7180_v50 }
0x23c8   : > { %7185 = vmatprep.subr.bf16.mxu0 %v7184_v55 }
0x23cb   : > { %7187 = vmatpush3.bf16.msra.mxu0 %v7184_v55  ;;  %v7205_v55 = vpack.c.bf16 %v5693_v52, %v5692_v51 }
0x23cc   : > { %7204 = vmatprep.subr.bf16.mxu0 %v7410_v56 }
0x2452   : > { %v5401_v39 = vpop.xlane.xlu1 %5400 }
0x2453   : > { %v5403_v41 = vmul.f32 0.03125, %v5401_v39  ;;  %v5398_v42 = vpop.xlane.xlu0 %5397 }
0x2454   : > { %v5402_v43 = vmul.f32 0.03125, %v5398_v42  ;;  %v6100_v42 = vld [vmem:[%s8445_s17 + $0x1] ss:$0 sm:$0xff] }
0x2455   : > { %v5405_v44 = vsub.f32 %v5391_v35, %v5403_v41 }
0x2456   : > { %v5404_v45 = vsub.f32 %v5390_v37, %v5402_v43 }
0x2457   : > { %v5407_v46 = vmul.f32 %v5405_v44, %v5405_v44 }
0x2458   : > { %v5406_v47 = vmul.f32 %v5404_v45, %v5404_v45 }
0x2459   : > { %v5411_v48 = vsel %vm871_vm4, %v5407_v46, 0.0 }
0x245a   : > { %5412 = vadd.xlane.f32.xlu1 %v5411_v48  ;;  %v5408_v54 = vsel %vm871_vm4, %v5406_v47, 0.0 }
0x245b   : > { %5409 = vadd.xlane.f32.xlu0 %v5408_v54 }
0x24e7   : > { %v5413_v63 = vpop.xlane.xlu1 %5412 }
0x24e8   : > { %v5415_v2 = vmul.f32 0.03125, %v5413_v63  ;;  %v5410_v3 = vpop.xlane.xlu0 %5409  ;;  %v6102_v63 = vld [vmem:[%s8447_s19] ss:$0 sm:$0xff] }
0x24e9   : > { %v5414_v4 = vmul.f32 0.03125, %v5410_v3  ;;  %v6103_v3 = vld [vmem:[%s8448_s20] ss:$0 sm:$0xff] }
0x24ea   : > { %v5417_v5 = vadd.f32 1e-05, %v5415_v2 }
0x24eb   : > { %v5416_v6 = vadd.f32 1e-05, %v5414_v4 }
0x24ec   : > { %7337 = vrsqrt.f32 %v5417_v5 }
0x24ed   : > { %7339 = vrsqrt.f32 %v5416_v6  ;;  %v6104_v6 = vld [vmem:[%s8507_s1] ss:$0 sm:$0xff]  ;;  %s7351_s1 = scalar_lea.vmem %s7350_s22, 128 }
0x24ee   : > { %p7353_p1 = scmp.lt.s32.totalorder %s7351_s1, %s7345_s3 }
0x24f0   : > { %p7354_p2 = por %p7353_p1, %p7352_p0 }
0x24f2   : > { %p7355_p3 = pnand %p7354_p2, %p7348_p13 }
0x24f6   : > { %v7338_v7 = vpop.eup %7337 }
0x24f7   : > { %v7340_v9 = vpop.eup %7339  ;;  %v5421_v10 = vmul.f32 %v7338_v7, %v5405_v44  ;;  %v6101_v44 = vld [vmem:[%s8446_s18 + $0x1] ss:$0 sm:$0xff] }
0x24f8   : > { %v5420_v11 = vmul.f32 %v7340_v9, %v5404_v45 }
0x24f9   : > { %v5429_v13 = vmul.f32 %v6076_v8, %v5421_v10 }
0x24fa   : > { %v5428_v14 = vmul.f32 %v6076_v8, %v5420_v11 }
0x24fb   : > { %v5437_v16 = vadd.f32 %v6077_v12, %v5429_v13 }
0x24fc   : > { %v5436_v15 = vadd.f32 %v6077_v12, %v5428_v14 }
0x24fe   : > { %6845 = vmatprep.mubr.msk.f32.mxu0 %vm871_vm4, %v5436_v15 }
0x24ff   : > { %6846 = vmatmul.mubr.msk.f32.vlgmr.msra.gmra.mrb[50].mxu0 %vm871_vm4, %v5437_v16 }
0x2500   : > { %7206 = vmatpush3.bf16.msra.mxu0 %v7205_v55  ;;  %6875 = vmatprep.mubr.msk.f32.mxu0 %vm7411_vm9, %v7412_v60 }
0x2501   : > { %7207 = vmatprep.subr.bf16.mxu0 %v7410_v56 }
0x2504   : > { %7209 = vmatpush3.bf16.msra.mxu0 %v7208_v59 }
0x25d2   : > { %v6847_v20 = vpop.f32.mrb[50].mxu0 }
0x25d3   : > { %v5529_v21 = vadd.f32 %v6847_v20, %v6083_v19  ;;  %v5523_v22 = vpop.f32.mrb[51].mxu0 }
0x25d4   : > { %v5524_v27 = vadd.f32 %v6083_v19, %v5523_v22 }
0x25d5   : > { %v5533_v23 = vmax.f32 %v5529_v21, 0.0 }
0x25d6   : > { %v5532_v26 = vmax.f32 %v5524_v27, 0.0 }
0x25d8   : > { %6864 = vmatprep.mubr.msk.f32.mxu1 %vm3107_vm8, %v5532_v26 }
0x25d9   : > { %6865 = vmatmul.mubr.msk.f32.vlgmr.msra.gmra.mrb[40].mxu1 %vm3107_vm8, %v5533_v23 }
0x26ac   : > { %v6866_v25 = vpop.f32.mrb[40].mxu1 }
0x26ad   : > { %v5623_v28 = vpop.f32.mrb[41].mxu1 }
0x26ae   : > { %v5624_v29 = vadd.f32 %v6095_v24, %v5623_v28 }
0x26b0   : > { %v5631_v30 = vadd.f32 %v5624_v29, %v5436_v15 }
0x26b2   : > { %v5636_v31 = vsel %vm871_vm4, %v5631_v30, 0.0 }
0x26b3   : > { %5637 = vadd.xlane.f32.xlu0 %v5636_v31 }
0x2740   : > { %v5638_v32 = vpop.xlane.xlu0 %5637 }
0x2741   : > { %v5639_v33 = vmul.f32 0.03125, %v5638_v32 }
0x2743   : > { %v5640_v34 = vsub.f32 %v5631_v30, %v5639_v33 }
0x2745   : > { %v5641_v35 = vmul.f32 %v5640_v34, %v5640_v34 }
0x2747   : > { %v5642_v37 = vsel %vm871_vm4, %v5641_v35, 0.0 }
0x2748   : > { %5643 = vadd.xlane.f32.xlu1 %v5642_v37 }
0x27d5   : > { %v5644_v38 = vpop.xlane.xlu1 %5643 }
0x27d6   : > { %v5645_v36 = vmul.f32 0.03125, %v5644_v38 }
0x27d8   : > { %v5646_v39 = vadd.f32 1e-05, %v5645_v36 }
0x27da   : > { %7341 = vrsqrt.f32 %v5646_v39 }
0x27e4   : > { %v7342_v41 = vpop.eup %7341 }
0x27e5   : > { %v5648_v43 = vmul.f32 %v7342_v41, %v5640_v34 }
0x27e7   : > { %v5655_v45 = vmul.f32 %v6100_v42, %v5648_v43 }
0x27e9   : > { %v5662_v46 = vadd.f32 %v6101_v44, %v5655_v45 }
0x27eb   : > { %v5665_v47 = vsel %vm871_vm4, %v5662_v46, 0.0 }
0x27ec   : > { %5666 = vadd.xlane.f32.xlu0 %v5665_v47 }
0x2879   : > { %v5667_v48 = vpop.xlane.xlu0 %5666 }
0x287a   : > { %v5668_v54 = vmul.f32 0.03125, %v5667_v48 }
0x287c   : > { %v5669_v53 = vsub.f32 %v5662_v46, %v5668_v54 }
0x287e   : > { %v5670_v49 = vmul.f32 %v5669_v53, %v5669_v53 }
0x2880   : > { %v5671_v50 = vsel %vm871_vm4, %v5670_v49, 0.0 }
0x2881   : > { %5672 = vadd.xlane.f32.xlu1 %v5671_v50 }
0x290e   : > { %v5673_v61 = vpop.xlane.xlu1 %5672 }
0x290f   : > { %v5674_v62 = vmul.f32 0.03125, %v5673_v61 }
0x2911   : > { %v5675_v0 = vadd.f32 1e-05, %v5674_v62 }
0x2913   : > { %7343 = vrsqrt.f32 %v5675_v0 }
0x291d   : > { %v7344_v1 = vpop.eup %7343 }
0x291e   : > { %v5677_v2 = vmul.f32 %v7344_v1, %v5669_v53 }
0x2920   : > { %v5684_v4 = vmul.f32 %v6102_v63, %v5677_v2 }
0x2922   : > { %v5691_v5 = vadd.f32 %v6103_v3, %v5684_v4 }
0x2924   : > { %6876 = vmatmul.mubr.msk.f32.vlgmr.msra.gmra.mrb[52].mxu0 %vm871_vm4, %v5691_v5 }
0x29f7   : > { %v5772_v7 = vpop.f32.mrb[52].mxu0 }
0x29f8   : > { %v5773_v8 = vadd.f32 %v6104_v6, %v5772_v7  ;;  %v6877_v9 = vpop.f32.mrb[53].mxu0 }
0x29fa   : > { %5777 = vst.msk [vmem:[%s703_s6] sm:$0xf] %vm5776_vm10, %v5773_v8 }
0x29fb   : > { %7358 = shalt.err (!%p7355_p3)
}
0x29fc   : > { %s7359_s6 = scalar_lea.hbm %s8386_s9, 64  ;;  %s7363_s29 = scalar_lea.hbm %s8509_s8, 128 }
0x29fd   : > { %p7360_p4 = scmp.ne.s32.totalorder %s8386_s9, %s7359_s6  ;;  %p7364_p9 = scmp.lt.u32.totalorder %s8386_s9, %s8509_s8 }
0x29fe   : > { %p7365_p10 = scmp.lt.u32.totalorder %s7363_s29, %s7359_s6  ;;  %p7367_p12 = scmp.lt.u32.totalorder %s7359_s6, %s8386_s9 }
0x29ff   : > { %p7361_p7 = pnand %p7360_p4, %p7572_p5 }
0x2a00   : > { %p7366_p11 = por %p7365_p10, %p7364_p9 }
0x2a01   : > { %p7362_p8 = pneg %p7361_p7 }
0x2a02   : > { %p7368_p13 = por %p7367_p12, %p7366_p11 }
0x2a04   : > { %p7369_p0 = pnand %p7368_p13, %p7362_p8 }
0x2a06   : > { %7372 = shalt.err (!%p7369_p0)
}
0x2a07   : > { %7222 = dma.vmem_to_hbm [thread:$0]  (%p7572_p5), %s8388_s7, 64, %s8386_s9, %s5779_s25  }
0x2a08 PF: > { %s8510_s3 = sld [smem:[#allocation7_spill]]  ;;  %s8511_s5 = sld [smem:[#allocation5_spill]] }
0x2a0e   : > { %p7228_p1 = scmp.ge.s32.totalorder %s8510_s3, 2  ;;  %s5804_s1 = sand.u32 1, %s8511_s5  }
0x2a0f   : > { %s5805_s2 = scalar_lea.sflag [#allocation3], %s5804_s1 }
0x2a10   : > { %p7225_p2 = pnand %p7228_p1, %p7576_p6 }
0x2a12   : > { %7390 = dma.done.wait (!%p7225_p2), %s5805_s2, 64  }
0x2a13   : > { %7392 = vsyncadd (!%p7225_p2), %s5805_s2, 4294967232  ;;  %s8513_s25 = sld [smem:[#allocation8_spill]]  ;;  %s8514_s6 = sld [smem:[#allocation6_spill]] }
0x2a14   : > { %s8515_s24 = sld [smem:[#allocation9_spill]]  ;;  %s8516_s4 = smov %s7399_s30 }
0x2a19   : > { %p33_p3 = scmp.ge.s32.totalorder %s8513_s25, 4   ;;  %s8517_s30 = smov %s8514_s6 }
0x2a1b   :  { %35 = sbr.rel (!%p33_p3) target bundleno = 16 (0x10), region = 163 }
0x2a22   :  { %5810 = vsyncpa [#allocation3], 1 }
0x2a23   :  { %5812 = vsyncpa [#allocation3 + $0x1], 1 }

</bundles_post_ra>
